<compile_context>
chip_gen: v7x
topology: tpu7x:2x2x1
jax: 0.10.0
libtpu: 0.0.40
codegen_flags: <defaults>
</compile_context>

<pallas_src>
import functools

import jax
import jax.numpy as jnp
import numpy as np
from jax.experimental import pallas as pl
from jax.experimental.pallas import tpu as pltpu


# ----------------------------------------------------------------------------- helpers
def _spec(shape):
    # whole-array block (shapes are tiny); grid=(1,) so index_map takes 1 arg.
    return pl.BlockSpec(shape, lambda *_: (0,) * len(shape))


# ----------------------------------------------------------------------------- fused decode kernel
def _decode_kernel(mem_ref, w_ih_ref, w_hh_ref, b_ref,
                   attn_wm_ref, hop_wm_ref, hop_wq_ref, hop_v_ref,
                   attn_wq_ref, attn_v_ref, init_h_ref, init_c_ref, init_i_ref,
                   sel_out_ref,
                   h_sc, c_sc, x_sc, mask_sc, done_sc, attn_feat_sc, hop_feat_sc,
                   *, n_hop):
    ns1, hidden = attn_feat_sc.shape          # ns1 = max_sent + 1 (stop slot)
    H = hidden
    max_sent = sel_out_ref.shape[0]           # number of decode steps

    # ---- prepare (fused): features + initial LSTM state + mask + done flag ----
    mem0 = mem_ref[...]
    attn_feat_sc[...] = jnp.dot(mem0, attn_wm_ref[...],
                                preferred_element_type=jnp.float32)
    hop_feat_sc[...] = jnp.dot(mem0, hop_wm_ref[...],
                               preferred_element_type=jnp.float32)
    h_sc[...] = init_h_ref[...]
    c_sc[...] = init_c_ref[...]
    x_sc[...] = init_i_ref[...]
    mask_sc[...] = jnp.zeros_like(mask_sc)
    done_sc[...] = jnp.zeros_like(done_sc)

    def _sigmoid(z):                          # EUP-friendly sigmoid (tanh slot)
        return 0.5 * jnp.tanh(0.5 * z) + 0.5

    def _step(step, carry):
        # ---------------- LSTM cell (PyTorch gate order: i, f, g, o) ----------------
        x = x_sc[...]                          # (1, Din)
        h = h_sc[...]                          # (1, H)
        c = c_sc[...]                          # (1, H)
        gates = (jnp.dot(x, w_ih_ref[...], preferred_element_type=jnp.float32)
                 + jnp.dot(h, w_hh_ref[...], preferred_element_type=jnp.float32)
                 + b_ref[...])                 # (1, 4H), bias pre-combined host-side
        i_g = _sigmoid(gates[:, 0 * H:1 * H])
        f_g = _sigmoid(gates[:, 1 * H:2 * H])
        g_g = jnp.tanh(gates[:, 2 * H:3 * H])
        o_g = _sigmoid(gates[:, 3 * H:4 * H])
        c_new = f_g * c + i_g * g_g
        h_new = o_g * jnp.tanh(c_new)
        h_sc[...] = h_new
        c_sc[...] = c_new

        # ---------------- n_hop glimpse attention (context vectors) ----------------
        hop_feat = hop_feat_sc[...]            # (Ns1, H)
        hop_v = hop_v_ref[...]                 # (1, H)
        query = h_new                          # (1, H)
        for _ in range(n_hop):                 # static unroll, n_hop is small
            proj = jnp.dot(query, hop_wq_ref[...],
                           preferred_element_type=jnp.float32)      # (1, H)
            s = jnp.tanh(hop_feat + proj)                            # (Ns1, H)
            sc = jnp.sum(s * hop_v, axis=-1, keepdims=True)          # (Ns1, 1)
            sc_max = jnp.max(sc, axis=0, keepdims=True)
            e = jnp.exp(sc - sc_max)
            wts = e / jnp.sum(e, axis=0, keepdims=True)              # softmax
            query = jnp.sum(wts * hop_feat, axis=0, keepdims=True)   # (1, H)

        # ---------------- masked unnormalized pointer scores ----------------
        proj = jnp.dot(query, attn_wq_ref[...], preferred_element_type=jnp.float32)
        s = jnp.tanh(attn_feat_sc[...] + proj)                       # (Ns1, H)
        score = jnp.sum(s * attn_v_ref[...], axis=-1, keepdims=True)  # (Ns1, 1)
        score = jnp.where(mask_sc[...] > 0.5, jnp.float32(-1000000.0), score)

        # ---------------- greedy selection: pure vector ops, no scalar extracts ----
        idx = jax.lax.broadcasted_iota(jnp.int32, (ns1, 1), 0).astype(jnp.float32)
        stop_idx = jnp.float32(max_sent)

        mx = jnp.max(score, axis=0, keepdims=True)
        am = jnp.min(jnp.where(score >= mx, idx, jnp.float32(ns1)),
                     axis=0, keepdims=True)              # first-occurrence argmax

        # best index excluding the stop slot (for the sent_num==0 special case)
        score2 = jnp.where(idx > stop_idx - 0.5, jnp.float32(-3.0e38), score)
        mx2 = jnp.max(score2, axis=0, keepdims=True)
        am2 = jnp.min(jnp.where(score2 >= mx2, idx, jnp.float32(ns1)),
                      axis=0, keepdims=True)

        step_v = jnp.full((1, 1), step, dtype=jnp.int32)
        first_v = step_v == 0                            # (1,1) bool
        picked_stop = am > stop_idx - 0.5                # (1,1) bool
        use_second = jnp.logical_and(picked_stop, first_v)
        stop_now = jnp.logical_and(picked_stop, jnp.logical_not(first_v))

        am_final = jnp.where(use_second, am2, am)        # (1,1)
        done_new = jnp.maximum(done_sc[...], jnp.where(stop_now, 1.0, 0.0))
        done_sc[...] = done_new

        onehot = jnp.where(jnp.abs(idx - am_final) < 0.5, 1.0, 0.0)  # (Ns1,1)
        sel = onehot * (1.0 - done_new)                  # zero row once stopped

        # per-step one-hot selection row (zero row == stop / already stopped)
        sel_out_ref[step] = sel
        # mask the newly extracted sentence (set, not add, like the reference)
        mask_sc[...] = jnp.maximum(mask_sc[...], sel)
        # lstm_in <- mem[ext]: one-hot weighted sum keeps the gather in vector land
        x_sc[...] = jnp.sum(sel * mem_ref[...], axis=0, keepdims=True)
        return carry

    jax.lax.fori_loop(0, max_sent, _step, 0, unroll=True)


# ----------------------------------------------------------------------------- wrapper
@functools.partial(jax.jit, static_argnames=("n_hop",))
def _fused_decode(attn_mem, params, *, n_hop):
    max_sent, din = attn_mem.shape[1], attn_mem.shape[2]
    hidden = params["attn_wm"].shape[1]
    ns1 = max_sent + 1
    f32 = jnp.float32

    mem = jnp.concatenate([attn_mem[0], params["stop"][None, :]], axis=0).astype(f32)
    w_ih_t = params["w_ih"].T.astype(f32)                       # (Din, 4H)
    w_hh_t = params["w_hh"].T.astype(f32)                       # (H, 4H)
    b = (params["b_ih"] + params["b_hh"])[None, :].astype(f32)  # combined bias
    hop_v = params["hop_v"][None, :].astype(f32)                # (1, H)
    attn_v = params["attn_v"][None, :].astype(f32)              # (1, H)
    init_i = params["init_i"][None, :].astype(f32)              # (1, Din)

    args = (mem, w_ih_t, w_hh_t, b,
            params["attn_wm"].astype(f32), params["hop_wm"].astype(f32),
            params["hop_wq"].astype(f32), hop_v,
            params["attn_wq"].astype(f32), attn_v,
            params["init_h"].astype(f32), params["init_c"].astype(f32), init_i)

    kernel = functools.partial(_decode_kernel, n_hop=n_hop)
    return pl.pallas_call(
        kernel,
        grid=(1,),
        in_specs=[_spec(a.shape) for a in args],
        out_specs=_spec((max_sent, ns1, 1)),
        out_shape=jax.ShapeDtypeStruct((max_sent, ns1, 1), jnp.float32),
        scratch_shapes=[
            pltpu.VMEM((1, hidden), jnp.float32),     # h
            pltpu.VMEM((1, hidden), jnp.float32),     # c
            pltpu.VMEM((1, din), jnp.float32),        # lstm input
            pltpu.VMEM((ns1, 1), jnp.float32),        # extracted-sentence mask
            pltpu.VMEM((1, 1), jnp.float32),          # stop/done flag
            pltpu.VMEM((ns1, hidden), jnp.float32),   # attn_feat (prepare, fused)
            pltpu.VMEM((ns1, hidden), jnp.float32),   # hop_feat  (prepare, fused)
        ],
        compiler_params=pltpu.CompilerParams(dimension_semantics=("arbitrary",)),
    )(*args)


def sc_extractor_forward(attn_mem, params, n_hop):
    """Greedy extraction (SCExtractorRL.forward). attn_mem: (1, max_sent, d_in)."""
    assert attn_mem.shape[0] == 1, "works only on single sample in RL setting"
    # TODO(synk): single-layer LSTM only (n_layer == 1), matching the RL use here.
    sel_rows = _fused_decode(attn_mem, params, n_hop=n_hop)
    jax.block_until_ready(sel_rows)
    # One device->host transfer for the whole decode; rows are one-hot per step,
    # an all-zero row means the stop embedding was selected (early break).
    rows = np.asarray(jax.device_get(sel_rows))[:, :, 0]       # (max_sent, ns1)
    extracts = []
    for row in rows:
        if row.max() < 0.5:
            break
        extracts.append(int(row.argmax()))
    return extracts


# ----------------------------------------------------------------------------- pure-JAX reference
def sc_extractor_forward_ref(attn_mem, params, n_hop):
    max_sent = attn_mem.shape[1]
    mem = jnp.concatenate([attn_mem[0], params["stop"][None, :]], axis=0)
    attn_feat = mem @ params["attn_wm"]
    hop_feat = mem @ params["hop_wm"]
    h, c = params["init_h"], params["init_c"]
    lstm_in = params["init_i"][None, :]
    H = h.shape[1]
    extracts = []
    for sent_num in range(max_sent):
        gates = (lstm_in @ params["w_ih"].T + params["b_ih"]
                 + h @ params["w_hh"].T + params["b_hh"])
        i_g = jax.nn.sigmoid(gates[:, 0 * H:1 * H])
        f_g = jax.nn.sigmoid(gates[:, 1 * H:2 * H])
        g_g = jnp.tanh(gates[:, 2 * H:3 * H])
        o_g = jax.nn.sigmoid(gates[:, 3 * H:4 * H])
        c = f_g * c + i_g * g_g
        h = o_g * jnp.tanh(c)
        query = h
        for _ in range(n_hop):
            s = jnp.tanh(hop_feat + query @ params["hop_wq"])
            sc = s @ params["hop_v"]
            w = jax.nn.softmax(sc)
            query = (w[:, None] * hop_feat).sum(axis=0, keepdims=True)
        s = jnp.tanh(attn_feat + query @ params["attn_wq"])
        score = s @ params["attn_v"]
        for e in extracts:
            score = score.at[e].set(-1000000.0)
        ext = int(jnp.argmax(score))
        if ext == max_sent and sent_num != 0:
            break
        if sent_num == 0 and ext == max_sent:
            ext = int(jax.lax.top_k(score, 2)[1][1])
        extracts.append(ext)
        lstm_in = mem[ext:ext + 1, :]
    return extracts


# ----------------------------------------------------------------------------- main
if __name__ == "__main__":
    B, MAX_SENT, DIN, H, NHOP = 1, 7, 32, 32, 2   # n_layer = 1

    key = jax.random.PRNGKey(0)
    keys = jax.random.split(key, 16)

    def rnd(k, shape, scale=0.1):
        return (scale * jax.random.normal(k, shape)).astype(jnp.float32)

    params = dict(
        init_h=rnd(keys[0], (1, H)),
        init_c=rnd(keys[1], (1, H)),
        init_i=rnd(keys[2], (DIN,)),
        attn_wm=rnd(keys[3], (DIN, H)),
        attn_wq=rnd(keys[4], (H, H)),
        attn_v=rnd(keys[5], (H,)),
        hop_wm=rnd(keys[6], (DIN, H)),
        hop_wq=rnd(keys[7], (H, H)),
        hop_v=rnd(keys[8], (H,)),
        stop=rnd(keys[9], (DIN,)),
        w_ih=rnd(keys[10], (4 * H, DIN)),
        w_hh=rnd(keys[11], (4 * H, H)),
        b_ih=rnd(keys[12], (4 * H,)),
        b_hh=rnd(keys[13], (4 * H,)),
    )
    attn_mem = rnd(keys[14], (B, MAX_SENT, DIN), scale=1.0)

    extracts = sc_extractor_forward(attn_mem, params, n_hop=NHOP)
    ref_extracts = sc_extractor_forward_ref(attn_mem, params, n_hop=NHOP)
    assert extracts == ref_extracts, (extracts, ref_extracts)
    assert 1 <= len(extracts) <= MAX_SENT
    print("KERNEL_OK")
</pallas_src>

<mosaic_0001>
module attributes {stable_mosaic.version = 11 : i64} {
  func.func @_decode_kernel(%arg0: i32, %arg1: memref<8x32xf32, #tpu.memory_space<vmem>>, %arg2: memref<32x128xf32, #tpu.memory_space<vmem>>, %arg3: memref<32x128xf32, #tpu.memory_space<vmem>>, %arg4: memref<1x128xf32, #tpu.memory_space<vmem>>, %arg5: memref<32x32xf32, #tpu.memory_space<vmem>>, %arg6: memref<32x32xf32, #tpu.memory_space<vmem>>, %arg7: memref<32x32xf32, #tpu.memory_space<vmem>>, %arg8: memref<1x32xf32, #tpu.memory_space<vmem>>, %arg9: memref<32x32xf32, #tpu.memory_space<vmem>>, %arg10: memref<1x32xf32, #tpu.memory_space<vmem>>, %arg11: memref<1x32xf32, #tpu.memory_space<vmem>>, %arg12: memref<1x32xf32, #tpu.memory_space<vmem>>, %arg13: memref<1x32xf32, #tpu.memory_space<vmem>>, %arg14: memref<7x8x1xf32, #tpu.memory_space<vmem>>, %arg15: memref<1x32xf32, #tpu.memory_space<vmem>>, %arg16: memref<1x32xf32, #tpu.memory_space<vmem>>, %arg17: memref<1x32xf32, #tpu.memory_space<vmem>>, %arg18: memref<8x1xf32, #tpu.memory_space<vmem>>, %arg19: memref<1x1xf32, #tpu.memory_space<vmem>>, %arg20: memref<8x32xf32, #tpu.memory_space<vmem>>, %arg21: memref<8x32xf32, #tpu.memory_space<vmem>>) attributes {dimension_semantics = [#tpu.dimension_semantics<arbitrary>], iteration_bounds = array<i64: 1>, scalar_prefetch = 0 : i64, scratch_operands = 7 : i64, tpu.core_type = #tpu.core_type<tc>, window_params = [{pipeline_mode = #tpu.pipeline_mode<synchronous>, transform_indices = @transform_0, window_bounds = array<i64: 8, 32>}, {pipeline_mode = #tpu.pipeline_mode<synchronous>, transform_indices = @transform_1, window_bounds = array<i64: 32, 128>}, {pipeline_mode = #tpu.pipeline_mode<synchronous>, transform_indices = @transform_2, window_bounds = array<i64: 32, 128>}, {pipeline_mode = #tpu.pipeline_mode<synchronous>, transform_indices = @transform_3, window_bounds = array<i64: 1, 128>}, {pipeline_mode = #tpu.pipeline_mode<synchronous>, transform_indices = @transform_4, window_bounds = array<i64: 32, 32>}, {pipeline_mode = #tpu.pipeline_mode<synchronous>, transform_indices = @transform_5, window_bounds = array<i64: 32, 32>}, {pipeline_mode = #tpu.pipeline_mode<synchronous>, transform_indices = @transform_6, window_bounds = array<i64: 32, 32>}, {pipeline_mode = #tpu.pipeline_mode<synchronous>, transform_indices = @transform_7, window_bounds = array<i64: 1, 32>}, {pipeline_mode = #tpu.pipeline_mode<synchronous>, transform_indices = @transform_8, window_bounds = array<i64: 32, 32>}, {pipeline_mode = #tpu.pipeline_mode<synchronous>, transform_indices = @transform_9, window_bounds = array<i64: 1, 32>}, {pipeline_mode = #tpu.pipeline_mode<synchronous>, transform_indices = @transform_10, window_bounds = array<i64: 1, 32>}, {pipeline_mode = #tpu.pipeline_mode<synchronous>, transform_indices = @transform_11, window_bounds = array<i64: 1, 32>}, {pipeline_mode = #tpu.pipeline_mode<synchronous>, transform_indices = @transform_12, window_bounds = array<i64: 1, 32>}, {pipeline_mode = #tpu.pipeline_mode<synchronous>, transform_indices = @transform_13, window_bounds = array<i64: 7, 8, 1>}]} {
    %c0 = arith.constant 0 : index
    %c0_0 = arith.constant 0 : index
    %0 = vector.load %arg1[%c0, %c0_0] : memref<8x32xf32, #tpu.memory_space<vmem>>, vector<8x32xf32>
    %c0_1 = arith.constant 0 : index
    %c0_2 = arith.constant 0 : index
    %1 = vector.load %arg5[%c0_1, %c0_2] : memref<32x32xf32, #tpu.memory_space<vmem>>, vector<32x32xf32>
    %cst = arith.constant dense<0.000000e+00> : vector<8x32xf32>
    %2 = tpu.matmul %0, %1, %cst {dimension_numbers = #tpu.dot_dimension_numbers<[1], [0], [0], [1], [0, 0, 1, 1], [], []>} : vector<8x32xf32>, vector<32x32xf32>, vector<8x32xf32> -> vector<8x32xf32>
    %c0_3 = arith.constant 0 : index
    %c0_4 = arith.constant 0 : index
    %3 = vector.load %arg20[%c0_3, %c0_4] : memref<8x32xf32, #tpu.memory_space<vmem>>, vector<8x32xf32>
    tpu.vector_store %arg20[%c0_3, %c0_4], %2 {strides = array<i32>} : memref<8x32xf32, #tpu.memory_space<vmem>>, vector<8x32xf32>,
    %c0_5 = arith.constant 0 : index
    %c0_6 = arith.constant 0 : index
    %4 = vector.load %arg6[%c0_5, %c0_6] : memref<32x32xf32, #tpu.memory_space<vmem>>, vector<32x32xf32>
    %cst_7 = arith.constant dense<0.000000e+00> : vector<8x32xf32>
    %5 = tpu.matmul %0, %4, %cst_7 {dimension_numbers = #tpu.dot_dimension_numbers<[1], [0], [0], [1], [0, 0, 1, 1], [], []>} : vector<8x32xf32>, vector<32x32xf32>, vector<8x32xf32> -> vector<8x32xf32>
    %c0_8 = arith.constant 0 : index
    %c0_9 = arith.constant 0 : index
    %6 = vector.load %arg21[%c0_8, %c0_9] : memref<8x32xf32, #tpu.memory_space<vmem>>, vector<8x32xf32>
    tpu.vector_store %arg21[%c0_8, %c0_9], %5 {strides = array<i32>} : memref<8x32xf32, #tpu.memory_space<vmem>>, vector<8x32xf32>,
    %c0_10 = arith.constant 0 : index
    %c0_11 = arith.constant 0 : index
    %7 = vector.load %arg11[%c0_10, %c0_11] : memref<1x32xf32, #tpu.memory_space<vmem>>, vector<1x32xf32>
    %c0_12 = arith.constant 0 : index
    %c0_13 = arith.constant 0 : index
    %8 = vector.load %arg15[%c0_12, %c0_13] : memref<1x32xf32, #tpu.memory_space<vmem>>, vector<1x32xf32>
    tpu.vector_store %arg15[%c0_12, %c0_13], %7 {strides = array<i32>} : memref<1x32xf32, #tpu.memory_space<vmem>>, vector<1x32xf32>,
    %c0_14 = arith.constant 0 : index
    %c0_15 = arith.constant 0 : index
    %9 = vector.load %arg12[%c0_14, %c0_15] : memref<1x32xf32, #tpu.memory_space<vmem>>, vector<1x32xf32>
    %c0_16 = arith.constant 0 : index
    %c0_17 = arith.constant 0 : index
    %10 = vector.load %arg16[%c0_16, %c0_17] : memref<1x32xf32, #tpu.memory_space<vmem>>, vector<1x32xf32>
    tpu.vector_store %arg16[%c0_16, %c0_17], %9 {strides = array<i32>} : memref<1x32xf32, #tpu.memory_space<vmem>>, vector<1x32xf32>,
    %c0_18 = arith.constant 0 : index
    %c0_19 = arith.constant 0 : index
    %11 = vector.load %arg13[%c0_18, %c0_19] : memref<1x32xf32, #tpu.memory_space<vmem>>, vector<1x32xf32>
    %c0_20 = arith.constant 0 : index
    %c0_21 = arith.constant 0 : index
    %12 = vector.load %arg17[%c0_20, %c0_21] : memref<1x32xf32, #tpu.memory_space<vmem>>, vector<1x32xf32>
    tpu.vector_store %arg17[%c0_20, %c0_21], %11 {strides = array<i32>} : memref<1x32xf32, #tpu.memory_space<vmem>>, vector<1x32xf32>,
    %cst_22 = arith.constant 0.000000e+00 : f32
    %13 = vector.broadcast %cst_22 : f32 to vector<8x1xf32>
    %c0_23 = arith.constant 0 : index
    %c0_24 = arith.constant 0 : index
    %14 = vector.load %arg18[%c0_23, %c0_24] : memref<8x1xf32, #tpu.memory_space<vmem>>, vector<8x1xf32>
    tpu.vector_store %arg18[%c0_23, %c0_24], %13 {strides = array<i32>} : memref<8x1xf32, #tpu.memory_space<vmem>>, vector<8x1xf32>,
    %cst_25 = arith.constant 0.000000e+00 : f32
    %15 = vector.broadcast %cst_25 : f32 to vector<1x1xf32>
    %c0_26 = arith.constant 0 : index
    %c0_27 = arith.constant 0 : index
    %16 = vector.load %arg19[%c0_26, %c0_27] : memref<1x1xf32, #tpu.memory_space<vmem>>, vector<1x1xf32>
    tpu.vector_store %arg19[%c0_26, %c0_27], %15 {strides = array<i32>} : memref<1x1xf32, #tpu.memory_space<vmem>>, vector<1x1xf32>,
    %c0_i32 = arith.constant 0 : i32
    %c0_28 = arith.constant 0 : index
    %c0_29 = arith.constant 0 : index
    %17 = vector.load %arg17[%c0_28, %c0_29] : memref<1x32xf32, #tpu.memory_space<vmem>>, vector<1x32xf32>
    %c0_30 = arith.constant 0 : index
    %c0_31 = arith.constant 0 : index
    %18 = vector.load %arg15[%c0_30, %c0_31] : memref<1x32xf32, #tpu.memory_space<vmem>>, vector<1x32xf32>
    %c0_32 = arith.constant 0 : index
    %c0_33 = arith.constant 0 : index
    %19 = vector.load %arg16[%c0_32, %c0_33] : memref<1x32xf32, #tpu.memory_space<vmem>>, vector<1x32xf32>
    %c0_34 = arith.constant 0 : index
    %c0_35 = arith.constant 0 : index
    %20 = vector.load %arg2[%c0_34, %c0_35] : memref<32x128xf32, #tpu.memory_space<vmem>>, vector<32x128xf32>
    %cst_36 = arith.constant dense<0.000000e+00> : vector<1x128xf32>
    %21 = tpu.matmul %17, %20, %cst_36 {dimension_numbers = #tpu.dot_dimension_numbers<[1], [0], [0], [1], [0, 0, 1, 1], [], []>} : vector<1x32xf32>, vector<32x128xf32>, vector<1x128xf32> -> vector<1x128xf32>
    %c0_37 = arith.constant 0 : index
    %c0_38 = arith.constant 0 : index
    %22 = vector.load %arg3[%c0_37, %c0_38] : memref<32x128xf32, #tpu.memory_space<vmem>>, vector<32x128xf32>
    %cst_39 = arith.constant dense<0.000000e+00> : vector<1x128xf32>
    %23 = tpu.matmul %18, %22, %cst_39 {dimension_numbers = #tpu.dot_dimension_numbers<[1], [0], [0], [1], [0, 0, 1, 1], [], []>} : vector<1x32xf32>, vector<32x128xf32>, vector<1x128xf32> -> vector<1x128xf32>
    %24 = arith.addf %21, %23 : vector<1x128xf32>
    %c0_40 = arith.constant 0 : index
    %c0_41 = arith.constant 0 : index
    %25 = vector.load %arg4[%c0_40, %c0_41] : memref<1x128xf32, #tpu.memory_space<vmem>>, vector<1x128xf32>
    %26 = arith.addf %24, %25 : vector<1x128xf32>
    %27 = vector.extract_strided_slice %26 {offsets = [0, 0], sizes = [1, 32], strides = [1, 1]} : vector<1x128xf32> to vector<1x32xf32>
    %cst_42 = arith.constant 5.000000e-01 : f32
    %28 = vector.broadcast %cst_42 : f32 to vector<1x32xf32>
    %29 = arith.mulf %28, %27 : vector<1x32xf32>
    %30 = math.tanh %29 : vector<1x32xf32>
    %cst_43 = arith.constant 5.000000e-01 : f32
    %31 = vector.broadcast %cst_43 : f32 to vector<1x32xf32>
    %32 = arith.mulf %31, %30 : vector<1x32xf32>
    %cst_44 = arith.constant 5.000000e-01 : f32
    %33 = vector.broadcast %cst_44 : f32 to vector<1x32xf32>
    %34 = arith.addf %32, %33 : vector<1x32xf32>
    %35 = vector.extract_strided_slice %26 {offsets = [0, 32], sizes = [1, 32], strides = [1, 1]} : vector<1x128xf32> to vector<1x32xf32>
    %cst_45 = arith.constant 5.000000e-01 : f32
    %36 = vector.broadcast %cst_45 : f32 to vector<1x32xf32>
    %37 = arith.mulf %36, %35 : vector<1x32xf32>
    %38 = math.tanh %37 : vector<1x32xf32>
    %cst_46 = arith.constant 5.000000e-01 : f32
    %39 = vector.broadcast %cst_46 : f32 to vector<1x32xf32>
    %40 = arith.mulf %39, %38 : vector<1x32xf32>
    %cst_47 = arith.constant 5.000000e-01 : f32
    %41 = vector.broadcast %cst_47 : f32 to vector<1x32xf32>
    %42 = arith.addf %40, %41 : vector<1x32xf32>
    %43 = vector.extract_strided_slice %26 {offsets = [0, 64], sizes = [1, 32], strides = [1, 1]} : vector<1x128xf32> to vector<1x32xf32>
    %44 = math.tanh %43 : vector<1x32xf32>
    %45 = vector.extract_strided_slice %26 {offsets = [0, 96], sizes = [1, 32], strides = [1, 1]} : vector<1x128xf32> to vector<1x32xf32>
    %cst_48 = arith.constant 5.000000e-01 : f32
    %46 = vector.broadcast %cst_48 : f32 to vector<1x32xf32>
    %47 = arith.mulf %46, %45 : vector<1x32xf32>
    %48 = math.tanh %47 : vector<1x32xf32>
    %cst_49 = arith.constant 5.000000e-01 : f32
    %49 = vector.broadcast %cst_49 : f32 to vector<1x32xf32>
    %50 = arith.mulf %49, %48 : vector<1x32xf32>
    %cst_50 = arith.constant 5.000000e-01 : f32
    %51 = vector.broadcast %cst_50 : f32 to vector<1x32xf32>
    %52 = arith.addf %50, %51 : vector<1x32xf32>
    %53 = arith.mulf %42, %19 : vector<1x32xf32>
    %54 = arith.mulf %34, %44 : vector<1x32xf32>
    %55 = arith.addf %53, %54 : vector<1x32xf32>
    %56 = math.tanh %55 : vector<1x32xf32>
    %57 = arith.mulf %52, %56 : vector<1x32xf32>
    %c0_51 = arith.constant 0 : index
    %c0_52 = arith.constant 0 : index
    %58 = vector.load %arg15[%c0_51, %c0_52] : memref<1x32xf32, #tpu.memory_space<vmem>>, vector<1x32xf32>
    tpu.vector_store %arg15[%c0_51, %c0_52], %57 {strides = array<i32>} : memref<1x32xf32, #tpu.memory_space<vmem>>, vector<1x32xf32>,
    %c0_53 = arith.constant 0 : index
    %c0_54 = arith.constant 0 : index
    %59 = vector.load %arg16[%c0_53, %c0_54] : memref<1x32xf32, #tpu.memory_space<vmem>>, vector<1x32xf32>
    tpu.vector_store %arg16[%c0_53, %c0_54], %55 {strides = array<i32>} : memref<1x32xf32, #tpu.memory_space<vmem>>, vector<1x32xf32>,
    %c0_55 = arith.constant 0 : index
    %c0_56 = arith.constant 0 : index
    %60 = vector.load %arg21[%c0_55, %c0_56] : memref<8x32xf32, #tpu.memory_space<vmem>>, vector<8x32xf32>
    %c0_57 = arith.constant 0 : index
    %c0_58 = arith.constant 0 : index
    %61 = vector.load %arg8[%c0_57, %c0_58] : memref<1x32xf32, #tpu.memory_space<vmem>>, vector<1x32xf32>
    %c0_59 = arith.constant 0 : index
    %c0_60 = arith.constant 0 : index
    %62 = vector.load %arg7[%c0_59, %c0_60] : memref<32x32xf32, #tpu.memory_space<vmem>>, vector<32x32xf32>
    %cst_61 = arith.constant dense<0.000000e+00> : vector<1x32xf32>
    %63 = tpu.matmul %57, %62, %cst_61 {dimension_numbers = #tpu.dot_dimension_numbers<[1], [0], [0], [1], [0, 0, 1, 1], [], []>} : vector<1x32xf32>, vector<32x32xf32>, vector<1x32xf32> -> vector<1x32xf32>
    %64 = vector.broadcast %63 : vector<1x32xf32> to vector<8x32xf32>
    %65 = arith.addf %60, %64 : vector<8x32xf32>
    %66 = math.tanh %65 : vector<8x32xf32>
    %67 = vector.broadcast %61 : vector<1x32xf32> to vector<8x32xf32>
    %68 = arith.mulf %66, %67 : vector<8x32xf32>
    %cst_62 = arith.constant dense<0.000000e+00> : vector<8xf32>
    %69 = vector.multi_reduction <add>, %68, %cst_62 [1] : vector<8x32xf32> to vector<8xf32>
    %70 = vector.shape_cast %69 : vector<8xf32> to vector<8x1xf32>
    %cst_63 = arith.constant dense<0xFF800000> : vector<1xf32>
    %71 = vector.multi_reduction <maximumf>, %70, %cst_63 [0] : vector<8x1xf32> to vector<1xf32>
    %72 = vector.shape_cast %71 : vector<1xf32> to vector<1x1xf32>
    %73 = vector.broadcast %72 : vector<1x1xf32> to vector<8x1xf32>
    %74 = arith.subf %70, %73 : vector<8x1xf32>
    %75 = math.exp %74 : vector<8x1xf32>
    %cst_64 = arith.constant dense<0.000000e+00> : vector<1xf32>
    %76 = vector.multi_reduction <add>, %75, %cst_64 [0] : vector<8x1xf32> to vector<1xf32>
    %77 = vector.shape_cast %76 : vector<1xf32> to vector<1x1xf32>
    %78 = vector.broadcast %77 : vector<1x1xf32> to vector<8x1xf32>
    %79 = arith.divf %75, %78 : vector<8x1xf32>
    %80 = vector.broadcast %79 : vector<8x1xf32> to vector<8x32xf32>
    %81 = arith.mulf %80, %60 : vector<8x32xf32>
    %cst_65 = arith.constant dense<0.000000e+00> : vector<32xf32>
    %82 = vector.multi_reduction <add>, %81, %cst_65 [0] : vector<8x32xf32> to vector<32xf32>
    %83 = vector.shape_cast %82 : vector<32xf32> to vector<1x32xf32>
    %c0_66 = arith.constant 0 : index
    %c0_67 = arith.constant 0 : index
    %84 = vector.load %arg7[%c0_66, %c0_67] : memref<32x32xf32, #tpu.memory_space<vmem>>, vector<32x32xf32>
    %cst_68 = arith.constant dense<0.000000e+00> : vector<1x32xf32>
    %85 = tpu.matmul %83, %84, %cst_68 {dimension_numbers = #tpu.dot_dimension_numbers<[1], [0], [0], [1], [0, 0, 1, 1], [], []>} : vector<1x32xf32>, vector<32x32xf32>, vector<1x32xf32> -> vector<1x32xf32>
    %86 = vector.broadcast %85 : vector<1x32xf32> to vector<8x32xf32>
    %87 = arith.addf %60, %86 : vector<8x32xf32>
    %88 = math.tanh %87 : vector<8x32xf32>
    %89 = vector.broadcast %61 : vector<1x32xf32> to vector<8x32xf32>
    %90 = arith.mulf %88, %89 : vector<8x32xf32>
    %cst_69 = arith.constant dense<0.000000e+00> : vector<8xf32>
    %91 = vector.multi_reduction <add>, %90, %cst_69 [1] : vector<8x32xf32> to vector<8xf32>
    %92 = vector.shape_cast %91 : vector<8xf32> to vector<8x1xf32>
    %cst_70 = arith.constant dense<0xFF800000> : vector<1xf32>
    %93 = vector.multi_reduction <maximumf>, %92, %cst_70 [0] : vector<8x1xf32> to vector<1xf32>
    %94 = vector.shape_cast %93 : vector<1xf32> to vector<1x1xf32>
    %95 = vector.broadcast %94 : vector<1x1xf32> to vector<8x1xf32>
    %96 = arith.subf %92, %95 : vector<8x1xf32>
    %97 = math.exp %96 : vector<8x1xf32>
    %cst_71 = arith.constant dense<0.000000e+00> : vector<1xf32>
    %98 = vector.multi_reduction <add>, %97, %cst_71 [0] : vector<8x1xf32> to vector<1xf32>
    %99 = vector.shape_cast %98 : vector<1xf32> to vector<1x1xf32>
    %100 = vector.broadcast %99 : vector<1x1xf32> to vector<8x1xf32>
    %101 = arith.divf %97, %100 : vector<8x1xf32>
    %102 = vector.broadcast %101 : vector<8x1xf32> to vector<8x32xf32>
    %103 = arith.mulf %102, %60 : vector<8x32xf32>
    %cst_72 = arith.constant dense<0.000000e+00> : vector<32xf32>
    %104 = vector.multi_reduction <add>, %103, %cst_72 [0] : vector<8x32xf32> to vector<32xf32>
    %105 = vector.shape_cast %104 : vector<32xf32> to vector<1x32xf32>
    %c0_73 = arith.constant 0 : index
    %c0_74 = arith.constant 0 : index
    %106 = vector.load %arg9[%c0_73, %c0_74] : memref<32x32xf32, #tpu.memory_space<vmem>>, vector<32x32xf32>
    %cst_75 = arith.constant dense<0.000000e+00> : vector<1x32xf32>
    %107 = tpu.matmul %105, %106, %cst_75 {dimension_numbers = #tpu.dot_dimension_numbers<[1], [0], [0], [1], [0, 0, 1, 1], [], []>} : vector<1x32xf32>, vector<32x32xf32>, vector<1x32xf32> -> vector<1x32xf32>
    %c0_76 = arith.constant 0 : index
    %c0_77 = arith.constant 0 : index
    %108 = vector.load %arg20[%c0_76, %c0_77] : memref<8x32xf32, #tpu.memory_space<vmem>>, vector<8x32xf32>
    %109 = vector.broadcast %107 : vector<1x32xf32> to vector<8x32xf32>
    %110 = arith.addf %108, %109 : vector<8x32xf32>
    %111 = math.tanh %110 : vector<8x32xf32>
    %c0_78 = arith.constant 0 : index
    %c0_79 = arith.constant 0 : index
    %112 = vector.load %arg10[%c0_78, %c0_79] : memref<1x32xf32, #tpu.memory_space<vmem>>, vector<1x32xf32>
    %113 = vector.broadcast %112 : vector<1x32xf32> to vector<8x32xf32>
    %114 = arith.mulf %111, %113 : vector<8x32xf32>
    %cst_80 = arith.constant dense<0.000000e+00> : vector<8xf32>
    %115 = vector.multi_reduction <add>, %114, %cst_80 [1] : vector<8x32xf32> to vector<8xf32>
    %116 = vector.shape_cast %115 : vector<8xf32> to vector<8x1xf32>
    %c0_81 = arith.constant 0 : index
    %c0_82 = arith.constant 0 : index
    %117 = vector.load %arg18[%c0_81, %c0_82] : memref<8x1xf32, #tpu.memory_space<vmem>>, vector<8x1xf32>
    %cst_83 = arith.constant 5.000000e-01 : f32
    %118 = vector.broadcast %cst_83 : f32 to vector<8x1xf32>
    %119 = arith.cmpf ogt, %117, %118 : vector<8x1xf32>
    %cst_84 = arith.constant -1.000000e+06 : f32
    %120 = vector.broadcast %cst_84 : f32 to vector<8x1xf32>
    %121 = arith.select %119, %120, %116 : vector<8x1xi1>, vector<8x1xf32>
    %122 = tpu.iota {dimensions = array<i32: 0>} : vector<8x1xi32>
    %123 = arith.sitofp %122 : vector<8x1xi32> to vector<8x1xf32>
    %cst_85 = arith.constant dense<0xFF800000> : vector<1xf32>
    %124 = vector.multi_reduction <maximumf>, %121, %cst_85 [0] : vector<8x1xf32> to vector<1xf32>
    %125 = vector.shape_cast %124 : vector<1xf32> to vector<1x1xf32>
    %126 = vector.broadcast %125 : vector<1x1xf32> to vector<8x1xf32>
    %127 = arith.cmpf oge, %121, %126 : vector<8x1xf32>
    %cst_86 = arith.constant 8.000000e+00 : f32
    %128 = vector.broadcast %cst_86 : f32 to vector<8x1xf32>
    %129 = arith.select %127, %123, %128 : vector<8x1xi1>, vector<8x1xf32>
    %cst_87 = arith.constant dense<0x7F800000> : vector<1xf32>
    %130 = vector.multi_reduction <minimumf>, %129, %cst_87 [0] : vector<8x1xf32> to vector<1xf32>
    %131 = vector.shape_cast %130 : vector<1xf32> to vector<1x1xf32>
    %cst_88 = arith.constant 7.000000e+00 : f32
    %cst_89 = arith.constant 5.000000e-01 : f32
    %132 = arith.subf %cst_88, %cst_89 : f32
    %133 = vector.broadcast %132 : f32 to vector<8x1xf32>
    %134 = arith.cmpf ogt, %123, %133 : vector<8x1xf32>
    %cst_90 = arith.constant -3.000000e+38 : f32
    %135 = vector.broadcast %cst_90 : f32 to vector<8x1xf32>
    %136 = arith.select %134, %135, %121 : vector<8x1xi1>, vector<8x1xf32>
    %cst_91 = arith.constant dense<0xFF800000> : vector<1xf32>
    %137 = vector.multi_reduction <maximumf>, %136, %cst_91 [0] : vector<8x1xf32> to vector<1xf32>
    %138 = vector.shape_cast %137 : vector<1xf32> to vector<1x1xf32>
    %139 = vector.broadcast %138 : vector<1x1xf32> to vector<8x1xf32>
    %140 = arith.cmpf oge, %136, %139 : vector<8x1xf32>
    %cst_92 = arith.constant 8.000000e+00 : f32
    %141 = vector.broadcast %cst_92 : f32 to vector<8x1xf32>
    %142 = arith.select %140, %123, %141 : vector<8x1xi1>, vector<8x1xf32>
    %cst_93 = arith.constant dense<0x7F800000> : vector<1xf32>
    %143 = vector.multi_reduction <minimumf>, %142, %cst_93 [0] : vector<8x1xf32> to vector<1xf32>
    %144 = vector.shape_cast %143 : vector<1xf32> to vector<1x1xf32>
    %145 = vector.broadcast %c0_i32 : i32 to vector<1x1xi32>
    %c0_i32_94 = arith.constant 0 : i32
    %146 = vector.broadcast %c0_i32_94 : i32 to vector<1x1xi32>
    %147 = arith.cmpi eq, %145, %146 : vector<1x1xi32>
    %cst_95 = arith.constant 7.000000e+00 : f32
    %cst_96 = arith.constant 5.000000e-01 : f32
    %148 = arith.subf %cst_95, %cst_96 : f32
    %149 = vector.broadcast %148 : f32 to vector<1x1xf32>
    %150 = arith.cmpf ogt, %131, %149 : vector<1x1xf32>
    %151 = arith.andi %150, %147 : vector<1x1xi1>
    %cst_97 = arith.constant dense<true> : vector<1x1xi1>
    %152 = arith.xori %147, %cst_97 : vector<1x1xi1>
    %153 = arith.andi %150, %152 : vector<1x1xi1>
    %154 = arith.select %151, %144, %131 : vector<1x1xi1>, vector<1x1xf32>
    %c0_98 = arith.constant 0 : index
    %c0_99 = arith.constant 0 : index
    %155 = vector.load %arg19[%c0_98, %c0_99] : memref<1x1xf32, #tpu.memory_space<vmem>>, vector<1x1xf32>
    %cst_100 = arith.constant 1.000000e+00 : f32
    %cst_101 = arith.constant 0.000000e+00 : f32
    %156 = vector.broadcast %cst_100 : f32 to vector<1x1xf32>
    %157 = vector.broadcast %cst_101 : f32 to vector<1x1xf32>
    %158 = arith.select %153, %156, %157 : vector<1x1xi1>, vector<1x1xf32>
    %159 = arith.maximumf %155, %158 : vector<1x1xf32>
    %c0_102 = arith.constant 0 : index
    %c0_103 = arith.constant 0 : index
    %160 = vector.load %arg19[%c0_102, %c0_103] : memref<1x1xf32, #tpu.memory_space<vmem>>, vector<1x1xf32>
    tpu.vector_store %arg19[%c0_102, %c0_103], %159 {strides = array<i32>} : memref<1x1xf32, #tpu.memory_space<vmem>>, vector<1x1xf32>,
    %161 = vector.broadcast %154 : vector<1x1xf32> to vector<8x1xf32>
    %162 = arith.subf %123, %161 : vector<8x1xf32>
    %163 = math.absf %162 : vector<8x1xf32>
    %cst_104 = arith.constant 5.000000e-01 : f32
    %164 = vector.broadcast %cst_104 : f32 to vector<8x1xf32>
    %165 = arith.cmpf olt, %163, %164 : vector<8x1xf32>
    %cst_105 = arith.constant 1.000000e+00 : f32
    %cst_106 = arith.constant 0.000000e+00 : f32
    %166 = vector.broadcast %cst_105 : f32 to vector<8x1xf32>
    %167 = vector.broadcast %cst_106 : f32 to vector<8x1xf32>
    %168 = arith.select %165, %166, %167 : vector<8x1xi1>, vector<8x1xf32>
    %cst_107 = arith.constant 1.000000e+00 : f32
    %169 = vector.broadcast %cst_107 : f32 to vector<1x1xf32>
    %170 = arith.subf %169, %159 : vector<1x1xf32>
    %171 = vector.broadcast %170 : vector<1x1xf32> to vector<8x1xf32>
    %172 = arith.mulf %168, %171 : vector<8x1xf32>
    %173 = arith.index_cast %c0_i32 : i32 to index
    %c0_108 = arith.constant 0 : index
    %c0_109 = arith.constant 0 : index
    %174 = vector.load %arg14[%173, %c0_108, %c0_109] : memref<7x8x1xf32, #tpu.memory_space<vmem>>, vector<1x8x1xf32>
    %175 = vector.shape_cast %174 : vector<1x8x1xf32> to vector<8x1xf32>
    %176 = vector.shape_cast %172 : vector<8x1xf32> to vector<1x8x1xf32>
    tpu.vector_store %arg14[%173, %c0_108, %c0_109], %176 {strides = array<i32>} : memref<7x8x1xf32, #tpu.memory_space<vmem>>, vector<1x8x1xf32>,
    %c0_110 = arith.constant 0 : index
    %c0_111 = arith.constant 0 : index
    %177 = vector.load %arg18[%c0_110, %c0_111] : memref<8x1xf32, #tpu.memory_space<vmem>>, vector<8x1xf32>
    %178 = arith.maximumf %177, %172 : vector<8x1xf32>
    %c0_112 = arith.constant 0 : index
    %c0_113 = arith.constant 0 : index
    %179 = vector.load %arg18[%c0_112, %c0_113] : memref<8x1xf32, #tpu.memory_space<vmem>>, vector<8x1xf32>
    tpu.vector_store %arg18[%c0_112, %c0_113], %178 {strides = array<i32>} : memref<8x1xf32, #tpu.memory_space<vmem>>, vector<8x1xf32>,
    %c0_114 = arith.constant 0 : index
    %c0_115 = arith.constant 0 : index
    %180 = vector.load %arg1[%c0_114, %c0_115] : memref<8x32xf32, #tpu.memory_space<vmem>>, vector<8x32xf32>
    %181 = vector.broadcast %172 : vector<8x1xf32> to vector<8x32xf32>
    %182 = arith.mulf %181, %180 : vector<8x32xf32>
    %cst_116 = arith.constant dense<0.000000e+00> : vector<32xf32>
    %183 = vector.multi_reduction <add>, %182, %cst_116 [0] : vector<8x32xf32> to vector<32xf32>
    %184 = vector.shape_cast %183 : vector<32xf32> to vector<1x32xf32>
    %c0_117 = arith.constant 0 : index
    %c0_118 = arith.constant 0 : index
    %185 = vector.load %arg17[%c0_117, %c0_118] : memref<1x32xf32, #tpu.memory_space<vmem>>, vector<1x32xf32>
    tpu.vector_store %arg17[%c0_117, %c0_118], %184 {strides = array<i32>} : memref<1x32xf32, #tpu.memory_space<vmem>>, vector<1x32xf32>,
    %c1_i32 = arith.constant 1 : i32
    %c0_119 = arith.constant 0 : index
    %c0_120 = arith.constant 0 : index
    %186 = vector.load %arg17[%c0_119, %c0_120] : memref<1x32xf32, #tpu.memory_space<vmem>>, vector<1x32xf32>
    %c0_121 = arith.constant 0 : index
    %c0_122 = arith.constant 0 : index
    %187 = vector.load %arg15[%c0_121, %c0_122] : memref<1x32xf32, #tpu.memory_space<vmem>>, vector<1x32xf32>
    %c0_123 = arith.constant 0 : index
    %c0_124 = arith.constant 0 : index
    %188 = vector.load %arg16[%c0_123, %c0_124] : memref<1x32xf32, #tpu.memory_space<vmem>>, vector<1x32xf32>
    %c0_125 = arith.constant 0 : index
    %c0_126 = arith.constant 0 : index
    %189 = vector.load %arg2[%c0_125, %c0_126] : memref<32x128xf32, #tpu.memory_space<vmem>>, vector<32x128xf32>
    %cst_127 = arith.constant dense<0.000000e+00> : vector<1x128xf32>
    %190 = tpu.matmul %186, %189, %cst_127 {dimension_numbers = #tpu.dot_dimension_numbers<[1], [0], [0], [1], [0, 0, 1, 1], [], []>} : vector<1x32xf32>, vector<32x128xf32>, vector<1x128xf32> -> vector<1x128xf32>
    %c0_128 = arith.constant 0 : index
    %c0_129 = arith.constant 0 : index
    %191 = vector.load %arg3[%c0_128, %c0_129] : memref<32x128xf32, #tpu.memory_space<vmem>>, vector<32x128xf32>
    %cst_130 = arith.constant dense<0.000000e+00> : vector<1x128xf32>
    %192 = tpu.matmul %187, %191, %cst_130 {dimension_numbers = #tpu.dot_dimension_numbers<[1], [0], [0], [1], [0, 0, 1, 1], [], []>} : vector<1x32xf32>, vector<32x128xf32>, vector<1x128xf32> -> vector<1x128xf32>
    %193 = arith.addf %190, %192 : vector<1x128xf32>
    %c0_131 = arith.constant 0 : index
    %c0_132 = arith.constant 0 : index
    %194 = vector.load %arg4[%c0_131, %c0_132] : memref<1x128xf32, #tpu.memory_space<vmem>>, vector<1x128xf32>
    %195 = arith.addf %193, %194 : vector<1x128xf32>
    %196 = vector.extract_strided_slice %195 {offsets = [0, 0], sizes = [1, 32], strides = [1, 1]} : vector<1x128xf32> to vector<1x32xf32>
    %cst_133 = arith.constant 5.000000e-01 : f32
    %197 = vector.broadcast %cst_133 : f32 to vector<1x32xf32>
    %198 = arith.mulf %197, %196 : vector<1x32xf32>
    %199 = math.tanh %198 : vector<1x32xf32>
    %cst_134 = arith.constant 5.000000e-01 : f32
    %200 = vector.broadcast %cst_134 : f32 to vector<1x32xf32>
    %201 = arith.mulf %200, %199 : vector<1x32xf32>
    %cst_135 = arith.constant 5.000000e-01 : f32
    %202 = vector.broadcast %cst_135 : f32 to vector<1x32xf32>
    %203 = arith.addf %201, %202 : vector<1x32xf32>
    %204 = vector.extract_strided_slice %195 {offsets = [0, 32], sizes = [1, 32], strides = [1, 1]} : vector<1x128xf32> to vector<1x32xf32>
    %cst_136 = arith.constant 5.000000e-01 : f32
    %205 = vector.broadcast %cst_136 : f32 to vector<1x32xf32>
    %206 = arith.mulf %205, %204 : vector<1x32xf32>
    %207 = math.tanh %206 : vector<1x32xf32>
    %cst_137 = arith.constant 5.000000e-01 : f32
    %208 = vector.broadcast %cst_137 : f32 to vector<1x32xf32>
    %209 = arith.mulf %208, %207 : vector<1x32xf32>
    %cst_138 = arith.constant 5.000000e-01 : f32
    %210 = vector.broadcast %cst_138 : f32 to vector<1x32xf32>
    %211 = arith.addf %209, %210 : vector<1x32xf32>
    %212 = vector.extract_strided_slice %195 {offsets = [0, 64], sizes = [1, 32], strides = [1, 1]} : vector<1x128xf32> to vector<1x32xf32>
    %213 = math.tanh %212 : vector<1x32xf32>
    %214 = vector.extract_strided_slice %195 {offsets = [0, 96], sizes = [1, 32], strides = [1, 1]} : vector<1x128xf32> to vector<1x32xf32>
    %cst_139 = arith.constant 5.000000e-01 : f32
    %215 = vector.broadcast %cst_139 : f32 to vector<1x32xf32>
    %216 = arith.mulf %215, %214 : vector<1x32xf32>
    %217 = math.tanh %216 : vector<1x32xf32>
    %cst_140 = arith.constant 5.000000e-01 : f32
    %218 = vector.broadcast %cst_140 : f32 to vector<1x32xf32>
    %219 = arith.mulf %218, %217 : vector<1x32xf32>
    %cst_141 = arith.constant 5.000000e-01 : f32
    %220 = vector.broadcast %cst_141 : f32 to vector<1x32xf32>
    %221 = arith.addf %219, %220 : vector<1x32xf32>
    %222 = arith.mulf %211, %188 : vector<1x32xf32>
    %223 = arith.mulf %203, %213 : vector<1x32xf32>
    %224 = arith.addf %222, %223 : vector<1x32xf32>
    %225 = math.tanh %224 : vector<1x32xf32>
    %226 = arith.mulf %221, %225 : vector<1x32xf32>
    %c0_142 = arith.constant 0 : index
    %c0_143 = arith.constant 0 : index
    %227 = vector.load %arg15[%c0_142, %c0_143] : memref<1x32xf32, #tpu.memory_space<vmem>>, vector<1x32xf32>
    tpu.vector_store %arg15[%c0_142, %c0_143], %226 {strides = array<i32>} : memref<1x32xf32, #tpu.memory_space<vmem>>, vector<1x32xf32>,
    %c0_144 = arith.constant 0 : index
    %c0_145 = arith.constant 0 : index
    %228 = vector.load %arg16[%c0_144, %c0_145] : memref<1x32xf32, #tpu.memory_space<vmem>>, vector<1x32xf32>
    tpu.vector_store %arg16[%c0_144, %c0_145], %224 {strides = array<i32>} : memref<1x32xf32, #tpu.memory_space<vmem>>, vector<1x32xf32>,
    %c0_146 = arith.constant 0 : index
    %c0_147 = arith.constant 0 : index
    %229 = vector.load %arg21[%c0_146, %c0_147] : memref<8x32xf32, #tpu.memory_space<vmem>>, vector<8x32xf32>
    %c0_148 = arith.constant 0 : index
    %c0_149 = arith.constant 0 : index
    %230 = vector.load %arg8[%c0_148, %c0_149] : memref<1x32xf32, #tpu.memory_space<vmem>>, vector<1x32xf32>
    %c0_150 = arith.constant 0 : index
    %c0_151 = arith.constant 0 : index
    %231 = vector.load %arg7[%c0_150, %c0_151] : memref<32x32xf32, #tpu.memory_space<vmem>>, vector<32x32xf32>
    %cst_152 = arith.constant dense<0.000000e+00> : vector<1x32xf32>
    %232 = tpu.matmul %226, %231, %cst_152 {dimension_numbers = #tpu.dot_dimension_numbers<[1], [0], [0], [1], [0, 0, 1, 1], [], []>} : vector<1x32xf32>, vector<32x32xf32>, vector<1x32xf32> -> vector<1x32xf32>
    %233 = vector.broadcast %232 : vector<1x32xf32> to vector<8x32xf32>
    %234 = arith.addf %229, %233 : vector<8x32xf32>
    %235 = math.tanh %234 : vector<8x32xf32>
    %236 = vector.broadcast %230 : vector<1x32xf32> to vector<8x32xf32>
    %237 = arith.mulf %235, %236 : vector<8x32xf32>
    %cst_153 = arith.constant dense<0.000000e+00> : vector<8xf32>
    %238 = vector.multi_reduction <add>, %237, %cst_153 [1] : vector<8x32xf32> to vector<8xf32>
    %239 = vector.shape_cast %238 : vector<8xf32> to vector<8x1xf32>
    %cst_154 = arith.constant dense<0xFF800000> : vector<1xf32>
    %240 = vector.multi_reduction <maximumf>, %239, %cst_154 [0] : vector<8x1xf32> to vector<1xf32>
    %241 = vector.shape_cast %240 : vector<1xf32> to vector<1x1xf32>
    %242 = vector.broadcast %241 : vector<1x1xf32> to vector<8x1xf32>
    %243 = arith.subf %239, %242 : vector<8x1xf32>
    %244 = math.exp %243 : vector<8x1xf32>
    %cst_155 = arith.constant dense<0.000000e+00> : vector<1xf32>
    %245 = vector.multi_reduction <add>, %244, %cst_155 [0] : vector<8x1xf32> to vector<1xf32>
    %246 = vector.shape_cast %245 : vector<1xf32> to vector<1x1xf32>
    %247 = vector.broadcast %246 : vector<1x1xf32> to vector<8x1xf32>
    %248 = arith.divf %244, %247 : vector<8x1xf32>
    %249 = vector.broadcast %248 : vector<8x1xf32> to vector<8x32xf32>
    %250 = arith.mulf %249, %229 : vector<8x32xf32>
    %cst_156 = arith.constant dense<0.000000e+00> : vector<32xf32>
    %251 = vector.multi_reduction <add>, %250, %cst_156 [0] : vector<8x32xf32> to vector<32xf32>
    %252 = vector.shape_cast %251 : vector<32xf32> to vector<1x32xf32>
    %c0_157 = arith.constant 0 : index
    %c0_158 = arith.constant 0 : index
    %253 = vector.load %arg7[%c0_157, %c0_158] : memref<32x32xf32, #tpu.memory_space<vmem>>, vector<32x32xf32>
    %cst_159 = arith.constant dense<0.000000e+00> : vector<1x32xf32>
    %254 = tpu.matmul %252, %253, %cst_159 {dimension_numbers = #tpu.dot_dimension_numbers<[1], [0], [0], [1], [0, 0, 1, 1], [], []>} : vector<1x32xf32>, vector<32x32xf32>, vector<1x32xf32> -> vector<1x32xf32>
    %255 = vector.broadcast %254 : vector<1x32xf32> to vector<8x32xf32>
    %256 = arith.addf %229, %255 : vector<8x32xf32>
    %257 = math.tanh %256 : vector<8x32xf32>
    %258 = vector.broadcast %230 : vector<1x32xf32> to vector<8x32xf32>
    %259 = arith.mulf %257, %258 : vector<8x32xf32>
    %cst_160 = arith.constant dense<0.000000e+00> : vector<8xf32>
    %260 = vector.multi_reduction <add>, %259, %cst_160 [1] : vector<8x32xf32> to vector<8xf32>
    %261 = vector.shape_cast %260 : vector<8xf32> to vector<8x1xf32>
    %cst_161 = arith.constant dense<0xFF800000> : vector<1xf32>
    %262 = vector.multi_reduction <maximumf>, %261, %cst_161 [0] : vector<8x1xf32> to vector<1xf32>
    %263 = vector.shape_cast %262 : vector<1xf32> to vector<1x1xf32>
    %264 = vector.broadcast %263 : vector<1x1xf32> to vector<8x1xf32>
    %265 = arith.subf %261, %264 : vector<8x1xf32>
    %266 = math.exp %265 : vector<8x1xf32>
    %cst_162 = arith.constant dense<0.000000e+00> : vector<1xf32>
    %267 = vector.multi_reduction <add>, %266, %cst_162 [0] : vector<8x1xf32> to vector<1xf32>
    %268 = vector.shape_cast %267 : vector<1xf32> to vector<1x1xf32>
    %269 = vector.broadcast %268 : vector<1x1xf32> to vector<8x1xf32>
    %270 = arith.divf %266, %269 : vector<8x1xf32>
    %271 = vector.broadcast %270 : vector<8x1xf32> to vector<8x32xf32>
    %272 = arith.mulf %271, %229 : vector<8x32xf32>
    %cst_163 = arith.constant dense<0.000000e+00> : vector<32xf32>
    %273 = vector.multi_reduction <add>, %272, %cst_163 [0] : vector<8x32xf32> to vector<32xf32>
    %274 = vector.shape_cast %273 : vector<32xf32> to vector<1x32xf32>
    %c0_164 = arith.constant 0 : index
    %c0_165 = arith.constant 0 : index
    %275 = vector.load %arg9[%c0_164, %c0_165] : memref<32x32xf32, #tpu.memory_space<vmem>>, vector<32x32xf32>
    %cst_166 = arith.constant dense<0.000000e+00> : vector<1x32xf32>
    %276 = tpu.matmul %274, %275, %cst_166 {dimension_numbers = #tpu.dot_dimension_numbers<[1], [0], [0], [1], [0, 0, 1, 1], [], []>} : vector<1x32xf32>, vector<32x32xf32>, vector<1x32xf32> -> vector<1x32xf32>
    %c0_167 = arith.constant 0 : index
    %c0_168 = arith.constant 0 : index
    %277 = vector.load %arg20[%c0_167, %c0_168] : memref<8x32xf32, #tpu.memory_space<vmem>>, vector<8x32xf32>
    %278 = vector.broadcast %276 : vector<1x32xf32> to vector<8x32xf32>
    %279 = arith.addf %277, %278 : vector<8x32xf32>
    %280 = math.tanh %279 : vector<8x32xf32>
    %c0_169 = arith.constant 0 : index
    %c0_170 = arith.constant 0 : index
    %281 = vector.load %arg10[%c0_169, %c0_170] : memref<1x32xf32, #tpu.memory_space<vmem>>, vector<1x32xf32>
    %282 = vector.broadcast %281 : vector<1x32xf32> to vector<8x32xf32>
    %283 = arith.mulf %280, %282 : vector<8x32xf32>
    %cst_171 = arith.constant dense<0.000000e+00> : vector<8xf32>
    %284 = vector.multi_reduction <add>, %283, %cst_171 [1] : vector<8x32xf32> to vector<8xf32>
    %285 = vector.shape_cast %284 : vector<8xf32> to vector<8x1xf32>
    %c0_172 = arith.constant 0 : index
    %c0_173 = arith.constant 0 : index
    %286 = vector.load %arg18[%c0_172, %c0_173] : memref<8x1xf32, #tpu.memory_space<vmem>>, vector<8x1xf32>
    %cst_174 = arith.constant 5.000000e-01 : f32
    %287 = vector.broadcast %cst_174 : f32 to vector<8x1xf32>
    %288 = arith.cmpf ogt, %286, %287 : vector<8x1xf32>
    %cst_175 = arith.constant -1.000000e+06 : f32
    %289 = vector.broadcast %cst_175 : f32 to vector<8x1xf32>
    %290 = arith.select %288, %289, %285 : vector<8x1xi1>, vector<8x1xf32>
    %291 = tpu.iota {dimensions = array<i32: 0>} : vector<8x1xi32>
    %292 = arith.sitofp %291 : vector<8x1xi32> to vector<8x1xf32>
    %cst_176 = arith.constant dense<0xFF800000> : vector<1xf32>
    %293 = vector.multi_reduction <maximumf>, %290, %cst_176 [0] : vector<8x1xf32> to vector<1xf32>
    %294 = vector.shape_cast %293 : vector<1xf32> to vector<1x1xf32>
    %295 = vector.broadcast %294 : vector<1x1xf32> to vector<8x1xf32>
    %296 = arith.cmpf oge, %290, %295 : vector<8x1xf32>
    %cst_177 = arith.constant 8.000000e+00 : f32
    %297 = vector.broadcast %cst_177 : f32 to vector<8x1xf32>
    %298 = arith.select %296, %292, %297 : vector<8x1xi1>, vector<8x1xf32>
    %cst_178 = arith.constant dense<0x7F800000> : vector<1xf32>
    %299 = vector.multi_reduction <minimumf>, %298, %cst_178 [0] : vector<8x1xf32> to vector<1xf32>
    %300 = vector.shape_cast %299 : vector<1xf32> to vector<1x1xf32>
    %cst_179 = arith.constant 7.000000e+00 : f32
    %cst_180 = arith.constant 5.000000e-01 : f32
    %301 = arith.subf %cst_179, %cst_180 : f32
    %302 = vector.broadcast %301 : f32 to vector<8x1xf32>
    %303 = arith.cmpf ogt, %292, %302 : vector<8x1xf32>
    %cst_181 = arith.constant -3.000000e+38 : f32
    %304 = vector.broadcast %cst_181 : f32 to vector<8x1xf32>
    %305 = arith.select %303, %304, %290 : vector<8x1xi1>, vector<8x1xf32>
    %cst_182 = arith.constant dense<0xFF800000> : vector<1xf32>
    %306 = vector.multi_reduction <maximumf>, %305, %cst_182 [0] : vector<8x1xf32> to vector<1xf32>
    %307 = vector.shape_cast %306 : vector<1xf32> to vector<1x1xf32>
    %308 = vector.broadcast %307 : vector<1x1xf32> to vector<8x1xf32>
    %309 = arith.cmpf oge, %305, %308 : vector<8x1xf32>
    %cst_183 = arith.constant 8.000000e+00 : f32
    %310 = vector.broadcast %cst_183 : f32 to vector<8x1xf32>
    %311 = arith.select %309, %292, %310 : vector<8x1xi1>, vector<8x1xf32>
    %cst_184 = arith.constant dense<0x7F800000> : vector<1xf32>
    %312 = vector.multi_reduction <minimumf>, %311, %cst_184 [0] : vector<8x1xf32> to vector<1xf32>
    %313 = vector.shape_cast %312 : vector<1xf32> to vector<1x1xf32>
    %314 = vector.broadcast %c1_i32 : i32 to vector<1x1xi32>
    %c0_i32_185 = arith.constant 0 : i32
    %315 = vector.broadcast %c0_i32_185 : i32 to vector<1x1xi32>
    %316 = arith.cmpi eq, %314, %315 : vector<1x1xi32>
    %cst_186 = arith.constant 7.000000e+00 : f32
    %cst_187 = arith.constant 5.000000e-01 : f32
    %317 = arith.subf %cst_186, %cst_187 : f32
    %318 = vector.broadcast %317 : f32 to vector<1x1xf32>
    %319 = arith.cmpf ogt, %300, %318 : vector<1x1xf32>
    %320 = arith.andi %319, %316 : vector<1x1xi1>
    %cst_188 = arith.constant dense<true> : vector<1x1xi1>
    %321 = arith.xori %316, %cst_188 : vector<1x1xi1>
    %322 = arith.andi %319, %321 : vector<1x1xi1>
    %323 = arith.select %320, %313, %300 : vector<1x1xi1>, vector<1x1xf32>
    %c0_189 = arith.constant 0 : index
    %c0_190 = arith.constant 0 : index
    %324 = vector.load %arg19[%c0_189, %c0_190] : memref<1x1xf32, #tpu.memory_space<vmem>>, vector<1x1xf32>
    %cst_191 = arith.constant 1.000000e+00 : f32
    %cst_192 = arith.constant 0.000000e+00 : f32
    %325 = vector.broadcast %cst_191 : f32 to vector<1x1xf32>
    %326 = vector.broadcast %cst_192 : f32 to vector<1x1xf32>
    %327 = arith.select %322, %325, %326 : vector<1x1xi1>, vector<1x1xf32>
    %328 = arith.maximumf %324, %327 : vector<1x1xf32>
    %c0_193 = arith.constant 0 : index
    %c0_194 = arith.constant 0 : index
    %329 = vector.load %arg19[%c0_193, %c0_194] : memref<1x1xf32, #tpu.memory_space<vmem>>, vector<1x1xf32>
    tpu.vector_store %arg19[%c0_193, %c0_194], %328 {strides = array<i32>} : memref<1x1xf32, #tpu.memory_space<vmem>>, vector<1x1xf32>,
    %330 = vector.broadcast %323 : vector<1x1xf32> to vector<8x1xf32>
    %331 = arith.subf %292, %330 : vector<8x1xf32>
    %332 = math.absf %331 : vector<8x1xf32>
    %cst_195 = arith.constant 5.000000e-01 : f32
    %333 = vector.broadcast %cst_195 : f32 to vector<8x1xf32>
    %334 = arith.cmpf olt, %332, %333 : vector<8x1xf32>
    %cst_196 = arith.constant 1.000000e+00 : f32
    %cst_197 = arith.constant 0.000000e+00 : f32
    %335 = vector.broadcast %cst_196 : f32 to vector<8x1xf32>
    %336 = vector.broadcast %cst_197 : f32 to vector<8x1xf32>
    %337 = arith.select %334, %335, %336 : vector<8x1xi1>, vector<8x1xf32>
    %cst_198 = arith.constant 1.000000e+00 : f32
    %338 = vector.broadcast %cst_198 : f32 to vector<1x1xf32>
    %339 = arith.subf %338, %328 : vector<1x1xf32>
    %340 = vector.broadcast %339 : vector<1x1xf32> to vector<8x1xf32>
    %341 = arith.mulf %337, %340 : vector<8x1xf32>
    %342 = arith.index_cast %c1_i32 : i32 to index
    %c0_199 = arith.constant 0 : index
    %c0_200 = arith.constant 0 : index
    %343 = vector.load %arg14[%342, %c0_199, %c0_200] : memref<7x8x1xf32, #tpu.memory_space<vmem>>, vector<1x8x1xf32>
    %344 = vector.shape_cast %343 : vector<1x8x1xf32> to vector<8x1xf32>
    %345 = vector.shape_cast %341 : vector<8x1xf32> to vector<1x8x1xf32>
    tpu.vector_store %arg14[%342, %c0_199, %c0_200], %345 {strides = array<i32>} : memref<7x8x1xf32, #tpu.memory_space<vmem>>, vector<1x8x1xf32>,
    %c0_201 = arith.constant 0 : index
    %c0_202 = arith.constant 0 : index
    %346 = vector.load %arg18[%c0_201, %c0_202] : memref<8x1xf32, #tpu.memory_space<vmem>>, vector<8x1xf32>
    %347 = arith.maximumf %346, %341 : vector<8x1xf32>
    %c0_203 = arith.constant 0 : index
    %c0_204 = arith.constant 0 : index
    %348 = vector.load %arg18[%c0_203, %c0_204] : memref<8x1xf32, #tpu.memory_space<vmem>>, vector<8x1xf32>
    tpu.vector_store %arg18[%c0_203, %c0_204], %347 {strides = array<i32>} : memref<8x1xf32, #tpu.memory_space<vmem>>, vector<8x1xf32>,
    %c0_205 = arith.constant 0 : index
    %c0_206 = arith.constant 0 : index
    %349 = vector.load %arg1[%c0_205, %c0_206] : memref<8x32xf32, #tpu.memory_space<vmem>>, vector<8x32xf32>
    %350 = vector.broadcast %341 : vector<8x1xf32> to vector<8x32xf32>
    %351 = arith.mulf %350, %349 : vector<8x32xf32>
    %cst_207 = arith.constant dense<0.000000e+00> : vector<32xf32>
    %352 = vector.multi_reduction <add>, %351, %cst_207 [0] : vector<8x32xf32> to vector<32xf32>
    %353 = vector.shape_cast %352 : vector<32xf32> to vector<1x32xf32>
    %c0_208 = arith.constant 0 : index
    %c0_209 = arith.constant 0 : index
    %354 = vector.load %arg17[%c0_208, %c0_209] : memref<1x32xf32, #tpu.memory_space<vmem>>, vector<1x32xf32>
    tpu.vector_store %arg17[%c0_208, %c0_209], %353 {strides = array<i32>} : memref<1x32xf32, #tpu.memory_space<vmem>>, vector<1x32xf32>,
    %c2_i32 = arith.constant 2 : i32
    %c0_210 = arith.constant 0 : index
    %c0_211 = arith.constant 0 : index
    %355 = vector.load %arg17[%c0_210, %c0_211] : memref<1x32xf32, #tpu.memory_space<vmem>>, vector<1x32xf32>
    %c0_212 = arith.constant 0 : index
    %c0_213 = arith.constant 0 : index
    %356 = vector.load %arg15[%c0_212, %c0_213] : memref<1x32xf32, #tpu.memory_space<vmem>>, vector<1x32xf32>
    %c0_214 = arith.constant 0 : index
    %c0_215 = arith.constant 0 : index
    %357 = vector.load %arg16[%c0_214, %c0_215] : memref<1x32xf32, #tpu.memory_space<vmem>>, vector<1x32xf32>
    %c0_216 = arith.constant 0 : index
    %c0_217 = arith.constant 0 : index
    %358 = vector.load %arg2[%c0_216, %c0_217] : memref<32x128xf32, #tpu.memory_space<vmem>>, vector<32x128xf32>
    %cst_218 = arith.constant dense<0.000000e+00> : vector<1x128xf32>
    %359 = tpu.matmul %355, %358, %cst_218 {dimension_numbers = #tpu.dot_dimension_numbers<[1], [0], [0], [1], [0, 0, 1, 1], [], []>} : vector<1x32xf32>, vector<32x128xf32>, vector<1x128xf32> -> vector<1x128xf32>
    %c0_219 = arith.constant 0 : index
    %c0_220 = arith.constant 0 : index
    %360 = vector.load %arg3[%c0_219, %c0_220] : memref<32x128xf32, #tpu.memory_space<vmem>>, vector<32x128xf32>
    %cst_221 = arith.constant dense<0.000000e+00> : vector<1x128xf32>
    %361 = tpu.matmul %356, %360, %cst_221 {dimension_numbers = #tpu.dot_dimension_numbers<[1], [0], [0], [1], [0, 0, 1, 1], [], []>} : vector<1x32xf32>, vector<32x128xf32>, vector<1x128xf32> -> vector<1x128xf32>
    %362 = arith.addf %359, %361 : vector<1x128xf32>
    %c0_222 = arith.constant 0 : index
    %c0_223 = arith.constant 0 : index
    %363 = vector.load %arg4[%c0_222, %c0_223] : memref<1x128xf32, #tpu.memory_space<vmem>>, vector<1x128xf32>
    %364 = arith.addf %362, %363 : vector<1x128xf32>
    %365 = vector.extract_strided_slice %364 {offsets = [0, 0], sizes = [1, 32], strides = [1, 1]} : vector<1x128xf32> to vector<1x32xf32>
    %cst_224 = arith.constant 5.000000e-01 : f32
    %366 = vector.broadcast %cst_224 : f32 to vector<1x32xf32>
    %367 = arith.mulf %366, %365 : vector<1x32xf32>
    %368 = math.tanh %367 : vector<1x32xf32>
    %cst_225 = arith.constant 5.000000e-01 : f32
    %369 = vector.broadcast %cst_225 : f32 to vector<1x32xf32>
    %370 = arith.mulf %369, %368 : vector<1x32xf32>
    %cst_226 = arith.constant 5.000000e-01 : f32
    %371 = vector.broadcast %cst_226 : f32 to vector<1x32xf32>
    %372 = arith.addf %370, %371 : vector<1x32xf32>
    %373 = vector.extract_strided_slice %364 {offsets = [0, 32], sizes = [1, 32], strides = [1, 1]} : vector<1x128xf32> to vector<1x32xf32>
    %cst_227 = arith.constant 5.000000e-01 : f32
    %374 = vector.broadcast %cst_227 : f32 to vector<1x32xf32>
    %375 = arith.mulf %374, %373 : vector<1x32xf32>
    %376 = math.tanh %375 : vector<1x32xf32>
    %cst_228 = arith.constant 5.000000e-01 : f32
    %377 = vector.broadcast %cst_228 : f32 to vector<1x32xf32>
    %378 = arith.mulf %377, %376 : vector<1x32xf32>
    %cst_229 = arith.constant 5.000000e-01 : f32
    %379 = vector.broadcast %cst_229 : f32 to vector<1x32xf32>
    %380 = arith.addf %378, %379 : vector<1x32xf32>
    %381 = vector.extract_strided_slice %364 {offsets = [0, 64], sizes = [1, 32], strides = [1, 1]} : vector<1x128xf32> to vector<1x32xf32>
    %382 = math.tanh %381 : vector<1x32xf32>
    %383 = vector.extract_strided_slice %364 {offsets = [0, 96], sizes = [1, 32], strides = [1, 1]} : vector<1x128xf32> to vector<1x32xf32>
    %cst_230 = arith.constant 5.000000e-01 : f32
    %384 = vector.broadcast %cst_230 : f32 to vector<1x32xf32>
    %385 = arith.mulf %384, %383 : vector<1x32xf32>
    %386 = math.tanh %385 : vector<1x32xf32>
    %cst_231 = arith.constant 5.000000e-01 : f32
    %387 = vector.broadcast %cst_231 : f32 to vector<1x32xf32>
    %388 = arith.mulf %387, %386 : vector<1x32xf32>
    %cst_232 = arith.constant 5.000000e-01 : f32
    %389 = vector.broadcast %cst_232 : f32 to vector<1x32xf32>
    %390 = arith.addf %388, %389 : vector<1x32xf32>
    %391 = arith.mulf %380, %357 : vector<1x32xf32>
    %392 = arith.mulf %372, %382 : vector<1x32xf32>
    %393 = arith.addf %391, %392 : vector<1x32xf32>
    %394 = math.tanh %393 : vector<1x32xf32>
    %395 = arith.mulf %390, %394 : vector<1x32xf32>
    %c0_233 = arith.constant 0 : index
    %c0_234 = arith.constant 0 : index
    %396 = vector.load %arg15[%c0_233, %c0_234] : memref<1x32xf32, #tpu.memory_space<vmem>>, vector<1x32xf32>
    tpu.vector_store %arg15[%c0_233, %c0_234], %395 {strides = array<i32>} : memref<1x32xf32, #tpu.memory_space<vmem>>, vector<1x32xf32>,
    %c0_235 = arith.constant 0 : index
    %c0_236 = arith.constant 0 : index
    %397 = vector.load %arg16[%c0_235, %c0_236] : memref<1x32xf32, #tpu.memory_space<vmem>>, vector<1x32xf32>
    tpu.vector_store %arg16[%c0_235, %c0_236], %393 {strides = array<i32>} : memref<1x32xf32, #tpu.memory_space<vmem>>, vector<1x32xf32>,
    %c0_237 = arith.constant 0 : index
    %c0_238 = arith.constant 0 : index
    %398 = vector.load %arg21[%c0_237, %c0_238] : memref<8x32xf32, #tpu.memory_space<vmem>>, vector<8x32xf32>
    %c0_239 = arith.constant 0 : index
    %c0_240 = arith.constant 0 : index
    %399 = vector.load %arg8[%c0_239, %c0_240] : memref<1x32xf32, #tpu.memory_space<vmem>>, vector<1x32xf32>
    %c0_241 = arith.constant 0 : index
    %c0_242 = arith.constant 0 : index
    %400 = vector.load %arg7[%c0_241, %c0_242] : memref<32x32xf32, #tpu.memory_space<vmem>>, vector<32x32xf32>
    %cst_243 = arith.constant dense<0.000000e+00> : vector<1x32xf32>
    %401 = tpu.matmul %395, %400, %cst_243 {dimension_numbers = #tpu.dot_dimension_numbers<[1], [0], [0], [1], [0, 0, 1, 1], [], []>} : vector<1x32xf32>, vector<32x32xf32>, vector<1x32xf32> -> vector<1x32xf32>
    %402 = vector.broadcast %401 : vector<1x32xf32> to vector<8x32xf32>
    %403 = arith.addf %398, %402 : vector<8x32xf32>
    %404 = math.tanh %403 : vector<8x32xf32>
    %405 = vector.broadcast %399 : vector<1x32xf32> to vector<8x32xf32>
    %406 = arith.mulf %404, %405 : vector<8x32xf32>
    %cst_244 = arith.constant dense<0.000000e+00> : vector<8xf32>
    %407 = vector.multi_reduction <add>, %406, %cst_244 [1] : vector<8x32xf32> to vector<8xf32>
    %408 = vector.shape_cast %407 : vector<8xf32> to vector<8x1xf32>
    %cst_245 = arith.constant dense<0xFF800000> : vector<1xf32>
    %409 = vector.multi_reduction <maximumf>, %408, %cst_245 [0] : vector<8x1xf32> to vector<1xf32>
    %410 = vector.shape_cast %409 : vector<1xf32> to vector<1x1xf32>
    %411 = vector.broadcast %410 : vector<1x1xf32> to vector<8x1xf32>
    %412 = arith.subf %408, %411 : vector<8x1xf32>
    %413 = math.exp %412 : vector<8x1xf32>
    %cst_246 = arith.constant dense<0.000000e+00> : vector<1xf32>
    %414 = vector.multi_reduction <add>, %413, %cst_246 [0] : vector<8x1xf32> to vector<1xf32>
    %415 = vector.shape_cast %414 : vector<1xf32> to vector<1x1xf32>
    %416 = vector.broadcast %415 : vector<1x1xf32> to vector<8x1xf32>
    %417 = arith.divf %413, %416 : vector<8x1xf32>
    %418 = vector.broadcast %417 : vector<8x1xf32> to vector<8x32xf32>
    %419 = arith.mulf %418, %398 : vector<8x32xf32>
    %cst_247 = arith.constant dense<0.000000e+00> : vector<32xf32>
    %420 = vector.multi_reduction <add>, %419, %cst_247 [0] : vector<8x32xf32> to vector<32xf32>
    %421 = vector.shape_cast %420 : vector<32xf32> to vector<1x32xf32>
    %c0_248 = arith.constant 0 : index
    %c0_249 = arith.constant 0 : index
    %422 = vector.load %arg7[%c0_248, %c0_249] : memref<32x32xf32, #tpu.memory_space<vmem>>, vector<32x32xf32>
    %cst_250 = arith.constant dense<0.000000e+00> : vector<1x32xf32>
    %423 = tpu.matmul %421, %422, %cst_250 {dimension_numbers = #tpu.dot_dimension_numbers<[1], [0], [0], [1], [0, 0, 1, 1], [], []>} : vector<1x32xf32>, vector<32x32xf32>, vector<1x32xf32> -> vector<1x32xf32>
    %424 = vector.broadcast %423 : vector<1x32xf32> to vector<8x32xf32>
    %425 = arith.addf %398, %424 : vector<8x32xf32>
    %426 = math.tanh %425 : vector<8x32xf32>
    %427 = vector.broadcast %399 : vector<1x32xf32> to vector<8x32xf32>
    %428 = arith.mulf %426, %427 : vector<8x32xf32>
    %cst_251 = arith.constant dense<0.000000e+00> : vector<8xf32>
    %429 = vector.multi_reduction <add>, %428, %cst_251 [1] : vector<8x32xf32> to vector<8xf32>
    %430 = vector.shape_cast %429 : vector<8xf32> to vector<8x1xf32>
    %cst_252 = arith.constant dense<0xFF800000> : vector<1xf32>
    %431 = vector.multi_reduction <maximumf>, %430, %cst_252 [0] : vector<8x1xf32> to vector<1xf32>
    %432 = vector.shape_cast %431 : vector<1xf32> to vector<1x1xf32>
    %433 = vector.broadcast %432 : vector<1x1xf32> to vector<8x1xf32>
    %434 = arith.subf %430, %433 : vector<8x1xf32>
    %435 = math.exp %434 : vector<8x1xf32>
    %cst_253 = arith.constant dense<0.000000e+00> : vector<1xf32>
    %436 = vector.multi_reduction <add>, %435, %cst_253 [0] : vector<8x1xf32> to vector<1xf32>
    %437 = vector.shape_cast %436 : vector<1xf32> to vector<1x1xf32>
    %438 = vector.broadcast %437 : vector<1x1xf32> to vector<8x1xf32>
    %439 = arith.divf %435, %438 : vector<8x1xf32>
    %440 = vector.broadcast %439 : vector<8x1xf32> to vector<8x32xf32>
    %441 = arith.mulf %440, %398 : vector<8x32xf32>
    %cst_254 = arith.constant dense<0.000000e+00> : vector<32xf32>
    %442 = vector.multi_reduction <add>, %441, %cst_254 [0] : vector<8x32xf32> to vector<32xf32>
    %443 = vector.shape_cast %442 : vector<32xf32> to vector<1x32xf32>
    %c0_255 = arith.constant 0 : index
    %c0_256 = arith.constant 0 : index
    %444 = vector.load %arg9[%c0_255, %c0_256] : memref<32x32xf32, #tpu.memory_space<vmem>>, vector<32x32xf32>
    %cst_257 = arith.constant dense<0.000000e+00> : vector<1x32xf32>
    %445 = tpu.matmul %443, %444, %cst_257 {dimension_numbers = #tpu.dot_dimension_numbers<[1], [0], [0], [1], [0, 0, 1, 1], [], []>} : vector<1x32xf32>, vector<32x32xf32>, vector<1x32xf32> -> vector<1x32xf32>
    %c0_258 = arith.constant 0 : index
    %c0_259 = arith.constant 0 : index
    %446 = vector.load %arg20[%c0_258, %c0_259] : memref<8x32xf32, #tpu.memory_space<vmem>>, vector<8x32xf32>
    %447 = vector.broadcast %445 : vector<1x32xf32> to vector<8x32xf32>
    %448 = arith.addf %446, %447 : vector<8x32xf32>
    %449 = math.tanh %448 : vector<8x32xf32>
    %c0_260 = arith.constant 0 : index
    %c0_261 = arith.constant 0 : index
    %450 = vector.load %arg10[%c0_260, %c0_261] : memref<1x32xf32, #tpu.memory_space<vmem>>, vector<1x32xf32>
    %451 = vector.broadcast %450 : vector<1x32xf32> to vector<8x32xf32>
    %452 = arith.mulf %449, %451 : vector<8x32xf32>
    %cst_262 = arith.constant dense<0.000000e+00> : vector<8xf32>
    %453 = vector.multi_reduction <add>, %452, %cst_262 [1] : vector<8x32xf32> to vector<8xf32>
    %454 = vector.shape_cast %453 : vector<8xf32> to vector<8x1xf32>
    %c0_263 = arith.constant 0 : index
    %c0_264 = arith.constant 0 : index
    %455 = vector.load %arg18[%c0_263, %c0_264] : memref<8x1xf32, #tpu.memory_space<vmem>>, vector<8x1xf32>
    %cst_265 = arith.constant 5.000000e-01 : f32
    %456 = vector.broadcast %cst_265 : f32 to vector<8x1xf32>
    %457 = arith.cmpf ogt, %455, %456 : vector<8x1xf32>
    %cst_266 = arith.constant -1.000000e+06 : f32
    %458 = vector.broadcast %cst_266 : f32 to vector<8x1xf32>
    %459 = arith.select %457, %458, %454 : vector<8x1xi1>, vector<8x1xf32>
    %460 = tpu.iota {dimensions = array<i32: 0>} : vector<8x1xi32>
    %461 = arith.sitofp %460 : vector<8x1xi32> to vector<8x1xf32>
    %cst_267 = arith.constant dense<0xFF800000> : vector<1xf32>
    %462 = vector.multi_reduction <maximumf>, %459, %cst_267 [0] : vector<8x1xf32> to vector<1xf32>
    %463 = vector.shape_cast %462 : vector<1xf32> to vector<1x1xf32>
    %464 = vector.broadcast %463 : vector<1x1xf32> to vector<8x1xf32>
    %465 = arith.cmpf oge, %459, %464 : vector<8x1xf32>
    %cst_268 = arith.constant 8.000000e+00 : f32
    %466 = vector.broadcast %cst_268 : f32 to vector<8x1xf32>
    %467 = arith.select %465, %461, %466 : vector<8x1xi1>, vector<8x1xf32>
    %cst_269 = arith.constant dense<0x7F800000> : vector<1xf32>
    %468 = vector.multi_reduction <minimumf>, %467, %cst_269 [0] : vector<8x1xf32> to vector<1xf32>
    %469 = vector.shape_cast %468 : vector<1xf32> to vector<1x1xf32>
    %cst_270 = arith.constant 7.000000e+00 : f32
    %cst_271 = arith.constant 5.000000e-01 : f32
    %470 = arith.subf %cst_270, %cst_271 : f32
    %471 = vector.broadcast %470 : f32 to vector<8x1xf32>
    %472 = arith.cmpf ogt, %461, %471 : vector<8x1xf32>
    %cst_272 = arith.constant -3.000000e+38 : f32
    %473 = vector.broadcast %cst_272 : f32 to vector<8x1xf32>
    %474 = arith.select %472, %473, %459 : vector<8x1xi1>, vector<8x1xf32>
    %cst_273 = arith.constant dense<0xFF800000> : vector<1xf32>
    %475 = vector.multi_reduction <maximumf>, %474, %cst_273 [0] : vector<8x1xf32> to vector<1xf32>
    %476 = vector.shape_cast %475 : vector<1xf32> to vector<1x1xf32>
    %477 = vector.broadcast %476 : vector<1x1xf32> to vector<8x1xf32>
    %478 = arith.cmpf oge, %474, %477 : vector<8x1xf32>
    %cst_274 = arith.constant 8.000000e+00 : f32
    %479 = vector.broadcast %cst_274 : f32 to vector<8x1xf32>
    %480 = arith.select %478, %461, %479 : vector<8x1xi1>, vector<8x1xf32>
    %cst_275 = arith.constant dense<0x7F800000> : vector<1xf32>
    %481 = vector.multi_reduction <minimumf>, %480, %cst_275 [0] : vector<8x1xf32> to vector<1xf32>
    %482 = vector.shape_cast %481 : vector<1xf32> to vector<1x1xf32>
    %483 = vector.broadcast %c2_i32 : i32 to vector<1x1xi32>
    %c0_i32_276 = arith.constant 0 : i32
    %484 = vector.broadcast %c0_i32_276 : i32 to vector<1x1xi32>
    %485 = arith.cmpi eq, %483, %484 : vector<1x1xi32>
    %cst_277 = arith.constant 7.000000e+00 : f32
    %cst_278 = arith.constant 5.000000e-01 : f32
    %486 = arith.subf %cst_277, %cst_278 : f32
    %487 = vector.broadcast %486 : f32 to vector<1x1xf32>
    %488 = arith.cmpf ogt, %469, %487 : vector<1x1xf32>
    %489 = arith.andi %488, %485 : vector<1x1xi1>
    %cst_279 = arith.constant dense<true> : vector<1x1xi1>
    %490 = arith.xori %485, %cst_279 : vector<1x1xi1>
    %491 = arith.andi %488, %490 : vector<1x1xi1>
    %492 = arith.select %489, %482, %469 : vector<1x1xi1>, vector<1x1xf32>
    %c0_280 = arith.constant 0 : index
    %c0_281 = arith.constant 0 : index
    %493 = vector.load %arg19[%c0_280, %c0_281] : memref<1x1xf32, #tpu.memory_space<vmem>>, vector<1x1xf32>
    %cst_282 = arith.constant 1.000000e+00 : f32
    %cst_283 = arith.constant 0.000000e+00 : f32
    %494 = vector.broadcast %cst_282 : f32 to vector<1x1xf32>
    %495 = vector.broadcast %cst_283 : f32 to vector<1x1xf32>
    %496 = arith.select %491, %494, %495 : vector<1x1xi1>, vector<1x1xf32>
    %497 = arith.maximumf %493, %496 : vector<1x1xf32>
    %c0_284 = arith.constant 0 : index
    %c0_285 = arith.constant 0 : index
    %498 = vector.load %arg19[%c0_284, %c0_285] : memref<1x1xf32, #tpu.memory_space<vmem>>, vector<1x1xf32>
    tpu.vector_store %arg19[%c0_284, %c0_285], %497 {strides = array<i32>} : memref<1x1xf32, #tpu.memory_space<vmem>>, vector<1x1xf32>,
    %499 = vector.broadcast %492 : vector<1x1xf32> to vector<8x1xf32>
    %500 = arith.subf %461, %499 : vector<8x1xf32>
    %501 = math.absf %500 : vector<8x1xf32>
    %cst_286 = arith.constant 5.000000e-01 : f32
    %502 = vector.broadcast %cst_286 : f32 to vector<8x1xf32>
    %503 = arith.cmpf olt, %501, %502 : vector<8x1xf32>
    %cst_287 = arith.constant 1.000000e+00 : f32
    %cst_288 = arith.constant 0.000000e+00 : f32
    %504 = vector.broadcast %cst_287 : f32 to vector<8x1xf32>
    %505 = vector.broadcast %cst_288 : f32 to vector<8x1xf32>
    %506 = arith.select %503, %504, %505 : vector<8x1xi1>, vector<8x1xf32>
    %cst_289 = arith.constant 1.000000e+00 : f32
    %507 = vector.broadcast %cst_289 : f32 to vector<1x1xf32>
    %508 = arith.subf %507, %497 : vector<1x1xf32>
    %509 = vector.broadcast %508 : vector<1x1xf32> to vector<8x1xf32>
    %510 = arith.mulf %506, %509 : vector<8x1xf32>
    %511 = arith.index_cast %c2_i32 : i32 to index
    %c0_290 = arith.constant 0 : index
    %c0_291 = arith.constant 0 : index
    %512 = vector.load %arg14[%511, %c0_290, %c0_291] : memref<7x8x1xf32, #tpu.memory_space<vmem>>, vector<1x8x1xf32>
    %513 = vector.shape_cast %512 : vector<1x8x1xf32> to vector<8x1xf32>
    %514 = vector.shape_cast %510 : vector<8x1xf32> to vector<1x8x1xf32>
    tpu.vector_store %arg14[%511, %c0_290, %c0_291], %514 {strides = array<i32>} : memref<7x8x1xf32, #tpu.memory_space<vmem>>, vector<1x8x1xf32>,
    %c0_292 = arith.constant 0 : index
    %c0_293 = arith.constant 0 : index
    %515 = vector.load %arg18[%c0_292, %c0_293] : memref<8x1xf32, #tpu.memory_space<vmem>>, vector<8x1xf32>
    %516 = arith.maximumf %515, %510 : vector<8x1xf32>
    %c0_294 = arith.constant 0 : index
    %c0_295 = arith.constant 0 : index
    %517 = vector.load %arg18[%c0_294, %c0_295] : memref<8x1xf32, #tpu.memory_space<vmem>>, vector<8x1xf32>
    tpu.vector_store %arg18[%c0_294, %c0_295], %516 {strides = array<i32>} : memref<8x1xf32, #tpu.memory_space<vmem>>, vector<8x1xf32>,
    %c0_296 = arith.constant 0 : index
    %c0_297 = arith.constant 0 : index
    %518 = vector.load %arg1[%c0_296, %c0_297] : memref<8x32xf32, #tpu.memory_space<vmem>>, vector<8x32xf32>
    %519 = vector.broadcast %510 : vector<8x1xf32> to vector<8x32xf32>
    %520 = arith.mulf %519, %518 : vector<8x32xf32>
    %cst_298 = arith.constant dense<0.000000e+00> : vector<32xf32>
    %521 = vector.multi_reduction <add>, %520, %cst_298 [0] : vector<8x32xf32> to vector<32xf32>
    %522 = vector.shape_cast %521 : vector<32xf32> to vector<1x32xf32>
    %c0_299 = arith.constant 0 : index
    %c0_300 = arith.constant 0 : index
    %523 = vector.load %arg17[%c0_299, %c0_300] : memref<1x32xf32, #tpu.memory_space<vmem>>, vector<1x32xf32>
    tpu.vector_store %arg17[%c0_299, %c0_300], %522 {strides = array<i32>} : memref<1x32xf32, #tpu.memory_space<vmem>>, vector<1x32xf32>,
    %c3_i32 = arith.constant 3 : i32
    %c0_301 = arith.constant 0 : index
    %c0_302 = arith.constant 0 : index
    %524 = vector.load %arg17[%c0_301, %c0_302] : memref<1x32xf32, #tpu.memory_space<vmem>>, vector<1x32xf32>
    %c0_303 = arith.constant 0 : index
    %c0_304 = arith.constant 0 : index
    %525 = vector.load %arg15[%c0_303, %c0_304] : memref<1x32xf32, #tpu.memory_space<vmem>>, vector<1x32xf32>
    %c0_305 = arith.constant 0 : index
    %c0_306 = arith.constant 0 : index
    %526 = vector.load %arg16[%c0_305, %c0_306] : memref<1x32xf32, #tpu.memory_space<vmem>>, vector<1x32xf32>
    %c0_307 = arith.constant 0 : index
    %c0_308 = arith.constant 0 : index
    %527 = vector.load %arg2[%c0_307, %c0_308] : memref<32x128xf32, #tpu.memory_space<vmem>>, vector<32x128xf32>
    %cst_309 = arith.constant dense<0.000000e+00> : vector<1x128xf32>
    %528 = tpu.matmul %524, %527, %cst_309 {dimension_numbers = #tpu.dot_dimension_numbers<[1], [0], [0], [1], [0, 0, 1, 1], [], []>} : vector<1x32xf32>, vector<32x128xf32>, vector<1x128xf32> -> vector<1x128xf32>
    %c0_310 = arith.constant 0 : index
    %c0_311 = arith.constant 0 : index
    %529 = vector.load %arg3[%c0_310, %c0_311] : memref<32x128xf32, #tpu.memory_space<vmem>>, vector<32x128xf32>
    %cst_312 = arith.constant dense<0.000000e+00> : vector<1x128xf32>
    %530 = tpu.matmul %525, %529, %cst_312 {dimension_numbers = #tpu.dot_dimension_numbers<[1], [0], [0], [1], [0, 0, 1, 1], [], []>} : vector<1x32xf32>, vector<32x128xf32>, vector<1x128xf32> -> vector<1x128xf32>
    %531 = arith.addf %528, %530 : vector<1x128xf32>
    %c0_313 = arith.constant 0 : index
    %c0_314 = arith.constant 0 : index
    %532 = vector.load %arg4[%c0_313, %c0_314] : memref<1x128xf32, #tpu.memory_space<vmem>>, vector<1x128xf32>
    %533 = arith.addf %531, %532 : vector<1x128xf32>
    %534 = vector.extract_strided_slice %533 {offsets = [0, 0], sizes = [1, 32], strides = [1, 1]} : vector<1x128xf32> to vector<1x32xf32>
    %cst_315 = arith.constant 5.000000e-01 : f32
    %535 = vector.broadcast %cst_315 : f32 to vector<1x32xf32>
    %536 = arith.mulf %535, %534 : vector<1x32xf32>
    %537 = math.tanh %536 : vector<1x32xf32>
    %cst_316 = arith.constant 5.000000e-01 : f32
    %538 = vector.broadcast %cst_316 : f32 to vector<1x32xf32>
    %539 = arith.mulf %538, %537 : vector<1x32xf32>
    %cst_317 = arith.constant 5.000000e-01 : f32
    %540 = vector.broadcast %cst_317 : f32 to vector<1x32xf32>
    %541 = arith.addf %539, %540 : vector<1x32xf32>
    %542 = vector.extract_strided_slice %533 {offsets = [0, 32], sizes = [1, 32], strides = [1, 1]} : vector<1x128xf32> to vector<1x32xf32>
    %cst_318 = arith.constant 5.000000e-01 : f32
    %543 = vector.broadcast %cst_318 : f32 to vector<1x32xf32>
    %544 = arith.mulf %543, %542 : vector<1x32xf32>
    %545 = math.tanh %544 : vector<1x32xf32>
    %cst_319 = arith.constant 5.000000e-01 : f32
    %546 = vector.broadcast %cst_319 : f32 to vector<1x32xf32>
    %547 = arith.mulf %546, %545 : vector<1x32xf32>
    %cst_320 = arith.constant 5.000000e-01 : f32
    %548 = vector.broadcast %cst_320 : f32 to vector<1x32xf32>
    %549 = arith.addf %547, %548 : vector<1x32xf32>
    %550 = vector.extract_strided_slice %533 {offsets = [0, 64], sizes = [1, 32], strides = [1, 1]} : vector<1x128xf32> to vector<1x32xf32>
    %551 = math.tanh %550 : vector<1x32xf32>
    %552 = vector.extract_strided_slice %533 {offsets = [0, 96], sizes = [1, 32], strides = [1, 1]} : vector<1x128xf32> to vector<1x32xf32>
    %cst_321 = arith.constant 5.000000e-01 : f32
    %553 = vector.broadcast %cst_321 : f32 to vector<1x32xf32>
    %554 = arith.mulf %553, %552 : vector<1x32xf32>
    %555 = math.tanh %554 : vector<1x32xf32>
    %cst_322 = arith.constant 5.000000e-01 : f32
    %556 = vector.broadcast %cst_322 : f32 to vector<1x32xf32>
    %557 = arith.mulf %556, %555 : vector<1x32xf32>
    %cst_323 = arith.constant 5.000000e-01 : f32
    %558 = vector.broadcast %cst_323 : f32 to vector<1x32xf32>
    %559 = arith.addf %557, %558 : vector<1x32xf32>
    %560 = arith.mulf %549, %526 : vector<1x32xf32>
    %561 = arith.mulf %541, %551 : vector<1x32xf32>
    %562 = arith.addf %560, %561 : vector<1x32xf32>
    %563 = math.tanh %562 : vector<1x32xf32>
    %564 = arith.mulf %559, %563 : vector<1x32xf32>
    %c0_324 = arith.constant 0 : index
    %c0_325 = arith.constant 0 : index
    %565 = vector.load %arg15[%c0_324, %c0_325] : memref<1x32xf32, #tpu.memory_space<vmem>>, vector<1x32xf32>
    tpu.vector_store %arg15[%c0_324, %c0_325], %564 {strides = array<i32>} : memref<1x32xf32, #tpu.memory_space<vmem>>, vector<1x32xf32>,
    %c0_326 = arith.constant 0 : index
    %c0_327 = arith.constant 0 : index
    %566 = vector.load %arg16[%c0_326, %c0_327] : memref<1x32xf32, #tpu.memory_space<vmem>>, vector<1x32xf32>
    tpu.vector_store %arg16[%c0_326, %c0_327], %562 {strides = array<i32>} : memref<1x32xf32, #tpu.memory_space<vmem>>, vector<1x32xf32>,
    %c0_328 = arith.constant 0 : index
    %c0_329 = arith.constant 0 : index
    %567 = vector.load %arg21[%c0_328, %c0_329] : memref<8x32xf32, #tpu.memory_space<vmem>>, vector<8x32xf32>
    %c0_330 = arith.constant 0 : index
    %c0_331 = arith.constant 0 : index
    %568 = vector.load %arg8[%c0_330, %c0_331] : memref<1x32xf32, #tpu.memory_space<vmem>>, vector<1x32xf32>
    %c0_332 = arith.constant 0 : index
    %c0_333 = arith.constant 0 : index
    %569 = vector.load %arg7[%c0_332, %c0_333] : memref<32x32xf32, #tpu.memory_space<vmem>>, vector<32x32xf32>
    %cst_334 = arith.constant dense<0.000000e+00> : vector<1x32xf32>
    %570 = tpu.matmul %564, %569, %cst_334 {dimension_numbers = #tpu.dot_dimension_numbers<[1], [0], [0], [1], [0, 0, 1, 1], [], []>} : vector<1x32xf32>, vector<32x32xf32>, vector<1x32xf32> -> vector<1x32xf32>
    %571 = vector.broadcast %570 : vector<1x32xf32> to vector<8x32xf32>
    %572 = arith.addf %567, %571 : vector<8x32xf32>
    %573 = math.tanh %572 : vector<8x32xf32>
    %574 = vector.broadcast %568 : vector<1x32xf32> to vector<8x32xf32>
    %575 = arith.mulf %573, %574 : vector<8x32xf32>
    %cst_335 = arith.constant dense<0.000000e+00> : vector<8xf32>
    %576 = vector.multi_reduction <add>, %575, %cst_335 [1] : vector<8x32xf32> to vector<8xf32>
    %577 = vector.shape_cast %576 : vector<8xf32> to vector<8x1xf32>
    %cst_336 = arith.constant dense<0xFF800000> : vector<1xf32>
    %578 = vector.multi_reduction <maximumf>, %577, %cst_336 [0] : vector<8x1xf32> to vector<1xf32>
    %579 = vector.shape_cast %578 : vector<1xf32> to vector<1x1xf32>
    %580 = vector.broadcast %579 : vector<1x1xf32> to vector<8x1xf32>
    %581 = arith.subf %577, %580 : vector<8x1xf32>
    %582 = math.exp %581 : vector<8x1xf32>
    %cst_337 = arith.constant dense<0.000000e+00> : vector<1xf32>
    %583 = vector.multi_reduction <add>, %582, %cst_337 [0] : vector<8x1xf32> to vector<1xf32>
    %584 = vector.shape_cast %583 : vector<1xf32> to vector<1x1xf32>
    %585 = vector.broadcast %584 : vector<1x1xf32> to vector<8x1xf32>
    %586 = arith.divf %582, %585 : vector<8x1xf32>
    %587 = vector.broadcast %586 : vector<8x1xf32> to vector<8x32xf32>
    %588 = arith.mulf %587, %567 : vector<8x32xf32>
    %cst_338 = arith.constant dense<0.000000e+00> : vector<32xf32>
    %589 = vector.multi_reduction <add>, %588, %cst_338 [0] : vector<8x32xf32> to vector<32xf32>
    %590 = vector.shape_cast %589 : vector<32xf32> to vector<1x32xf32>
    %c0_339 = arith.constant 0 : index
    %c0_340 = arith.constant 0 : index
    %591 = vector.load %arg7[%c0_339, %c0_340] : memref<32x32xf32, #tpu.memory_space<vmem>>, vector<32x32xf32>
    %cst_341 = arith.constant dense<0.000000e+00> : vector<1x32xf32>
    %592 = tpu.matmul %590, %591, %cst_341 {dimension_numbers = #tpu.dot_dimension_numbers<[1], [0], [0], [1], [0, 0, 1, 1], [], []>} : vector<1x32xf32>, vector<32x32xf32>, vector<1x32xf32> -> vector<1x32xf32>
    %593 = vector.broadcast %592 : vector<1x32xf32> to vector<8x32xf32>
    %594 = arith.addf %567, %593 : vector<8x32xf32>
    %595 = math.tanh %594 : vector<8x32xf32>
    %596 = vector.broadcast %568 : vector<1x32xf32> to vector<8x32xf32>
    %597 = arith.mulf %595, %596 : vector<8x32xf32>
    %cst_342 = arith.constant dense<0.000000e+00> : vector<8xf32>
    %598 = vector.multi_reduction <add>, %597, %cst_342 [1] : vector<8x32xf32> to vector<8xf32>
    %599 = vector.shape_cast %598 : vector<8xf32> to vector<8x1xf32>
    %cst_343 = arith.constant dense<0xFF800000> : vector<1xf32>
    %600 = vector.multi_reduction <maximumf>, %599, %cst_343 [0] : vector<8x1xf32> to vector<1xf32>
    %601 = vector.shape_cast %600 : vector<1xf32> to vector<1x1xf32>
    %602 = vector.broadcast %601 : vector<1x1xf32> to vector<8x1xf32>
    %603 = arith.subf %599, %602 : vector<8x1xf32>
    %604 = math.exp %603 : vector<8x1xf32>
    %cst_344 = arith.constant dense<0.000000e+00> : vector<1xf32>
    %605 = vector.multi_reduction <add>, %604, %cst_344 [0] : vector<8x1xf32> to vector<1xf32>
    %606 = vector.shape_cast %605 : vector<1xf32> to vector<1x1xf32>
    %607 = vector.broadcast %606 : vector<1x1xf32> to vector<8x1xf32>
    %608 = arith.divf %604, %607 : vector<8x1xf32>
    %609 = vector.broadcast %608 : vector<8x1xf32> to vector<8x32xf32>
    %610 = arith.mulf %609, %567 : vector<8x32xf32>
    %cst_345 = arith.constant dense<0.000000e+00> : vector<32xf32>
    %611 = vector.multi_reduction <add>, %610, %cst_345 [0] : vector<8x32xf32> to vector<32xf32>
    %612 = vector.shape_cast %611 : vector<32xf32> to vector<1x32xf32>
    %c0_346 = arith.constant 0 : index
    %c0_347 = arith.constant 0 : index
    %613 = vector.load %arg9[%c0_346, %c0_347] : memref<32x32xf32, #tpu.memory_space<vmem>>, vector<32x32xf32>
    %cst_348 = arith.constant dense<0.000000e+00> : vector<1x32xf32>
    %614 = tpu.matmul %612, %613, %cst_348 {dimension_numbers = #tpu.dot_dimension_numbers<[1], [0], [0], [1], [0, 0, 1, 1], [], []>} : vector<1x32xf32>, vector<32x32xf32>, vector<1x32xf32> -> vector<1x32xf32>
    %c0_349 = arith.constant 0 : index
    %c0_350 = arith.constant 0 : index
    %615 = vector.load %arg20[%c0_349, %c0_350] : memref<8x32xf32, #tpu.memory_space<vmem>>, vector<8x32xf32>
    %616 = vector.broadcast %614 : vector<1x32xf32> to vector<8x32xf32>
    %617 = arith.addf %615, %616 : vector<8x32xf32>
    %618 = math.tanh %617 : vector<8x32xf32>
    %c0_351 = arith.constant 0 : index
    %c0_352 = arith.constant 0 : index
    %619 = vector.load %arg10[%c0_351, %c0_352] : memref<1x32xf32, #tpu.memory_space<vmem>>, vector<1x32xf32>
    %620 = vector.broadcast %619 : vector<1x32xf32> to vector<8x32xf32>
    %621 = arith.mulf %618, %620 : vector<8x32xf32>
    %cst_353 = arith.constant dense<0.000000e+00> : vector<8xf32>
    %622 = vector.multi_reduction <add>, %621, %cst_353 [1] : vector<8x32xf32> to vector<8xf32>
    %623 = vector.shape_cast %622 : vector<8xf32> to vector<8x1xf32>
    %c0_354 = arith.constant 0 : index
    %c0_355 = arith.constant 0 : index
    %624 = vector.load %arg18[%c0_354, %c0_355] : memref<8x1xf32, #tpu.memory_space<vmem>>, vector<8x1xf32>
    %cst_356 = arith.constant 5.000000e-01 : f32
    %625 = vector.broadcast %cst_356 : f32 to vector<8x1xf32>
    %626 = arith.cmpf ogt, %624, %625 : vector<8x1xf32>
    %cst_357 = arith.constant -1.000000e+06 : f32
    %627 = vector.broadcast %cst_357 : f32 to vector<8x1xf32>
    %628 = arith.select %626, %627, %623 : vector<8x1xi1>, vector<8x1xf32>
    %629 = tpu.iota {dimensions = array<i32: 0>} : vector<8x1xi32>
    %630 = arith.sitofp %629 : vector<8x1xi32> to vector<8x1xf32>
    %cst_358 = arith.constant dense<0xFF800000> : vector<1xf32>
    %631 = vector.multi_reduction <maximumf>, %628, %cst_358 [0] : vector<8x1xf32> to vector<1xf32>
    %632 = vector.shape_cast %631 : vector<1xf32> to vector<1x1xf32>
    %633 = vector.broadcast %632 : vector<1x1xf32> to vector<8x1xf32>
    %634 = arith.cmpf oge, %628, %633 : vector<8x1xf32>
    %cst_359 = arith.constant 8.000000e+00 : f32
    %635 = vector.broadcast %cst_359 : f32 to vector<8x1xf32>
    %636 = arith.select %634, %630, %635 : vector<8x1xi1>, vector<8x1xf32>
    %cst_360 = arith.constant dense<0x7F800000> : vector<1xf32>
    %637 = vector.multi_reduction <minimumf>, %636, %cst_360 [0] : vector<8x1xf32> to vector<1xf32>
    %638 = vector.shape_cast %637 : vector<1xf32> to vector<1x1xf32>
    %cst_361 = arith.constant 7.000000e+00 : f32
    %cst_362 = arith.constant 5.000000e-01 : f32
    %639 = arith.subf %cst_361, %cst_362 : f32
    %640 = vector.broadcast %639 : f32 to vector<8x1xf32>
    %641 = arith.cmpf ogt, %630, %640 : vector<8x1xf32>
    %cst_363 = arith.constant -3.000000e+38 : f32
    %642 = vector.broadcast %cst_363 : f32 to vector<8x1xf32>
    %643 = arith.select %641, %642, %628 : vector<8x1xi1>, vector<8x1xf32>
    %cst_364 = arith.constant dense<0xFF800000> : vector<1xf32>
    %644 = vector.multi_reduction <maximumf>, %643, %cst_364 [0] : vector<8x1xf32> to vector<1xf32>
    %645 = vector.shape_cast %644 : vector<1xf32> to vector<1x1xf32>
    %646 = vector.broadcast %645 : vector<1x1xf32> to vector<8x1xf32>
    %647 = arith.cmpf oge, %643, %646 : vector<8x1xf32>
    %cst_365 = arith.constant 8.000000e+00 : f32
    %648 = vector.broadcast %cst_365 : f32 to vector<8x1xf32>
    %649 = arith.select %647, %630, %648 : vector<8x1xi1>, vector<8x1xf32>
    %cst_366 = arith.constant dense<0x7F800000> : vector<1xf32>
    %650 = vector.multi_reduction <minimumf>, %649, %cst_366 [0] : vector<8x1xf32> to vector<1xf32>
    %651 = vector.shape_cast %650 : vector<1xf32> to vector<1x1xf32>
    %652 = vector.broadcast %c3_i32 : i32 to vector<1x1xi32>
    %c0_i32_367 = arith.constant 0 : i32
    %653 = vector.broadcast %c0_i32_367 : i32 to vector<1x1xi32>
    %654 = arith.cmpi eq, %652, %653 : vector<1x1xi32>
    %cst_368 = arith.constant 7.000000e+00 : f32
    %cst_369 = arith.constant 5.000000e-01 : f32
    %655 = arith.subf %cst_368, %cst_369 : f32
    %656 = vector.broadcast %655 : f32 to vector<1x1xf32>
    %657 = arith.cmpf ogt, %638, %656 : vector<1x1xf32>
    %658 = arith.andi %657, %654 : vector<1x1xi1>
    %cst_370 = arith.constant dense<true> : vector<1x1xi1>
    %659 = arith.xori %654, %cst_370 : vector<1x1xi1>
    %660 = arith.andi %657, %659 : vector<1x1xi1>
    %661 = arith.select %658, %651, %638 : vector<1x1xi1>, vector<1x1xf32>
    %c0_371 = arith.constant 0 : index
    %c0_372 = arith.constant 0 : index
    %662 = vector.load %arg19[%c0_371, %c0_372] : memref<1x1xf32, #tpu.memory_space<vmem>>, vector<1x1xf32>
    %cst_373 = arith.constant 1.000000e+00 : f32
    %cst_374 = arith.constant 0.000000e+00 : f32
    %663 = vector.broadcast %cst_373 : f32 to vector<1x1xf32>
    %664 = vector.broadcast %cst_374 : f32 to vector<1x1xf32>
    %665 = arith.select %660, %663, %664 : vector<1x1xi1>, vector<1x1xf32>
    %666 = arith.maximumf %662, %665 : vector<1x1xf32>
    %c0_375 = arith.constant 0 : index
    %c0_376 = arith.constant 0 : index
    %667 = vector.load %arg19[%c0_375, %c0_376] : memref<1x1xf32, #tpu.memory_space<vmem>>, vector<1x1xf32>
    tpu.vector_store %arg19[%c0_375, %c0_376], %666 {strides = array<i32>} : memref<1x1xf32, #tpu.memory_space<vmem>>, vector<1x1xf32>,
    %668 = vector.broadcast %661 : vector<1x1xf32> to vector<8x1xf32>
    %669 = arith.subf %630, %668 : vector<8x1xf32>
    %670 = math.absf %669 : vector<8x1xf32>
    %cst_377 = arith.constant 5.000000e-01 : f32
    %671 = vector.broadcast %cst_377 : f32 to vector<8x1xf32>
    %672 = arith.cmpf olt, %670, %671 : vector<8x1xf32>
    %cst_378 = arith.constant 1.000000e+00 : f32
    %cst_379 = arith.constant 0.000000e+00 : f32
    %673 = vector.broadcast %cst_378 : f32 to vector<8x1xf32>
    %674 = vector.broadcast %cst_379 : f32 to vector<8x1xf32>
    %675 = arith.select %672, %673, %674 : vector<8x1xi1>, vector<8x1xf32>
    %cst_380 = arith.constant 1.000000e+00 : f32
    %676 = vector.broadcast %cst_380 : f32 to vector<1x1xf32>
    %677 = arith.subf %676, %666 : vector<1x1xf32>
    %678 = vector.broadcast %677 : vector<1x1xf32> to vector<8x1xf32>
    %679 = arith.mulf %675, %678 : vector<8x1xf32>
    %680 = arith.index_cast %c3_i32 : i32 to index
    %c0_381 = arith.constant 0 : index
    %c0_382 = arith.constant 0 : index
    %681 = vector.load %arg14[%680, %c0_381, %c0_382] : memref<7x8x1xf32, #tpu.memory_space<vmem>>, vector<1x8x1xf32>
    %682 = vector.shape_cast %681 : vector<1x8x1xf32> to vector<8x1xf32>
    %683 = vector.shape_cast %679 : vector<8x1xf32> to vector<1x8x1xf32>
    tpu.vector_store %arg14[%680, %c0_381, %c0_382], %683 {strides = array<i32>} : memref<7x8x1xf32, #tpu.memory_space<vmem>>, vector<1x8x1xf32>,
    %c0_383 = arith.constant 0 : index
    %c0_384 = arith.constant 0 : index
    %684 = vector.load %arg18[%c0_383, %c0_384] : memref<8x1xf32, #tpu.memory_space<vmem>>, vector<8x1xf32>
    %685 = arith.maximumf %684, %679 : vector<8x1xf32>
    %c0_385 = arith.constant 0 : index
    %c0_386 = arith.constant 0 : index
    %686 = vector.load %arg18[%c0_385, %c0_386] : memref<8x1xf32, #tpu.memory_space<vmem>>, vector<8x1xf32>
    tpu.vector_store %arg18[%c0_385, %c0_386], %685 {strides = array<i32>} : memref<8x1xf32, #tpu.memory_space<vmem>>, vector<8x1xf32>,
    %c0_387 = arith.constant 0 : index
    %c0_388 = arith.constant 0 : index
    %687 = vector.load %arg1[%c0_387, %c0_388] : memref<8x32xf32, #tpu.memory_space<vmem>>, vector<8x32xf32>
    %688 = vector.broadcast %679 : vector<8x1xf32> to vector<8x32xf32>
    %689 = arith.mulf %688, %687 : vector<8x32xf32>
    %cst_389 = arith.constant dense<0.000000e+00> : vector<32xf32>
    %690 = vector.multi_reduction <add>, %689, %cst_389 [0] : vector<8x32xf32> to vector<32xf32>
    %691 = vector.shape_cast %690 : vector<32xf32> to vector<1x32xf32>
    %c0_390 = arith.constant 0 : index
    %c0_391 = arith.constant 0 : index
    %692 = vector.load %arg17[%c0_390, %c0_391] : memref<1x32xf32, #tpu.memory_space<vmem>>, vector<1x32xf32>
    tpu.vector_store %arg17[%c0_390, %c0_391], %691 {strides = array<i32>} : memref<1x32xf32, #tpu.memory_space<vmem>>, vector<1x32xf32>,
    %c4_i32 = arith.constant 4 : i32
    %c0_392 = arith.constant 0 : index
    %c0_393 = arith.constant 0 : index
    %693 = vector.load %arg17[%c0_392, %c0_393] : memref<1x32xf32, #tpu.memory_space<vmem>>, vector<1x32xf32>
    %c0_394 = arith.constant 0 : index
    %c0_395 = arith.constant 0 : index
    %694 = vector.load %arg15[%c0_394, %c0_395] : memref<1x32xf32, #tpu.memory_space<vmem>>, vector<1x32xf32>
    %c0_396 = arith.constant 0 : index
    %c0_397 = arith.constant 0 : index
    %695 = vector.load %arg16[%c0_396, %c0_397] : memref<1x32xf32, #tpu.memory_space<vmem>>, vector<1x32xf32>
    %c0_398 = arith.constant 0 : index
    %c0_399 = arith.constant 0 : index
    %696 = vector.load %arg2[%c0_398, %c0_399] : memref<32x128xf32, #tpu.memory_space<vmem>>, vector<32x128xf32>
    %cst_400 = arith.constant dense<0.000000e+00> : vector<1x128xf32>
    %697 = tpu.matmul %693, %696, %cst_400 {dimension_numbers = #tpu.dot_dimension_numbers<[1], [0], [0], [1], [0, 0, 1, 1], [], []>} : vector<1x32xf32>, vector<32x128xf32>, vector<1x128xf32> -> vector<1x128xf32>
    %c0_401 = arith.constant 0 : index
    %c0_402 = arith.constant 0 : index
    %698 = vector.load %arg3[%c0_401, %c0_402] : memref<32x128xf32, #tpu.memory_space<vmem>>, vector<32x128xf32>
    %cst_403 = arith.constant dense<0.000000e+00> : vector<1x128xf32>
    %699 = tpu.matmul %694, %698, %cst_403 {dimension_numbers = #tpu.dot_dimension_numbers<[1], [0], [0], [1], [0, 0, 1, 1], [], []>} : vector<1x32xf32>, vector<32x128xf32>, vector<1x128xf32> -> vector<1x128xf32>
    %700 = arith.addf %697, %699 : vector<1x128xf32>
    %c0_404 = arith.constant 0 : index
    %c0_405 = arith.constant 0 : index
    %701 = vector.load %arg4[%c0_404, %c0_405] : memref<1x128xf32, #tpu.memory_space<vmem>>, vector<1x128xf32>
    %702 = arith.addf %700, %701 : vector<1x128xf32>
    %703 = vector.extract_strided_slice %702 {offsets = [0, 0], sizes = [1, 32], strides = [1, 1]} : vector<1x128xf32> to vector<1x32xf32>
    %cst_406 = arith.constant 5.000000e-01 : f32
    %704 = vector.broadcast %cst_406 : f32 to vector<1x32xf32>
    %705 = arith.mulf %704, %703 : vector<1x32xf32>
    %706 = math.tanh %705 : vector<1x32xf32>
    %cst_407 = arith.constant 5.000000e-01 : f32
    %707 = vector.broadcast %cst_407 : f32 to vector<1x32xf32>
    %708 = arith.mulf %707, %706 : vector<1x32xf32>
    %cst_408 = arith.constant 5.000000e-01 : f32
    %709 = vector.broadcast %cst_408 : f32 to vector<1x32xf32>
    %710 = arith.addf %708, %709 : vector<1x32xf32>
    %711 = vector.extract_strided_slice %702 {offsets = [0, 32], sizes = [1, 32], strides = [1, 1]} : vector<1x128xf32> to vector<1x32xf32>
    %cst_409 = arith.constant 5.000000e-01 : f32
    %712 = vector.broadcast %cst_409 : f32 to vector<1x32xf32>
    %713 = arith.mulf %712, %711 : vector<1x32xf32>
    %714 = math.tanh %713 : vector<1x32xf32>
    %cst_410 = arith.constant 5.000000e-01 : f32
    %715 = vector.broadcast %cst_410 : f32 to vector<1x32xf32>
    %716 = arith.mulf %715, %714 : vector<1x32xf32>
    %cst_411 = arith.constant 5.000000e-01 : f32
    %717 = vector.broadcast %cst_411 : f32 to vector<1x32xf32>
    %718 = arith.addf %716, %717 : vector<1x32xf32>
    %719 = vector.extract_strided_slice %702 {offsets = [0, 64], sizes = [1, 32], strides = [1, 1]} : vector<1x128xf32> to vector<1x32xf32>
    %720 = math.tanh %719 : vector<1x32xf32>
    %721 = vector.extract_strided_slice %702 {offsets = [0, 96], sizes = [1, 32], strides = [1, 1]} : vector<1x128xf32> to vector<1x32xf32>
    %cst_412 = arith.constant 5.000000e-01 : f32
    %722 = vector.broadcast %cst_412 : f32 to vector<1x32xf32>
    %723 = arith.mulf %722, %721 : vector<1x32xf32>
    %724 = math.tanh %723 : vector<1x32xf32>
    %cst_413 = arith.constant 5.000000e-01 : f32
    %725 = vector.broadcast %cst_413 : f32 to vector<1x32xf32>
    %726 = arith.mulf %725, %724 : vector<1x32xf32>
    %cst_414 = arith.constant 5.000000e-01 : f32
    %727 = vector.broadcast %cst_414 : f32 to vector<1x32xf32>
    %728 = arith.addf %726, %727 : vector<1x32xf32>
    %729 = arith.mulf %718, %695 : vector<1x32xf32>
    %730 = arith.mulf %710, %720 : vector<1x32xf32>
    %731 = arith.addf %729, %730 : vector<1x32xf32>
    %732 = math.tanh %731 : vector<1x32xf32>
    %733 = arith.mulf %728, %732 : vector<1x32xf32>
    %c0_415 = arith.constant 0 : index
    %c0_416 = arith.constant 0 : index
    %734 = vector.load %arg15[%c0_415, %c0_416] : memref<1x32xf32, #tpu.memory_space<vmem>>, vector<1x32xf32>
    tpu.vector_store %arg15[%c0_415, %c0_416], %733 {strides = array<i32>} : memref<1x32xf32, #tpu.memory_space<vmem>>, vector<1x32xf32>,
    %c0_417 = arith.constant 0 : index
    %c0_418 = arith.constant 0 : index
    %735 = vector.load %arg16[%c0_417, %c0_418] : memref<1x32xf32, #tpu.memory_space<vmem>>, vector<1x32xf32>
    tpu.vector_store %arg16[%c0_417, %c0_418], %731 {strides = array<i32>} : memref<1x32xf32, #tpu.memory_space<vmem>>, vector<1x32xf32>,
    %c0_419 = arith.constant 0 : index
    %c0_420 = arith.constant 0 : index
    %736 = vector.load %arg21[%c0_419, %c0_420] : memref<8x32xf32, #tpu.memory_space<vmem>>, vector<8x32xf32>
    %c0_421 = arith.constant 0 : index
    %c0_422 = arith.constant 0 : index
    %737 = vector.load %arg8[%c0_421, %c0_422] : memref<1x32xf32, #tpu.memory_space<vmem>>, vector<1x32xf32>
    %c0_423 = arith.constant 0 : index
    %c0_424 = arith.constant 0 : index
    %738 = vector.load %arg7[%c0_423, %c0_424] : memref<32x32xf32, #tpu.memory_space<vmem>>, vector<32x32xf32>
    %cst_425 = arith.constant dense<0.000000e+00> : vector<1x32xf32>
    %739 = tpu.matmul %733, %738, %cst_425 {dimension_numbers = #tpu.dot_dimension_numbers<[1], [0], [0], [1], [0, 0, 1, 1], [], []>} : vector<1x32xf32>, vector<32x32xf32>, vector<1x32xf32> -> vector<1x32xf32>
    %740 = vector.broadcast %739 : vector<1x32xf32> to vector<8x32xf32>
    %741 = arith.addf %736, %740 : vector<8x32xf32>
    %742 = math.tanh %741 : vector<8x32xf32>
    %743 = vector.broadcast %737 : vector<1x32xf32> to vector<8x32xf32>
    %744 = arith.mulf %742, %743 : vector<8x32xf32>
    %cst_426 = arith.constant dense<0.000000e+00> : vector<8xf32>
    %745 = vector.multi_reduction <add>, %744, %cst_426 [1] : vector<8x32xf32> to vector<8xf32>
    %746 = vector.shape_cast %745 : vector<8xf32> to vector<8x1xf32>
    %cst_427 = arith.constant dense<0xFF800000> : vector<1xf32>
    %747 = vector.multi_reduction <maximumf>, %746, %cst_427 [0] : vector<8x1xf32> to vector<1xf32>
    %748 = vector.shape_cast %747 : vector<1xf32> to vector<1x1xf32>
    %749 = vector.broadcast %748 : vector<1x1xf32> to vector<8x1xf32>
    %750 = arith.subf %746, %749 : vector<8x1xf32>
    %751 = math.exp %750 : vector<8x1xf32>
    %cst_428 = arith.constant dense<0.000000e+00> : vector<1xf32>
    %752 = vector.multi_reduction <add>, %751, %cst_428 [0] : vector<8x1xf32> to vector<1xf32>
    %753 = vector.shape_cast %752 : vector<1xf32> to vector<1x1xf32>
    %754 = vector.broadcast %753 : vector<1x1xf32> to vector<8x1xf32>
    %755 = arith.divf %751, %754 : vector<8x1xf32>
    %756 = vector.broadcast %755 : vector<8x1xf32> to vector<8x32xf32>
    %757 = arith.mulf %756, %736 : vector<8x32xf32>
    %cst_429 = arith.constant dense<0.000000e+00> : vector<32xf32>
    %758 = vector.multi_reduction <add>, %757, %cst_429 [0] : vector<8x32xf32> to vector<32xf32>
    %759 = vector.shape_cast %758 : vector<32xf32> to vector<1x32xf32>
    %c0_430 = arith.constant 0 : index
    %c0_431 = arith.constant 0 : index
    %760 = vector.load %arg7[%c0_430, %c0_431] : memref<32x32xf32, #tpu.memory_space<vmem>>, vector<32x32xf32>
    %cst_432 = arith.constant dense<0.000000e+00> : vector<1x32xf32>
    %761 = tpu.matmul %759, %760, %cst_432 {dimension_numbers = #tpu.dot_dimension_numbers<[1], [0], [0], [1], [0, 0, 1, 1], [], []>} : vector<1x32xf32>, vector<32x32xf32>, vector<1x32xf32> -> vector<1x32xf32>
    %762 = vector.broadcast %761 : vector<1x32xf32> to vector<8x32xf32>
    %763 = arith.addf %736, %762 : vector<8x32xf32>
    %764 = math.tanh %763 : vector<8x32xf32>
    %765 = vector.broadcast %737 : vector<1x32xf32> to vector<8x32xf32>
    %766 = arith.mulf %764, %765 : vector<8x32xf32>
    %cst_433 = arith.constant dense<0.000000e+00> : vector<8xf32>
    %767 = vector.multi_reduction <add>, %766, %cst_433 [1] : vector<8x32xf32> to vector<8xf32>
    %768 = vector.shape_cast %767 : vector<8xf32> to vector<8x1xf32>
    %cst_434 = arith.constant dense<0xFF800000> : vector<1xf32>
    %769 = vector.multi_reduction <maximumf>, %768, %cst_434 [0] : vector<8x1xf32> to vector<1xf32>
    %770 = vector.shape_cast %769 : vector<1xf32> to vector<1x1xf32>
    %771 = vector.broadcast %770 : vector<1x1xf32> to vector<8x1xf32>
    %772 = arith.subf %768, %771 : vector<8x1xf32>
    %773 = math.exp %772 : vector<8x1xf32>
    %cst_435 = arith.constant dense<0.000000e+00> : vector<1xf32>
    %774 = vector.multi_reduction <add>, %773, %cst_435 [0] : vector<8x1xf32> to vector<1xf32>
    %775 = vector.shape_cast %774 : vector<1xf32> to vector<1x1xf32>
    %776 = vector.broadcast %775 : vector<1x1xf32> to vector<8x1xf32>
    %777 = arith.divf %773, %776 : vector<8x1xf32>
    %778 = vector.broadcast %777 : vector<8x1xf32> to vector<8x32xf32>
    %779 = arith.mulf %778, %736 : vector<8x32xf32>
    %cst_436 = arith.constant dense<0.000000e+00> : vector<32xf32>
    %780 = vector.multi_reduction <add>, %779, %cst_436 [0] : vector<8x32xf32> to vector<32xf32>
    %781 = vector.shape_cast %780 : vector<32xf32> to vector<1x32xf32>
    %c0_437 = arith.constant 0 : index
    %c0_438 = arith.constant 0 : index
    %782 = vector.load %arg9[%c0_437, %c0_438] : memref<32x32xf32, #tpu.memory_space<vmem>>, vector<32x32xf32>
    %cst_439 = arith.constant dense<0.000000e+00> : vector<1x32xf32>
    %783 = tpu.matmul %781, %782, %cst_439 {dimension_numbers = #tpu.dot_dimension_numbers<[1], [0], [0], [1], [0, 0, 1, 1], [], []>} : vector<1x32xf32>, vector<32x32xf32>, vector<1x32xf32> -> vector<1x32xf32>
    %c0_440 = arith.constant 0 : index
    %c0_441 = arith.constant 0 : index
    %784 = vector.load %arg20[%c0_440, %c0_441] : memref<8x32xf32, #tpu.memory_space<vmem>>, vector<8x32xf32>
    %785 = vector.broadcast %783 : vector<1x32xf32> to vector<8x32xf32>
    %786 = arith.addf %784, %785 : vector<8x32xf32>
    %787 = math.tanh %786 : vector<8x32xf32>
    %c0_442 = arith.constant 0 : index
    %c0_443 = arith.constant 0 : index
    %788 = vector.load %arg10[%c0_442, %c0_443] : memref<1x32xf32, #tpu.memory_space<vmem>>, vector<1x32xf32>
    %789 = vector.broadcast %788 : vector<1x32xf32> to vector<8x32xf32>
    %790 = arith.mulf %787, %789 : vector<8x32xf32>
    %cst_444 = arith.constant dense<0.000000e+00> : vector<8xf32>
    %791 = vector.multi_reduction <add>, %790, %cst_444 [1] : vector<8x32xf32> to vector<8xf32>
    %792 = vector.shape_cast %791 : vector<8xf32> to vector<8x1xf32>
    %c0_445 = arith.constant 0 : index
    %c0_446 = arith.constant 0 : index
    %793 = vector.load %arg18[%c0_445, %c0_446] : memref<8x1xf32, #tpu.memory_space<vmem>>, vector<8x1xf32>
    %cst_447 = arith.constant 5.000000e-01 : f32
    %794 = vector.broadcast %cst_447 : f32 to vector<8x1xf32>
    %795 = arith.cmpf ogt, %793, %794 : vector<8x1xf32>
    %cst_448 = arith.constant -1.000000e+06 : f32
    %796 = vector.broadcast %cst_448 : f32 to vector<8x1xf32>
    %797 = arith.select %795, %796, %792 : vector<8x1xi1>, vector<8x1xf32>
    %798 = tpu.iota {dimensions = array<i32: 0>} : vector<8x1xi32>
    %799 = arith.sitofp %798 : vector<8x1xi32> to vector<8x1xf32>
    %cst_449 = arith.constant dense<0xFF800000> : vector<1xf32>
    %800 = vector.multi_reduction <maximumf>, %797, %cst_449 [0] : vector<8x1xf32> to vector<1xf32>
    %801 = vector.shape_cast %800 : vector<1xf32> to vector<1x1xf32>
    %802 = vector.broadcast %801 : vector<1x1xf32> to vector<8x1xf32>
    %803 = arith.cmpf oge, %797, %802 : vector<8x1xf32>
    %cst_450 = arith.constant 8.000000e+00 : f32
    %804 = vector.broadcast %cst_450 : f32 to vector<8x1xf32>
    %805 = arith.select %803, %799, %804 : vector<8x1xi1>, vector<8x1xf32>
    %cst_451 = arith.constant dense<0x7F800000> : vector<1xf32>
    %806 = vector.multi_reduction <minimumf>, %805, %cst_451 [0] : vector<8x1xf32> to vector<1xf32>
    %807 = vector.shape_cast %806 : vector<1xf32> to vector<1x1xf32>
    %cst_452 = arith.constant 7.000000e+00 : f32
    %cst_453 = arith.constant 5.000000e-01 : f32
    %808 = arith.subf %cst_452, %cst_453 : f32
    %809 = vector.broadcast %808 : f32 to vector<8x1xf32>
    %810 = arith.cmpf ogt, %799, %809 : vector<8x1xf32>
    %cst_454 = arith.constant -3.000000e+38 : f32
    %811 = vector.broadcast %cst_454 : f32 to vector<8x1xf32>
    %812 = arith.select %810, %811, %797 : vector<8x1xi1>, vector<8x1xf32>
    %cst_455 = arith.constant dense<0xFF800000> : vector<1xf32>
    %813 = vector.multi_reduction <maximumf>, %812, %cst_455 [0] : vector<8x1xf32> to vector<1xf32>
    %814 = vector.shape_cast %813 : vector<1xf32> to vector<1x1xf32>
    %815 = vector.broadcast %814 : vector<1x1xf32> to vector<8x1xf32>
    %816 = arith.cmpf oge, %812, %815 : vector<8x1xf32>
    %cst_456 = arith.constant 8.000000e+00 : f32
    %817 = vector.broadcast %cst_456 : f32 to vector<8x1xf32>
    %818 = arith.select %816, %799, %817 : vector<8x1xi1>, vector<8x1xf32>
    %cst_457 = arith.constant dense<0x7F800000> : vector<1xf32>
    %819 = vector.multi_reduction <minimumf>, %818, %cst_457 [0] : vector<8x1xf32> to vector<1xf32>
    %820 = vector.shape_cast %819 : vector<1xf32> to vector<1x1xf32>
    %821 = vector.broadcast %c4_i32 : i32 to vector<1x1xi32>
    %c0_i32_458 = arith.constant 0 : i32
    %822 = vector.broadcast %c0_i32_458 : i32 to vector<1x1xi32>
    %823 = arith.cmpi eq, %821, %822 : vector<1x1xi32>
    %cst_459 = arith.constant 7.000000e+00 : f32
    %cst_460 = arith.constant 5.000000e-01 : f32
    %824 = arith.subf %cst_459, %cst_460 : f32
    %825 = vector.broadcast %824 : f32 to vector<1x1xf32>
    %826 = arith.cmpf ogt, %807, %825 : vector<1x1xf32>
    %827 = arith.andi %826, %823 : vector<1x1xi1>
    %cst_461 = arith.constant dense<true> : vector<1x1xi1>
    %828 = arith.xori %823, %cst_461 : vector<1x1xi1>
    %829 = arith.andi %826, %828 : vector<1x1xi1>
    %830 = arith.select %827, %820, %807 : vector<1x1xi1>, vector<1x1xf32>
    %c0_462 = arith.constant 0 : index
    %c0_463 = arith.constant 0 : index
    %831 = vector.load %arg19[%c0_462, %c0_463] : memref<1x1xf32, #tpu.memory_space<vmem>>, vector<1x1xf32>
    %cst_464 = arith.constant 1.000000e+00 : f32
    %cst_465 = arith.constant 0.000000e+00 : f32
    %832 = vector.broadcast %cst_464 : f32 to vector<1x1xf32>
    %833 = vector.broadcast %cst_465 : f32 to vector<1x1xf32>
    %834 = arith.select %829, %832, %833 : vector<1x1xi1>, vector<1x1xf32>
    %835 = arith.maximumf %831, %834 : vector<1x1xf32>
    %c0_466 = arith.constant 0 : index
    %c0_467 = arith.constant 0 : index
    %836 = vector.load %arg19[%c0_466, %c0_467] : memref<1x1xf32, #tpu.memory_space<vmem>>, vector<1x1xf32>
    tpu.vector_store %arg19[%c0_466, %c0_467], %835 {strides = array<i32>} : memref<1x1xf32, #tpu.memory_space<vmem>>, vector<1x1xf32>,
    %837 = vector.broadcast %830 : vector<1x1xf32> to vector<8x1xf32>
    %838 = arith.subf %799, %837 : vector<8x1xf32>
    %839 = math.absf %838 : vector<8x1xf32>
    %cst_468 = arith.constant 5.000000e-01 : f32
    %840 = vector.broadcast %cst_468 : f32 to vector<8x1xf32>
    %841 = arith.cmpf olt, %839, %840 : vector<8x1xf32>
    %cst_469 = arith.constant 1.000000e+00 : f32
    %cst_470 = arith.constant 0.000000e+00 : f32
    %842 = vector.broadcast %cst_469 : f32 to vector<8x1xf32>
    %843 = vector.broadcast %cst_470 : f32 to vector<8x1xf32>
    %844 = arith.select %841, %842, %843 : vector<8x1xi1>, vector<8x1xf32>
    %cst_471 = arith.constant 1.000000e+00 : f32
    %845 = vector.broadcast %cst_471 : f32 to vector<1x1xf32>
    %846 = arith.subf %845, %835 : vector<1x1xf32>
    %847 = vector.broadcast %846 : vector<1x1xf32> to vector<8x1xf32>
    %848 = arith.mulf %844, %847 : vector<8x1xf32>
    %849 = arith.index_cast %c4_i32 : i32 to index
    %c0_472 = arith.constant 0 : index
    %c0_473 = arith.constant 0 : index
    %850 = vector.load %arg14[%849, %c0_472, %c0_473] : memref<7x8x1xf32, #tpu.memory_space<vmem>>, vector<1x8x1xf32>
    %851 = vector.shape_cast %850 : vector<1x8x1xf32> to vector<8x1xf32>
    %852 = vector.shape_cast %848 : vector<8x1xf32> to vector<1x8x1xf32>
    tpu.vector_store %arg14[%849, %c0_472, %c0_473], %852 {strides = array<i32>} : memref<7x8x1xf32, #tpu.memory_space<vmem>>, vector<1x8x1xf32>,
    %c0_474 = arith.constant 0 : index
    %c0_475 = arith.constant 0 : index
    %853 = vector.load %arg18[%c0_474, %c0_475] : memref<8x1xf32, #tpu.memory_space<vmem>>, vector<8x1xf32>
    %854 = arith.maximumf %853, %848 : vector<8x1xf32>
    %c0_476 = arith.constant 0 : index
    %c0_477 = arith.constant 0 : index
    %855 = vector.load %arg18[%c0_476, %c0_477] : memref<8x1xf32, #tpu.memory_space<vmem>>, vector<8x1xf32>
    tpu.vector_store %arg18[%c0_476, %c0_477], %854 {strides = array<i32>} : memref<8x1xf32, #tpu.memory_space<vmem>>, vector<8x1xf32>,
    %c0_478 = arith.constant 0 : index
    %c0_479 = arith.constant 0 : index
    %856 = vector.load %arg1[%c0_478, %c0_479] : memref<8x32xf32, #tpu.memory_space<vmem>>, vector<8x32xf32>
    %857 = vector.broadcast %848 : vector<8x1xf32> to vector<8x32xf32>
    %858 = arith.mulf %857, %856 : vector<8x32xf32>
    %cst_480 = arith.constant dense<0.000000e+00> : vector<32xf32>
    %859 = vector.multi_reduction <add>, %858, %cst_480 [0] : vector<8x32xf32> to vector<32xf32>
    %860 = vector.shape_cast %859 : vector<32xf32> to vector<1x32xf32>
    %c0_481 = arith.constant 0 : index
    %c0_482 = arith.constant 0 : index
    %861 = vector.load %arg17[%c0_481, %c0_482] : memref<1x32xf32, #tpu.memory_space<vmem>>, vector<1x32xf32>
    tpu.vector_store %arg17[%c0_481, %c0_482], %860 {strides = array<i32>} : memref<1x32xf32, #tpu.memory_space<vmem>>, vector<1x32xf32>,
    %c5_i32 = arith.constant 5 : i32
    %c0_483 = arith.constant 0 : index
    %c0_484 = arith.constant 0 : index
    %862 = vector.load %arg17[%c0_483, %c0_484] : memref<1x32xf32, #tpu.memory_space<vmem>>, vector<1x32xf32>
    %c0_485 = arith.constant 0 : index
    %c0_486 = arith.constant 0 : index
    %863 = vector.load %arg15[%c0_485, %c0_486] : memref<1x32xf32, #tpu.memory_space<vmem>>, vector<1x32xf32>
    %c0_487 = arith.constant 0 : index
    %c0_488 = arith.constant 0 : index
    %864 = vector.load %arg16[%c0_487, %c0_488] : memref<1x32xf32, #tpu.memory_space<vmem>>, vector<1x32xf32>
    %c0_489 = arith.constant 0 : index
    %c0_490 = arith.constant 0 : index
    %865 = vector.load %arg2[%c0_489, %c0_490] : memref<32x128xf32, #tpu.memory_space<vmem>>, vector<32x128xf32>
    %cst_491 = arith.constant dense<0.000000e+00> : vector<1x128xf32>
    %866 = tpu.matmul %862, %865, %cst_491 {dimension_numbers = #tpu.dot_dimension_numbers<[1], [0], [0], [1], [0, 0, 1, 1], [], []>} : vector<1x32xf32>, vector<32x128xf32>, vector<1x128xf32> -> vector<1x128xf32>
    %c0_492 = arith.constant 0 : index
    %c0_493 = arith.constant 0 : index
    %867 = vector.load %arg3[%c0_492, %c0_493] : memref<32x128xf32, #tpu.memory_space<vmem>>, vector<32x128xf32>
    %cst_494 = arith.constant dense<0.000000e+00> : vector<1x128xf32>
    %868 = tpu.matmul %863, %867, %cst_494 {dimension_numbers = #tpu.dot_dimension_numbers<[1], [0], [0], [1], [0, 0, 1, 1], [], []>} : vector<1x32xf32>, vector<32x128xf32>, vector<1x128xf32> -> vector<1x128xf32>
    %869 = arith.addf %866, %868 : vector<1x128xf32>
    %c0_495 = arith.constant 0 : index
    %c0_496 = arith.constant 0 : index
    %870 = vector.load %arg4[%c0_495, %c0_496] : memref<1x128xf32, #tpu.memory_space<vmem>>, vector<1x128xf32>
    %871 = arith.addf %869, %870 : vector<1x128xf32>
    %872 = vector.extract_strided_slice %871 {offsets = [0, 0], sizes = [1, 32], strides = [1, 1]} : vector<1x128xf32> to vector<1x32xf32>
    %cst_497 = arith.constant 5.000000e-01 : f32
    %873 = vector.broadcast %cst_497 : f32 to vector<1x32xf32>
    %874 = arith.mulf %873, %872 : vector<1x32xf32>
    %875 = math.tanh %874 : vector<1x32xf32>
    %cst_498 = arith.constant 5.000000e-01 : f32
    %876 = vector.broadcast %cst_498 : f32 to vector<1x32xf32>
    %877 = arith.mulf %876, %875 : vector<1x32xf32>
    %cst_499 = arith.constant 5.000000e-01 : f32
    %878 = vector.broadcast %cst_499 : f32 to vector<1x32xf32>
    %879 = arith.addf %877, %878 : vector<1x32xf32>
    %880 = vector.extract_strided_slice %871 {offsets = [0, 32], sizes = [1, 32], strides = [1, 1]} : vector<1x128xf32> to vector<1x32xf32>
    %cst_500 = arith.constant 5.000000e-01 : f32
    %881 = vector.broadcast %cst_500 : f32 to vector<1x32xf32>
    %882 = arith.mulf %881, %880 : vector<1x32xf32>
    %883 = math.tanh %882 : vector<1x32xf32>
    %cst_501 = arith.constant 5.000000e-01 : f32
    %884 = vector.broadcast %cst_501 : f32 to vector<1x32xf32>
    %885 = arith.mulf %884, %883 : vector<1x32xf32>
    %cst_502 = arith.constant 5.000000e-01 : f32
    %886 = vector.broadcast %cst_502 : f32 to vector<1x32xf32>
    %887 = arith.addf %885, %886 : vector<1x32xf32>
    %888 = vector.extract_strided_slice %871 {offsets = [0, 64], sizes = [1, 32], strides = [1, 1]} : vector<1x128xf32> to vector<1x32xf32>
    %889 = math.tanh %888 : vector<1x32xf32>
    %890 = vector.extract_strided_slice %871 {offsets = [0, 96], sizes = [1, 32], strides = [1, 1]} : vector<1x128xf32> to vector<1x32xf32>
    %cst_503 = arith.constant 5.000000e-01 : f32
    %891 = vector.broadcast %cst_503 : f32 to vector<1x32xf32>
    %892 = arith.mulf %891, %890 : vector<1x32xf32>
    %893 = math.tanh %892 : vector<1x32xf32>
    %cst_504 = arith.constant 5.000000e-01 : f32
    %894 = vector.broadcast %cst_504 : f32 to vector<1x32xf32>
    %895 = arith.mulf %894, %893 : vector<1x32xf32>
    %cst_505 = arith.constant 5.000000e-01 : f32
    %896 = vector.broadcast %cst_505 : f32 to vector<1x32xf32>
    %897 = arith.addf %895, %896 : vector<1x32xf32>
    %898 = arith.mulf %887, %864 : vector<1x32xf32>
    %899 = arith.mulf %879, %889 : vector<1x32xf32>
    %900 = arith.addf %898, %899 : vector<1x32xf32>
    %901 = math.tanh %900 : vector<1x32xf32>
    %902 = arith.mulf %897, %901 : vector<1x32xf32>
    %c0_506 = arith.constant 0 : index
    %c0_507 = arith.constant 0 : index
    %903 = vector.load %arg15[%c0_506, %c0_507] : memref<1x32xf32, #tpu.memory_space<vmem>>, vector<1x32xf32>
    tpu.vector_store %arg15[%c0_506, %c0_507], %902 {strides = array<i32>} : memref<1x32xf32, #tpu.memory_space<vmem>>, vector<1x32xf32>,
    %c0_508 = arith.constant 0 : index
    %c0_509 = arith.constant 0 : index
    %904 = vector.load %arg16[%c0_508, %c0_509] : memref<1x32xf32, #tpu.memory_space<vmem>>, vector<1x32xf32>
    tpu.vector_store %arg16[%c0_508, %c0_509], %900 {strides = array<i32>} : memref<1x32xf32, #tpu.memory_space<vmem>>, vector<1x32xf32>,
    %c0_510 = arith.constant 0 : index
    %c0_511 = arith.constant 0 : index
    %905 = vector.load %arg21[%c0_510, %c0_511] : memref<8x32xf32, #tpu.memory_space<vmem>>, vector<8x32xf32>
    %c0_512 = arith.constant 0 : index
    %c0_513 = arith.constant 0 : index
    %906 = vector.load %arg8[%c0_512, %c0_513] : memref<1x32xf32, #tpu.memory_space<vmem>>, vector<1x32xf32>
    %c0_514 = arith.constant 0 : index
    %c0_515 = arith.constant 0 : index
    %907 = vector.load %arg7[%c0_514, %c0_515] : memref<32x32xf32, #tpu.memory_space<vmem>>, vector<32x32xf32>
    %cst_516 = arith.constant dense<0.000000e+00> : vector<1x32xf32>
    %908 = tpu.matmul %902, %907, %cst_516 {dimension_numbers = #tpu.dot_dimension_numbers<[1], [0], [0], [1], [0, 0, 1, 1], [], []>} : vector<1x32xf32>, vector<32x32xf32>, vector<1x32xf32> -> vector<1x32xf32>
    %909 = vector.broadcast %908 : vector<1x32xf32> to vector<8x32xf32>
    %910 = arith.addf %905, %909 : vector<8x32xf32>
    %911 = math.tanh %910 : vector<8x32xf32>
    %912 = vector.broadcast %906 : vector<1x32xf32> to vector<8x32xf32>
    %913 = arith.mulf %911, %912 : vector<8x32xf32>
    %cst_517 = arith.constant dense<0.000000e+00> : vector<8xf32>
    %914 = vector.multi_reduction <add>, %913, %cst_517 [1] : vector<8x32xf32> to vector<8xf32>
    %915 = vector.shape_cast %914 : vector<8xf32> to vector<8x1xf32>
    %cst_518 = arith.constant dense<0xFF800000> : vector<1xf32>
    %916 = vector.multi_reduction <maximumf>, %915, %cst_518 [0] : vector<8x1xf32> to vector<1xf32>
    %917 = vector.shape_cast %916 : vector<1xf32> to vector<1x1xf32>
    %918 = vector.broadcast %917 : vector<1x1xf32> to vector<8x1xf32>
    %919 = arith.subf %915, %918 : vector<8x1xf32>
    %920 = math.exp %919 : vector<8x1xf32>
    %cst_519 = arith.constant dense<0.000000e+00> : vector<1xf32>
    %921 = vector.multi_reduction <add>, %920, %cst_519 [0] : vector<8x1xf32> to vector<1xf32>
    %922 = vector.shape_cast %921 : vector<1xf32> to vector<1x1xf32>
    %923 = vector.broadcast %922 : vector<1x1xf32> to vector<8x1xf32>
    %924 = arith.divf %920, %923 : vector<8x1xf32>
    %925 = vector.broadcast %924 : vector<8x1xf32> to vector<8x32xf32>
    %926 = arith.mulf %925, %905 : vector<8x32xf32>
    %cst_520 = arith.constant dense<0.000000e+00> : vector<32xf32>
    %927 = vector.multi_reduction <add>, %926, %cst_520 [0] : vector<8x32xf32> to vector<32xf32>
    %928 = vector.shape_cast %927 : vector<32xf32> to vector<1x32xf32>
    %c0_521 = arith.constant 0 : index
    %c0_522 = arith.constant 0 : index
    %929 = vector.load %arg7[%c0_521, %c0_522] : memref<32x32xf32, #tpu.memory_space<vmem>>, vector<32x32xf32>
    %cst_523 = arith.constant dense<0.000000e+00> : vector<1x32xf32>
    %930 = tpu.matmul %928, %929, %cst_523 {dimension_numbers = #tpu.dot_dimension_numbers<[1], [0], [0], [1], [0, 0, 1, 1], [], []>} : vector<1x32xf32>, vector<32x32xf32>, vector<1x32xf32> -> vector<1x32xf32>
    %931 = vector.broadcast %930 : vector<1x32xf32> to vector<8x32xf32>
    %932 = arith.addf %905, %931 : vector<8x32xf32>
    %933 = math.tanh %932 : vector<8x32xf32>
    %934 = vector.broadcast %906 : vector<1x32xf32> to vector<8x32xf32>
    %935 = arith.mulf %933, %934 : vector<8x32xf32>
    %cst_524 = arith.constant dense<0.000000e+00> : vector<8xf32>
    %936 = vector.multi_reduction <add>, %935, %cst_524 [1] : vector<8x32xf32> to vector<8xf32>
    %937 = vector.shape_cast %936 : vector<8xf32> to vector<8x1xf32>
    %cst_525 = arith.constant dense<0xFF800000> : vector<1xf32>
    %938 = vector.multi_reduction <maximumf>, %937, %cst_525 [0] : vector<8x1xf32> to vector<1xf32>
    %939 = vector.shape_cast %938 : vector<1xf32> to vector<1x1xf32>
    %940 = vector.broadcast %939 : vector<1x1xf32> to vector<8x1xf32>
    %941 = arith.subf %937, %940 : vector<8x1xf32>
    %942 = math.exp %941 : vector<8x1xf32>
    %cst_526 = arith.constant dense<0.000000e+00> : vector<1xf32>
    %943 = vector.multi_reduction <add>, %942, %cst_526 [0] : vector<8x1xf32> to vector<1xf32>
    %944 = vector.shape_cast %943 : vector<1xf32> to vector<1x1xf32>
    %945 = vector.broadcast %944 : vector<1x1xf32> to vector<8x1xf32>
    %946 = arith.divf %942, %945 : vector<8x1xf32>
    %947 = vector.broadcast %946 : vector<8x1xf32> to vector<8x32xf32>
    %948 = arith.mulf %947, %905 : vector<8x32xf32>
    %cst_527 = arith.constant dense<0.000000e+00> : vector<32xf32>
    %949 = vector.multi_reduction <add>, %948, %cst_527 [0] : vector<8x32xf32> to vector<32xf32>
    %950 = vector.shape_cast %949 : vector<32xf32> to vector<1x32xf32>
    %c0_528 = arith.constant 0 : index
    %c0_529 = arith.constant 0 : index
    %951 = vector.load %arg9[%c0_528, %c0_529] : memref<32x32xf32, #tpu.memory_space<vmem>>, vector<32x32xf32>
    %cst_530 = arith.constant dense<0.000000e+00> : vector<1x32xf32>
    %952 = tpu.matmul %950, %951, %cst_530 {dimension_numbers = #tpu.dot_dimension_numbers<[1], [0], [0], [1], [0, 0, 1, 1], [], []>} : vector<1x32xf32>, vector<32x32xf32>, vector<1x32xf32> -> vector<1x32xf32>
    %c0_531 = arith.constant 0 : index
    %c0_532 = arith.constant 0 : index
    %953 = vector.load %arg20[%c0_531, %c0_532] : memref<8x32xf32, #tpu.memory_space<vmem>>, vector<8x32xf32>
    %954 = vector.broadcast %952 : vector<1x32xf32> to vector<8x32xf32>
    %955 = arith.addf %953, %954 : vector<8x32xf32>
    %956 = math.tanh %955 : vector<8x32xf32>
    %c0_533 = arith.constant 0 : index
    %c0_534 = arith.constant 0 : index
    %957 = vector.load %arg10[%c0_533, %c0_534] : memref<1x32xf32, #tpu.memory_space<vmem>>, vector<1x32xf32>
    %958 = vector.broadcast %957 : vector<1x32xf32> to vector<8x32xf32>
    %959 = arith.mulf %956, %958 : vector<8x32xf32>
    %cst_535 = arith.constant dense<0.000000e+00> : vector<8xf32>
    %960 = vector.multi_reduction <add>, %959, %cst_535 [1] : vector<8x32xf32> to vector<8xf32>
    %961 = vector.shape_cast %960 : vector<8xf32> to vector<8x1xf32>
    %c0_536 = arith.constant 0 : index
    %c0_537 = arith.constant 0 : index
    %962 = vector.load %arg18[%c0_536, %c0_537] : memref<8x1xf32, #tpu.memory_space<vmem>>, vector<8x1xf32>
    %cst_538 = arith.constant 5.000000e-01 : f32
    %963 = vector.broadcast %cst_538 : f32 to vector<8x1xf32>
    %964 = arith.cmpf ogt, %962, %963 : vector<8x1xf32>
    %cst_539 = arith.constant -1.000000e+06 : f32
    %965 = vector.broadcast %cst_539 : f32 to vector<8x1xf32>
    %966 = arith.select %964, %965, %961 : vector<8x1xi1>, vector<8x1xf32>
    %967 = tpu.iota {dimensions = array<i32: 0>} : vector<8x1xi32>
    %968 = arith.sitofp %967 : vector<8x1xi32> to vector<8x1xf32>
    %cst_540 = arith.constant dense<0xFF800000> : vector<1xf32>
    %969 = vector.multi_reduction <maximumf>, %966, %cst_540 [0] : vector<8x1xf32> to vector<1xf32>
    %970 = vector.shape_cast %969 : vector<1xf32> to vector<1x1xf32>
    %971 = vector.broadcast %970 : vector<1x1xf32> to vector<8x1xf32>
    %972 = arith.cmpf oge, %966, %971 : vector<8x1xf32>
    %cst_541 = arith.constant 8.000000e+00 : f32
    %973 = vector.broadcast %cst_541 : f32 to vector<8x1xf32>
    %974 = arith.select %972, %968, %973 : vector<8x1xi1>, vector<8x1xf32>
    %cst_542 = arith.constant dense<0x7F800000> : vector<1xf32>
    %975 = vector.multi_reduction <minimumf>, %974, %cst_542 [0] : vector<8x1xf32> to vector<1xf32>
    %976 = vector.shape_cast %975 : vector<1xf32> to vector<1x1xf32>
    %cst_543 = arith.constant 7.000000e+00 : f32
    %cst_544 = arith.constant 5.000000e-01 : f32
    %977 = arith.subf %cst_543, %cst_544 : f32
    %978 = vector.broadcast %977 : f32 to vector<8x1xf32>
    %979 = arith.cmpf ogt, %968, %978 : vector<8x1xf32>
    %cst_545 = arith.constant -3.000000e+38 : f32
    %980 = vector.broadcast %cst_545 : f32 to vector<8x1xf32>
    %981 = arith.select %979, %980, %966 : vector<8x1xi1>, vector<8x1xf32>
    %cst_546 = arith.constant dense<0xFF800000> : vector<1xf32>
    %982 = vector.multi_reduction <maximumf>, %981, %cst_546 [0] : vector<8x1xf32> to vector<1xf32>
    %983 = vector.shape_cast %982 : vector<1xf32> to vector<1x1xf32>
    %984 = vector.broadcast %983 : vector<1x1xf32> to vector<8x1xf32>
    %985 = arith.cmpf oge, %981, %984 : vector<8x1xf32>
    %cst_547 = arith.constant 8.000000e+00 : f32
    %986 = vector.broadcast %cst_547 : f32 to vector<8x1xf32>
    %987 = arith.select %985, %968, %986 : vector<8x1xi1>, vector<8x1xf32>
    %cst_548 = arith.constant dense<0x7F800000> : vector<1xf32>
    %988 = vector.multi_reduction <minimumf>, %987, %cst_548 [0] : vector<8x1xf32> to vector<1xf32>
    %989 = vector.shape_cast %988 : vector<1xf32> to vector<1x1xf32>
    %990 = vector.broadcast %c5_i32 : i32 to vector<1x1xi32>
    %c0_i32_549 = arith.constant 0 : i32
    %991 = vector.broadcast %c0_i32_549 : i32 to vector<1x1xi32>
    %992 = arith.cmpi eq, %990, %991 : vector<1x1xi32>
    %cst_550 = arith.constant 7.000000e+00 : f32
    %cst_551 = arith.constant 5.000000e-01 : f32
    %993 = arith.subf %cst_550, %cst_551 : f32
    %994 = vector.broadcast %993 : f32 to vector<1x1xf32>
    %995 = arith.cmpf ogt, %976, %994 : vector<1x1xf32>
    %996 = arith.andi %995, %992 : vector<1x1xi1>
    %cst_552 = arith.constant dense<true> : vector<1x1xi1>
    %997 = arith.xori %992, %cst_552 : vector<1x1xi1>
    %998 = arith.andi %995, %997 : vector<1x1xi1>
    %999 = arith.select %996, %989, %976 : vector<1x1xi1>, vector<1x1xf32>
    %c0_553 = arith.constant 0 : index
    %c0_554 = arith.constant 0 : index
    %1000 = vector.load %arg19[%c0_553, %c0_554] : memref<1x1xf32, #tpu.memory_space<vmem>>, vector<1x1xf32>
    %cst_555 = arith.constant 1.000000e+00 : f32
    %cst_556 = arith.constant 0.000000e+00 : f32
    %1001 = vector.broadcast %cst_555 : f32 to vector<1x1xf32>
    %1002 = vector.broadcast %cst_556 : f32 to vector<1x1xf32>
    %1003 = arith.select %998, %1001, %1002 : vector<1x1xi1>, vector<1x1xf32>
    %1004 = arith.maximumf %1000, %1003 : vector<1x1xf32>
    %c0_557 = arith.constant 0 : index
    %c0_558 = arith.constant 0 : index
    %1005 = vector.load %arg19[%c0_557, %c0_558] : memref<1x1xf32, #tpu.memory_space<vmem>>, vector<1x1xf32>
    tpu.vector_store %arg19[%c0_557, %c0_558], %1004 {strides = array<i32>} : memref<1x1xf32, #tpu.memory_space<vmem>>, vector<1x1xf32>,
    %1006 = vector.broadcast %999 : vector<1x1xf32> to vector<8x1xf32>
    %1007 = arith.subf %968, %1006 : vector<8x1xf32>
    %1008 = math.absf %1007 : vector<8x1xf32>
    %cst_559 = arith.constant 5.000000e-01 : f32
    %1009 = vector.broadcast %cst_559 : f32 to vector<8x1xf32>
    %1010 = arith.cmpf olt, %1008, %1009 : vector<8x1xf32>
    %cst_560 = arith.constant 1.000000e+00 : f32
    %cst_561 = arith.constant 0.000000e+00 : f32
    %1011 = vector.broadcast %cst_560 : f32 to vector<8x1xf32>
    %1012 = vector.broadcast %cst_561 : f32 to vector<8x1xf32>
    %1013 = arith.select %1010, %1011, %1012 : vector<8x1xi1>, vector<8x1xf32>
    %cst_562 = arith.constant 1.000000e+00 : f32
    %1014 = vector.broadcast %cst_562 : f32 to vector<1x1xf32>
    %1015 = arith.subf %1014, %1004 : vector<1x1xf32>
    %1016 = vector.broadcast %1015 : vector<1x1xf32> to vector<8x1xf32>
    %1017 = arith.mulf %1013, %1016 : vector<8x1xf32>
    %1018 = arith.index_cast %c5_i32 : i32 to index
    %c0_563 = arith.constant 0 : index
    %c0_564 = arith.constant 0 : index
    %1019 = vector.load %arg14[%1018, %c0_563, %c0_564] : memref<7x8x1xf32, #tpu.memory_space<vmem>>, vector<1x8x1xf32>
    %1020 = vector.shape_cast %1019 : vector<1x8x1xf32> to vector<8x1xf32>
    %1021 = vector.shape_cast %1017 : vector<8x1xf32> to vector<1x8x1xf32>
    tpu.vector_store %arg14[%1018, %c0_563, %c0_564], %1021 {strides = array<i32>} : memref<7x8x1xf32, #tpu.memory_space<vmem>>, vector<1x8x1xf32>,
    %c0_565 = arith.constant 0 : index
    %c0_566 = arith.constant 0 : index
    %1022 = vector.load %arg18[%c0_565, %c0_566] : memref<8x1xf32, #tpu.memory_space<vmem>>, vector<8x1xf32>
    %1023 = arith.maximumf %1022, %1017 : vector<8x1xf32>
    %c0_567 = arith.constant 0 : index
    %c0_568 = arith.constant 0 : index
    %1024 = vector.load %arg18[%c0_567, %c0_568] : memref<8x1xf32, #tpu.memory_space<vmem>>, vector<8x1xf32>
    tpu.vector_store %arg18[%c0_567, %c0_568], %1023 {strides = array<i32>} : memref<8x1xf32, #tpu.memory_space<vmem>>, vector<8x1xf32>,
    %c0_569 = arith.constant 0 : index
    %c0_570 = arith.constant 0 : index
    %1025 = vector.load %arg1[%c0_569, %c0_570] : memref<8x32xf32, #tpu.memory_space<vmem>>, vector<8x32xf32>
    %1026 = vector.broadcast %1017 : vector<8x1xf32> to vector<8x32xf32>
    %1027 = arith.mulf %1026, %1025 : vector<8x32xf32>
    %cst_571 = arith.constant dense<0.000000e+00> : vector<32xf32>
    %1028 = vector.multi_reduction <add>, %1027, %cst_571 [0] : vector<8x32xf32> to vector<32xf32>
    %1029 = vector.shape_cast %1028 : vector<32xf32> to vector<1x32xf32>
    %c0_572 = arith.constant 0 : index
    %c0_573 = arith.constant 0 : index
    %1030 = vector.load %arg17[%c0_572, %c0_573] : memref<1x32xf32, #tpu.memory_space<vmem>>, vector<1x32xf32>
    tpu.vector_store %arg17[%c0_572, %c0_573], %1029 {strides = array<i32>} : memref<1x32xf32, #tpu.memory_space<vmem>>, vector<1x32xf32>,
    %c6_i32 = arith.constant 6 : i32
    %c0_574 = arith.constant 0 : index
    %c0_575 = arith.constant 0 : index
    %1031 = vector.load %arg17[%c0_574, %c0_575] : memref<1x32xf32, #tpu.memory_space<vmem>>, vector<1x32xf32>
    %c0_576 = arith.constant 0 : index
    %c0_577 = arith.constant 0 : index
    %1032 = vector.load %arg15[%c0_576, %c0_577] : memref<1x32xf32, #tpu.memory_space<vmem>>, vector<1x32xf32>
    %c0_578 = arith.constant 0 : index
    %c0_579 = arith.constant 0 : index
    %1033 = vector.load %arg16[%c0_578, %c0_579] : memref<1x32xf32, #tpu.memory_space<vmem>>, vector<1x32xf32>
    %c0_580 = arith.constant 0 : index
    %c0_581 = arith.constant 0 : index
    %1034 = vector.load %arg2[%c0_580, %c0_581] : memref<32x128xf32, #tpu.memory_space<vmem>>, vector<32x128xf32>
    %cst_582 = arith.constant dense<0.000000e+00> : vector<1x128xf32>
    %1035 = tpu.matmul %1031, %1034, %cst_582 {dimension_numbers = #tpu.dot_dimension_numbers<[1], [0], [0], [1], [0, 0, 1, 1], [], []>} : vector<1x32xf32>, vector<32x128xf32>, vector<1x128xf32> -> vector<1x128xf32>
    %c0_583 = arith.constant 0 : index
    %c0_584 = arith.constant 0 : index
    %1036 = vector.load %arg3[%c0_583, %c0_584] : memref<32x128xf32, #tpu.memory_space<vmem>>, vector<32x128xf32>
    %cst_585 = arith.constant dense<0.000000e+00> : vector<1x128xf32>
    %1037 = tpu.matmul %1032, %1036, %cst_585 {dimension_numbers = #tpu.dot_dimension_numbers<[1], [0], [0], [1], [0, 0, 1, 1], [], []>} : vector<1x32xf32>, vector<32x128xf32>, vector<1x128xf32> -> vector<1x128xf32>
    %1038 = arith.addf %1035, %1037 : vector<1x128xf32>
    %c0_586 = arith.constant 0 : index
    %c0_587 = arith.constant 0 : index
    %1039 = vector.load %arg4[%c0_586, %c0_587] : memref<1x128xf32, #tpu.memory_space<vmem>>, vector<1x128xf32>
    %1040 = arith.addf %1038, %1039 : vector<1x128xf32>
    %1041 = vector.extract_strided_slice %1040 {offsets = [0, 0], sizes = [1, 32], strides = [1, 1]} : vector<1x128xf32> to vector<1x32xf32>
    %cst_588 = arith.constant 5.000000e-01 : f32
    %1042 = vector.broadcast %cst_588 : f32 to vector<1x32xf32>
    %1043 = arith.mulf %1042, %1041 : vector<1x32xf32>
    %1044 = math.tanh %1043 : vector<1x32xf32>
    %cst_589 = arith.constant 5.000000e-01 : f32
    %1045 = vector.broadcast %cst_589 : f32 to vector<1x32xf32>
    %1046 = arith.mulf %1045, %1044 : vector<1x32xf32>
    %cst_590 = arith.constant 5.000000e-01 : f32
    %1047 = vector.broadcast %cst_590 : f32 to vector<1x32xf32>
    %1048 = arith.addf %1046, %1047 : vector<1x32xf32>
    %1049 = vector.extract_strided_slice %1040 {offsets = [0, 32], sizes = [1, 32], strides = [1, 1]} : vector<1x128xf32> to vector<1x32xf32>
    %cst_591 = arith.constant 5.000000e-01 : f32
    %1050 = vector.broadcast %cst_591 : f32 to vector<1x32xf32>
    %1051 = arith.mulf %1050, %1049 : vector<1x32xf32>
    %1052 = math.tanh %1051 : vector<1x32xf32>
    %cst_592 = arith.constant 5.000000e-01 : f32
    %1053 = vector.broadcast %cst_592 : f32 to vector<1x32xf32>
    %1054 = arith.mulf %1053, %1052 : vector<1x32xf32>
    %cst_593 = arith.constant 5.000000e-01 : f32
    %1055 = vector.broadcast %cst_593 : f32 to vector<1x32xf32>
    %1056 = arith.addf %1054, %1055 : vector<1x32xf32>
    %1057 = vector.extract_strided_slice %1040 {offsets = [0, 64], sizes = [1, 32], strides = [1, 1]} : vector<1x128xf32> to vector<1x32xf32>
    %1058 = math.tanh %1057 : vector<1x32xf32>
    %1059 = vector.extract_strided_slice %1040 {offsets = [0, 96], sizes = [1, 32], strides = [1, 1]} : vector<1x128xf32> to vector<1x32xf32>
    %cst_594 = arith.constant 5.000000e-01 : f32
    %1060 = vector.broadcast %cst_594 : f32 to vector<1x32xf32>
    %1061 = arith.mulf %1060, %1059 : vector<1x32xf32>
    %1062 = math.tanh %1061 : vector<1x32xf32>
    %cst_595 = arith.constant 5.000000e-01 : f32
    %1063 = vector.broadcast %cst_595 : f32 to vector<1x32xf32>
    %1064 = arith.mulf %1063, %1062 : vector<1x32xf32>
    %cst_596 = arith.constant 5.000000e-01 : f32
    %1065 = vector.broadcast %cst_596 : f32 to vector<1x32xf32>
    %1066 = arith.addf %1064, %1065 : vector<1x32xf32>
    %1067 = arith.mulf %1056, %1033 : vector<1x32xf32>
    %1068 = arith.mulf %1048, %1058 : vector<1x32xf32>
    %1069 = arith.addf %1067, %1068 : vector<1x32xf32>
    %1070 = math.tanh %1069 : vector<1x32xf32>
    %1071 = arith.mulf %1066, %1070 : vector<1x32xf32>
    %c0_597 = arith.constant 0 : index
    %c0_598 = arith.constant 0 : index
    %1072 = vector.load %arg15[%c0_597, %c0_598] : memref<1x32xf32, #tpu.memory_space<vmem>>, vector<1x32xf32>
    tpu.vector_store %arg15[%c0_597, %c0_598], %1071 {strides = array<i32>} : memref<1x32xf32, #tpu.memory_space<vmem>>, vector<1x32xf32>,
    %c0_599 = arith.constant 0 : index
    %c0_600 = arith.constant 0 : index
    %1073 = vector.load %arg16[%c0_599, %c0_600] : memref<1x32xf32, #tpu.memory_space<vmem>>, vector<1x32xf32>
    tpu.vector_store %arg16[%c0_599, %c0_600], %1069 {strides = array<i32>} : memref<1x32xf32, #tpu.memory_space<vmem>>, vector<1x32xf32>,
    %c0_601 = arith.constant 0 : index
    %c0_602 = arith.constant 0 : index
    %1074 = vector.load %arg21[%c0_601, %c0_602] : memref<8x32xf32, #tpu.memory_space<vmem>>, vector<8x32xf32>
    %c0_603 = arith.constant 0 : index
    %c0_604 = arith.constant 0 : index
    %1075 = vector.load %arg8[%c0_603, %c0_604] : memref<1x32xf32, #tpu.memory_space<vmem>>, vector<1x32xf32>
    %c0_605 = arith.constant 0 : index
    %c0_606 = arith.constant 0 : index
    %1076 = vector.load %arg7[%c0_605, %c0_606] : memref<32x32xf32, #tpu.memory_space<vmem>>, vector<32x32xf32>
    %cst_607 = arith.constant dense<0.000000e+00> : vector<1x32xf32>
    %1077 = tpu.matmul %1071, %1076, %cst_607 {dimension_numbers = #tpu.dot_dimension_numbers<[1], [0], [0], [1], [0, 0, 1, 1], [], []>} : vector<1x32xf32>, vector<32x32xf32>, vector<1x32xf32> -> vector<1x32xf32>
    %1078 = vector.broadcast %1077 : vector<1x32xf32> to vector<8x32xf32>
    %1079 = arith.addf %1074, %1078 : vector<8x32xf32>
    %1080 = math.tanh %1079 : vector<8x32xf32>
    %1081 = vector.broadcast %1075 : vector<1x32xf32> to vector<8x32xf32>
    %1082 = arith.mulf %1080, %1081 : vector<8x32xf32>
    %cst_608 = arith.constant dense<0.000000e+00> : vector<8xf32>
    %1083 = vector.multi_reduction <add>, %1082, %cst_608 [1] : vector<8x32xf32> to vector<8xf32>
    %1084 = vector.shape_cast %1083 : vector<8xf32> to vector<8x1xf32>
    %cst_609 = arith.constant dense<0xFF800000> : vector<1xf32>
    %1085 = vector.multi_reduction <maximumf>, %1084, %cst_609 [0] : vector<8x1xf32> to vector<1xf32>
    %1086 = vector.shape_cast %1085 : vector<1xf32> to vector<1x1xf32>
    %1087 = vector.broadcast %1086 : vector<1x1xf32> to vector<8x1xf32>
    %1088 = arith.subf %1084, %1087 : vector<8x1xf32>
    %1089 = math.exp %1088 : vector<8x1xf32>
    %cst_610 = arith.constant dense<0.000000e+00> : vector<1xf32>
    %1090 = vector.multi_reduction <add>, %1089, %cst_610 [0] : vector<8x1xf32> to vector<1xf32>
    %1091 = vector.shape_cast %1090 : vector<1xf32> to vector<1x1xf32>
    %1092 = vector.broadcast %1091 : vector<1x1xf32> to vector<8x1xf32>
    %1093 = arith.divf %1089, %1092 : vector<8x1xf32>
    %1094 = vector.broadcast %1093 : vector<8x1xf32> to vector<8x32xf32>
    %1095 = arith.mulf %1094, %1074 : vector<8x32xf32>
    %cst_611 = arith.constant dense<0.000000e+00> : vector<32xf32>
    %1096 = vector.multi_reduction <add>, %1095, %cst_611 [0] : vector<8x32xf32> to vector<32xf32>
    %1097 = vector.shape_cast %1096 : vector<32xf32> to vector<1x32xf32>
    %c0_612 = arith.constant 0 : index
    %c0_613 = arith.constant 0 : index
    %1098 = vector.load %arg7[%c0_612, %c0_613] : memref<32x32xf32, #tpu.memory_space<vmem>>, vector<32x32xf32>
    %cst_614 = arith.constant dense<0.000000e+00> : vector<1x32xf32>
    %1099 = tpu.matmul %1097, %1098, %cst_614 {dimension_numbers = #tpu.dot_dimension_numbers<[1], [0], [0], [1], [0, 0, 1, 1], [], []>} : vector<1x32xf32>, vector<32x32xf32>, vector<1x32xf32> -> vector<1x32xf32>
    %1100 = vector.broadcast %1099 : vector<1x32xf32> to vector<8x32xf32>
    %1101 = arith.addf %1074, %1100 : vector<8x32xf32>
    %1102 = math.tanh %1101 : vector<8x32xf32>
    %1103 = vector.broadcast %1075 : vector<1x32xf32> to vector<8x32xf32>
    %1104 = arith.mulf %1102, %1103 : vector<8x32xf32>
    %cst_615 = arith.constant dense<0.000000e+00> : vector<8xf32>
    %1105 = vector.multi_reduction <add>, %1104, %cst_615 [1] : vector<8x32xf32> to vector<8xf32>
    %1106 = vector.shape_cast %1105 : vector<8xf32> to vector<8x1xf32>
    %cst_616 = arith.constant dense<0xFF800000> : vector<1xf32>
    %1107 = vector.multi_reduction <maximumf>, %1106, %cst_616 [0] : vector<8x1xf32> to vector<1xf32>
    %1108 = vector.shape_cast %1107 : vector<1xf32> to vector<1x1xf32>
    %1109 = vector.broadcast %1108 : vector<1x1xf32> to vector<8x1xf32>
    %1110 = arith.subf %1106, %1109 : vector<8x1xf32>
    %1111 = math.exp %1110 : vector<8x1xf32>
    %cst_617 = arith.constant dense<0.000000e+00> : vector<1xf32>
    %1112 = vector.multi_reduction <add>, %1111, %cst_617 [0] : vector<8x1xf32> to vector<1xf32>
    %1113 = vector.shape_cast %1112 : vector<1xf32> to vector<1x1xf32>
    %1114 = vector.broadcast %1113 : vector<1x1xf32> to vector<8x1xf32>
    %1115 = arith.divf %1111, %1114 : vector<8x1xf32>
    %1116 = vector.broadcast %1115 : vector<8x1xf32> to vector<8x32xf32>
    %1117 = arith.mulf %1116, %1074 : vector<8x32xf32>
    %cst_618 = arith.constant dense<0.000000e+00> : vector<32xf32>
    %1118 = vector.multi_reduction <add>, %1117, %cst_618 [0] : vector<8x32xf32> to vector<32xf32>
    %1119 = vector.shape_cast %1118 : vector<32xf32> to vector<1x32xf32>
    %c0_619 = arith.constant 0 : index
    %c0_620 = arith.constant 0 : index
    %1120 = vector.load %arg9[%c0_619, %c0_620] : memref<32x32xf32, #tpu.memory_space<vmem>>, vector<32x32xf32>
    %cst_621 = arith.constant dense<0.000000e+00> : vector<1x32xf32>
    %1121 = tpu.matmul %1119, %1120, %cst_621 {dimension_numbers = #tpu.dot_dimension_numbers<[1], [0], [0], [1], [0, 0, 1, 1], [], []>} : vector<1x32xf32>, vector<32x32xf32>, vector<1x32xf32> -> vector<1x32xf32>
    %c0_622 = arith.constant 0 : index
    %c0_623 = arith.constant 0 : index
    %1122 = vector.load %arg20[%c0_622, %c0_623] : memref<8x32xf32, #tpu.memory_space<vmem>>, vector<8x32xf32>
    %1123 = vector.broadcast %1121 : vector<1x32xf32> to vector<8x32xf32>
    %1124 = arith.addf %1122, %1123 : vector<8x32xf32>
    %1125 = math.tanh %1124 : vector<8x32xf32>
    %c0_624 = arith.constant 0 : index
    %c0_625 = arith.constant 0 : index
    %1126 = vector.load %arg10[%c0_624, %c0_625] : memref<1x32xf32, #tpu.memory_space<vmem>>, vector<1x32xf32>
    %1127 = vector.broadcast %1126 : vector<1x32xf32> to vector<8x32xf32>
    %1128 = arith.mulf %1125, %1127 : vector<8x32xf32>
    %cst_626 = arith.constant dense<0.000000e+00> : vector<8xf32>
    %1129 = vector.multi_reduction <add>, %1128, %cst_626 [1] : vector<8x32xf32> to vector<8xf32>
    %1130 = vector.shape_cast %1129 : vector<8xf32> to vector<8x1xf32>
    %c0_627 = arith.constant 0 : index
    %c0_628 = arith.constant 0 : index
    %1131 = vector.load %arg18[%c0_627, %c0_628] : memref<8x1xf32, #tpu.memory_space<vmem>>, vector<8x1xf32>
    %cst_629 = arith.constant 5.000000e-01 : f32
    %1132 = vector.broadcast %cst_629 : f32 to vector<8x1xf32>
    %1133 = arith.cmpf ogt, %1131, %1132 : vector<8x1xf32>
    %cst_630 = arith.constant -1.000000e+06 : f32
    %1134 = vector.broadcast %cst_630 : f32 to vector<8x1xf32>
    %1135 = arith.select %1133, %1134, %1130 : vector<8x1xi1>, vector<8x1xf32>
    %1136 = tpu.iota {dimensions = array<i32: 0>} : vector<8x1xi32>
    %1137 = arith.sitofp %1136 : vector<8x1xi32> to vector<8x1xf32>
    %cst_631 = arith.constant dense<0xFF800000> : vector<1xf32>
    %1138 = vector.multi_reduction <maximumf>, %1135, %cst_631 [0] : vector<8x1xf32> to vector<1xf32>
    %1139 = vector.shape_cast %1138 : vector<1xf32> to vector<1x1xf32>
    %1140 = vector.broadcast %1139 : vector<1x1xf32> to vector<8x1xf32>
    %1141 = arith.cmpf oge, %1135, %1140 : vector<8x1xf32>
    %cst_632 = arith.constant 8.000000e+00 : f32
    %1142 = vector.broadcast %cst_632 : f32 to vector<8x1xf32>
    %1143 = arith.select %1141, %1137, %1142 : vector<8x1xi1>, vector<8x1xf32>
    %cst_633 = arith.constant dense<0x7F800000> : vector<1xf32>
    %1144 = vector.multi_reduction <minimumf>, %1143, %cst_633 [0] : vector<8x1xf32> to vector<1xf32>
    %1145 = vector.shape_cast %1144 : vector<1xf32> to vector<1x1xf32>
    %cst_634 = arith.constant 7.000000e+00 : f32
    %cst_635 = arith.constant 5.000000e-01 : f32
    %1146 = arith.subf %cst_634, %cst_635 : f32
    %1147 = vector.broadcast %1146 : f32 to vector<8x1xf32>
    %1148 = arith.cmpf ogt, %1137, %1147 : vector<8x1xf32>
    %cst_636 = arith.constant -3.000000e+38 : f32
    %1149 = vector.broadcast %cst_636 : f32 to vector<8x1xf32>
    %1150 = arith.select %1148, %1149, %1135 : vector<8x1xi1>, vector<8x1xf32>
    %cst_637 = arith.constant dense<0xFF800000> : vector<1xf32>
    %1151 = vector.multi_reduction <maximumf>, %1150, %cst_637 [0] : vector<8x1xf32> to vector<1xf32>
    %1152 = vector.shape_cast %1151 : vector<1xf32> to vector<1x1xf32>
    %1153 = vector.broadcast %1152 : vector<1x1xf32> to vector<8x1xf32>
    %1154 = arith.cmpf oge, %1150, %1153 : vector<8x1xf32>
    %cst_638 = arith.constant 8.000000e+00 : f32
    %1155 = vector.broadcast %cst_638 : f32 to vector<8x1xf32>
    %1156 = arith.select %1154, %1137, %1155 : vector<8x1xi1>, vector<8x1xf32>
    %cst_639 = arith.constant dense<0x7F800000> : vector<1xf32>
    %1157 = vector.multi_reduction <minimumf>, %1156, %cst_639 [0] : vector<8x1xf32> to vector<1xf32>
    %1158 = vector.shape_cast %1157 : vector<1xf32> to vector<1x1xf32>
    %1159 = vector.broadcast %c6_i32 : i32 to vector<1x1xi32>
    %c0_i32_640 = arith.constant 0 : i32
    %1160 = vector.broadcast %c0_i32_640 : i32 to vector<1x1xi32>
    %1161 = arith.cmpi eq, %1159, %1160 : vector<1x1xi32>
    %cst_641 = arith.constant 7.000000e+00 : f32
    %cst_642 = arith.constant 5.000000e-01 : f32
    %1162 = arith.subf %cst_641, %cst_642 : f32
    %1163 = vector.broadcast %1162 : f32 to vector<1x1xf32>
    %1164 = arith.cmpf ogt, %1145, %1163 : vector<1x1xf32>
    %1165 = arith.andi %1164, %1161 : vector<1x1xi1>
    %cst_643 = arith.constant dense<true> : vector<1x1xi1>
    %1166 = arith.xori %1161, %cst_643 : vector<1x1xi1>
    %1167 = arith.andi %1164, %1166 : vector<1x1xi1>
    %1168 = arith.select %1165, %1158, %1145 : vector<1x1xi1>, vector<1x1xf32>
    %c0_644 = arith.constant 0 : index
    %c0_645 = arith.constant 0 : index
    %1169 = vector.load %arg19[%c0_644, %c0_645] : memref<1x1xf32, #tpu.memory_space<vmem>>, vector<1x1xf32>
    %cst_646 = arith.constant 1.000000e+00 : f32
    %cst_647 = arith.constant 0.000000e+00 : f32
    %1170 = vector.broadcast %cst_646 : f32 to vector<1x1xf32>
    %1171 = vector.broadcast %cst_647 : f32 to vector<1x1xf32>
    %1172 = arith.select %1167, %1170, %1171 : vector<1x1xi1>, vector<1x1xf32>
    %1173 = arith.maximumf %1169, %1172 : vector<1x1xf32>
    %c0_648 = arith.constant 0 : index
    %c0_649 = arith.constant 0 : index
    %1174 = vector.load %arg19[%c0_648, %c0_649] : memref<1x1xf32, #tpu.memory_space<vmem>>, vector<1x1xf32>
    tpu.vector_store %arg19[%c0_648, %c0_649], %1173 {strides = array<i32>} : memref<1x1xf32, #tpu.memory_space<vmem>>, vector<1x1xf32>,
    %1175 = vector.broadcast %1168 : vector<1x1xf32> to vector<8x1xf32>
    %1176 = arith.subf %1137, %1175 : vector<8x1xf32>
    %1177 = math.absf %1176 : vector<8x1xf32>
    %cst_650 = arith.constant 5.000000e-01 : f32
    %1178 = vector.broadcast %cst_650 : f32 to vector<8x1xf32>
    %1179 = arith.cmpf olt, %1177, %1178 : vector<8x1xf32>
    %cst_651 = arith.constant 1.000000e+00 : f32
    %cst_652 = arith.constant 0.000000e+00 : f32
    %1180 = vector.broadcast %cst_651 : f32 to vector<8x1xf32>
    %1181 = vector.broadcast %cst_652 : f32 to vector<8x1xf32>
    %1182 = arith.select %1179, %1180, %1181 : vector<8x1xi1>, vector<8x1xf32>
    %cst_653 = arith.constant 1.000000e+00 : f32
    %1183 = vector.broadcast %cst_653 : f32 to vector<1x1xf32>
    %1184 = arith.subf %1183, %1173 : vector<1x1xf32>
    %1185 = vector.broadcast %1184 : vector<1x1xf32> to vector<8x1xf32>
    %1186 = arith.mulf %1182, %1185 : vector<8x1xf32>
    %1187 = arith.index_cast %c6_i32 : i32 to index
    %c0_654 = arith.constant 0 : index
    %c0_655 = arith.constant 0 : index
    %1188 = vector.load %arg14[%1187, %c0_654, %c0_655] : memref<7x8x1xf32, #tpu.memory_space<vmem>>, vector<1x8x1xf32>
    %1189 = vector.shape_cast %1188 : vector<1x8x1xf32> to vector<8x1xf32>
    %1190 = vector.shape_cast %1186 : vector<8x1xf32> to vector<1x8x1xf32>
    tpu.vector_store %arg14[%1187, %c0_654, %c0_655], %1190 {strides = array<i32>} : memref<7x8x1xf32, #tpu.memory_space<vmem>>, vector<1x8x1xf32>,
    %c0_656 = arith.constant 0 : index
    %c0_657 = arith.constant 0 : index
    %1191 = vector.load %arg18[%c0_656, %c0_657] : memref<8x1xf32, #tpu.memory_space<vmem>>, vector<8x1xf32>
    %1192 = arith.maximumf %1191, %1186 : vector<8x1xf32>
    %c0_658 = arith.constant 0 : index
    %c0_659 = arith.constant 0 : index
    %1193 = vector.load %arg18[%c0_658, %c0_659] : memref<8x1xf32, #tpu.memory_space<vmem>>, vector<8x1xf32>
    tpu.vector_store %arg18[%c0_658, %c0_659], %1192 {strides = array<i32>} : memref<8x1xf32, #tpu.memory_space<vmem>>, vector<8x1xf32>,
    %c0_660 = arith.constant 0 : index
    %c0_661 = arith.constant 0 : index
    %1194 = vector.load %arg1[%c0_660, %c0_661] : memref<8x32xf32, #tpu.memory_space<vmem>>, vector<8x32xf32>
    %1195 = vector.broadcast %1186 : vector<8x1xf32> to vector<8x32xf32>
    %1196 = arith.mulf %1195, %1194 : vector<8x32xf32>
    %cst_662 = arith.constant dense<0.000000e+00> : vector<32xf32>
    %1197 = vector.multi_reduction <add>, %1196, %cst_662 [0] : vector<8x32xf32> to vector<32xf32>
    %1198 = vector.shape_cast %1197 : vector<32xf32> to vector<1x32xf32>
    %c0_663 = arith.constant 0 : index
    %c0_664 = arith.constant 0 : index
    %1199 = vector.load %arg17[%c0_663, %c0_664] : memref<1x32xf32, #tpu.memory_space<vmem>>, vector<1x32xf32>
    tpu.vector_store %arg17[%c0_663, %c0_664], %1198 {strides = array<i32>} : memref<1x32xf32, #tpu.memory_space<vmem>>, vector<1x32xf32>,
    %c7_i32 = arith.constant 7 : i32
    return
  }
  func.func @transform_0(%arg0: i32) -> (i32, i32) {
    %c0_i32 = arith.constant 0 : i32
    %c0_i32_0 = arith.constant 0 : i32
    %c0_i32_1 = arith.constant 0 : i32
    return %c0_i32, %c0_i32_0 : i32, i32
  }
  func.func @transform_1(%arg0: i32) -> (i32, i32) {
    %c0_i32 = arith.constant 0 : i32
    %c0_i32_0 = arith.constant 0 : i32
    %c0_i32_1 = arith.constant 0 : i32
    return %c0_i32, %c0_i32_0 : i32, i32
  }
  func.func @transform_2(%arg0: i32) -> (i32, i32) {
    %c0_i32 = arith.constant 0 : i32
    %c0_i32_0 = arith.constant 0 : i32
    %c0_i32_1 = arith.constant 0 : i32
    return %c0_i32, %c0_i32_0 : i32, i32
  }
  func.func @transform_3(%arg0: i32) -> (i32, i32) {
    %c0_i32 = arith.constant 0 : i32
    %c0_i32_0 = arith.constant 0 : i32
    %c0_i32_1 = arith.constant 0 : i32
    return %c0_i32, %c0_i32_0 : i32, i32
  }
  func.func @transform_4(%arg0: i32) -> (i32, i32) {
    %c0_i32 = arith.constant 0 : i32
    %c0_i32_0 = arith.constant 0 : i32
    %c0_i32_1 = arith.constant 0 : i32
    return %c0_i32, %c0_i32_0 : i32, i32
  }
  func.func @transform_5(%arg0: i32) -> (i32, i32) {
    %c0_i32 = arith.constant 0 : i32
    %c0_i32_0 = arith.constant 0 : i32
    %c0_i32_1 = arith.constant 0 : i32
    return %c0_i32, %c0_i32_0 : i32, i32
  }
  func.func @transform_6(%arg0: i32) -> (i32, i32) {
    %c0_i32 = arith.constant 0 : i32
    %c0_i32_0 = arith.constant 0 : i32
    %c0_i32_1 = arith.constant 0 : i32
    return %c0_i32, %c0_i32_0 : i32, i32
  }
  func.func @transform_7(%arg0: i32) -> (i32, i32) {
    %c0_i32 = arith.constant 0 : i32
    %c0_i32_0 = arith.constant 0 : i32
    %c0_i32_1 = arith.constant 0 : i32
    return %c0_i32, %c0_i32_0 : i32, i32
  }
  func.func @transform_8(%arg0: i32) -> (i32, i32) {
    %c0_i32 = arith.constant 0 : i32
    %c0_i32_0 = arith.constant 0 : i32
    %c0_i32_1 = arith.constant 0 : i32
    return %c0_i32, %c0_i32_0 : i32, i32
  }
  func.func @transform_9(%arg0: i32) -> (i32, i32) {
    %c0_i32 = arith.constant 0 : i32
    %c0_i32_0 = arith.constant 0 : i32
    %c0_i32_1 = arith.constant 0 : i32
    return %c0_i32, %c0_i32_0 : i32, i32
  }
  func.func @transform_10(%arg0: i32) -> (i32, i32) {
    %c0_i32 = arith.constant 0 : i32
    %c0_i32_0 = arith.constant 0 : i32
    %c0_i32_1 = arith.constant 0 : i32
    return %c0_i32, %c0_i32_0 : i32, i32
  }
  func.func @transform_11(%arg0: i32) -> (i32, i32) {
    %c0_i32 = arith.constant 0 : i32
    %c0_i32_0 = arith.constant 0 : i32
    %c0_i32_1 = arith.constant 0 : i32
    return %c0_i32, %c0_i32_0 : i32, i32
  }
  func.func @transform_12(%arg0: i32) -> (i32, i32) {
    %c0_i32 = arith.constant 0 : i32
    %c0_i32_0 = arith.constant 0 : i32
    %c0_i32_1 = arith.constant 0 : i32
    return %c0_i32, %c0_i32_0 : i32, i32
  }
  func.func @transform_13(%arg0: i32) -> (i32, i32, i32) {
    %c0_i32 = arith.constant 0 : i32
    %c0_i32_0 = arith.constant 0 : i32
    %c0_i32_1 = arith.constant 0 : i32
    %c0_i32_2 = arith.constant 0 : i32
    return %c0_i32, %c0_i32_0, %c0_i32_1 : i32, i32, i32
  }
}

</mosaic_0001>

<bundles_post_ra>
// kernel: _fused_decode.1
= control target key start
LH: loop header
LB: loop body
LE: loop exit
PB: predicated region body
PF: predicated region fallthrough
CT: control target
= control target key end

     0   :  { %18 = vsyncpa [#allocation10], 0  ;;  %s6389_s0 = inlined_call_operand.vmem [shape: f32[8,32], index: 0, kind: input, shape index: {}]   ;;  %s6390_s1 = inlined_call_operand.vmem [shape: f32[32,128], index: 1, kind: input, shape index: {}]   ;;  %s6391_s2 = inlined_call_operand.vmem [shape: f32[32,128], index: 2, kind: input, shape index: {}]   ;;  %s6392_s3 = inlined_call_operand.vmem [shape: f32[1,128], index: 3, kind: input, shape index: {}]   ;;  %s6393_s4 = inlined_call_operand.hbm [shape: f32[32,32], index: 4, kind: input, shape index: {}]   ;;  %s6394_s5 = inlined_call_operand.hbm [shape: f32[32,32], index: 5, kind: input, shape index: {}]   ;;  %s6395_s6 = inlined_call_operand.hbm [shape: f32[32,32], index: 6, kind: input, shape index: {}]   ;;  %s6396_s7 = inlined_call_operand.vmem [shape: f32[1,32], index: 7, kind: input, shape index: {}]   ;;  %s6397_s8 = inlined_call_operand.hbm [shape: f32[32,32], index: 8, kind: input, shape index: {}]   ;;  %s6398_s9 = inlined_call_operand.vmem [shape: f32[1,32], index: 9, kind: input, shape index: {}]   ;;  %s6399_s10 = inlined_call_operand.vmem [shape: f32[1,32], index: 10, kind: input, shape index: {}]   ;;  %s6400_s11 = inlined_call_operand.vmem [shape: f32[1,32], index: 11, kind: input, shape index: {}]   ;;  %s6401_s12 = inlined_call_operand.vmem [shape: f32[1,32], index: 12, kind: input, shape index: {}]   ;;  %s6402_s13 = inlined_call_operand.vmem [shape: f32[7,8,1], index: 13, kind: output, shape index: {}]  }
   0x1   :  { %19 = vsyncpa [#allocation12], 0 }
   0x2   :  { %20 = vsyncpa [#allocation15], 0  ;;  %s5459_s25 = smov [#allocation11]   ;;  %s5460_s27 = smov [#allocation9]  }
   0x3   :  { %s46_s26 = sshll.u32 %s5459_s25, 4  ;;  %s34_s28 = sshll.u32 %s5460_s27, 4  ;;  %s47_s26 = int_to_ptr.vmem [resolvable:$true] %s46_s26  ;;  %s5542_s28 = int_to_ptr.vmem [resolvable:$true] %s34_s28 }
   0x4   :  { %s5365_s14 = scalar_lea.hbm %s6394_s5, 512 }
   0x5   :  { %p5366_p0 = scmp.ne.s32.totalorder %s6394_s5, %s5365_s14  ;;  %p5369_p1 = scmp.lt.u32.totalorder %s5365_s14, %s6394_s5 }
   0x7   :  { %p5371_p2 = pnand %p5369_p1, %p5366_p0 }
   0x9   :  { %5374 = shalt.err (!%p5371_p2)
}
   0xa   :  { %s5375_s19 = scalar_lea.vmem %s47_s26, 512  ;;  %p5380_p4 = scmp.lt.s32.totalorder %s47_s26, %s47_s26 }
   0xb   :  { %p5376_p3 = scmp.ne.s32.totalorder %s47_s26, %s5375_s19  ;;  %p5381_p5 = scmp.lt.s32.totalorder %s5375_s19, %s5375_s19 }
   0xd   :  { %p5382_p6 = por %p5381_p5, %p5380_p4 }
   0xf   :  { %p5383_p7 = pnand %p5382_p6, %p5376_p3 }
  0x11   :  { %5386 = shalt.err (!%p5383_p7)
}
  0x12   :  { %s5461_s20 = smov 128   ;;  %s5462_s21 = smov 8  }
  0x13   :  { %52 = dma.hbm_to_vmem [thread:$0]  %s6394_s5, 512, %s47_s26, [#allocation12], %s5461_s20, %s5461_s20, %s5462_s21  }
  0x14   :  { %s5387_s27 = scalar_lea.hbm %s6393_s4, 512 }
  0x15   :  { %p5388_p8 = scmp.ne.s32.totalorder %s6393_s4, %s5387_s27  ;;  %p5391_p9 = scmp.lt.u32.totalorder %s5387_s27, %s6393_s4 }
  0x17   :  { %p5393_p10 = pnand %p5391_p9, %p5388_p8 }
  0x19   :  { %5396 = shalt.err (!%p5393_p10)
}
  0x1a   :  { %s5397_s16 = scalar_lea.vmem %s5542_s28, 512  ;;  %p5402_p12 = scmp.lt.s32.totalorder %s5542_s28, %s5542_s28 }
  0x1b   :  { %p5398_p11 = scmp.ne.s32.totalorder %s5542_s28, %s5397_s16  ;;  %p5403_p13 = scmp.lt.s32.totalorder %s5397_s16, %s5397_s16 }
  0x1d   :  { %p5404_p0 = por %p5403_p13, %p5402_p12 }
  0x1f   :  { %p5405_p1 = pnand %p5404_p0, %p5398_p11 }
  0x21   :  { %5408 = shalt.err (!%p5405_p1)
}
  0x22   :  { %40 = dma.hbm_to_vmem [thread:$0]  %s6393_s4, 512, %s5542_s28, [#allocation10], %s5461_s20, %s5461_s20, %s5462_s21  }
  0x23   :  { %s5463_s17 = smov [#allocation13]   ;;  %s5464_s19 = smov [#allocation14]  }
  0x24   :  { %s58_s18 = sshll.u32 %s5463_s17, 4  ;;  %s72_s22 = sshll.u32 %s5464_s19, 4  ;;  %s59_s18 = int_to_ptr.vmem [resolvable:$true] %s58_s18  ;;  %s5579_s22 = int_to_ptr.vmem [resolvable:$true] %s72_s22 }
  0x25   :  { %s5409_s25 = scalar_lea.hbm %s6395_s6, 512 }
  0x26   :  { %p5410_p2 = scmp.ne.s32.totalorder %s6395_s6, %s5409_s25  ;;  %p5413_p3 = scmp.lt.u32.totalorder %s5409_s25, %s6395_s6 }
  0x28   :  { %p5415_p4 = pnand %p5413_p3, %p5410_p2 }
  0x2a   :  { %5418 = shalt.err (!%p5415_p4)
}
  0x2b   :  { %s5419_s4 = scalar_lea.vmem %s59_s18, 512  ;;  %p5424_p6 = scmp.lt.s32.totalorder %s59_s18, %s59_s18 }
  0x2c   :  { %p5420_p5 = scmp.ne.s32.totalorder %s59_s18, %s5419_s4  ;;  %p5425_p7 = scmp.lt.s32.totalorder %s5419_s4, %s5419_s4 }
  0x2e   :  { %p5426_p8 = por %p5425_p7, %p5424_p6 }
  0x30   :  { %p5427_p9 = pnand %p5426_p8, %p5420_p5 }
  0x32   :  { %5430 = shalt.err (!%p5427_p9)
}
  0x33   :  { %64 = dma.hbm_to_vmem [thread:$0]  %s6395_s6, 512, %s59_s18, [#allocation12], %s5461_s20, %s5461_s20, %s5462_s21  }
  0x34   :  { %s5431_s26 = scalar_lea.hbm %s6397_s8, 512 }
  0x35   :  { %p5432_p10 = scmp.ne.s32.totalorder %s6397_s8, %s5431_s26  ;;  %p5435_p11 = scmp.lt.u32.totalorder %s5431_s26, %s6397_s8 }
  0x37   :  { %p5437_p12 = pnand %p5435_p11, %p5432_p10 }
  0x39   :  { %5440 = shalt.err (!%p5437_p12)
}
  0x3a   :  { %s5441_s25 = scalar_lea.vmem %s5579_s22, 512  ;;  %p5446_p0 = scmp.lt.s32.totalorder %s5579_s22, %s5579_s22 }
  0x3b   :  { %p5442_p13 = scmp.ne.s32.totalorder %s5579_s22, %s5441_s25  ;;  %p5447_p1 = scmp.lt.s32.totalorder %s5441_s25, %s5441_s25 }
  0x3d   :  { %p5448_p2 = por %p5447_p1, %p5446_p0 }
  0x3f   :  { %p5449_p3 = pnand %p5448_p2, %p5442_p13 }
  0x41   :  { %5452 = shalt.err (!%p5449_p3)
}
  0x42   :  { %78 = dma.hbm_to_vmem [thread:$0]  %s6397_s8, 512, %s5579_s22, [#allocation15], %s5461_s20, %s5461_s20, %s5462_s21  }
  0x43   :  { %5453 = dma.done.wait [#allocation10], 512  }
  0x44   :  { %5454 = vsyncadd [#allocation10], 4294966784 }
  0x45   :  { %5455 = dma.done.wait [#allocation12], 1024  }
  0x46   :  { %5456 = vsyncadd [#allocation12], 4294966272 }
  0x47   :  { %5457 = dma.done.wait [#allocation15], 512  }
  0x48   :  { %5458 = vsyncadd [#allocation15], 4294966784  ;;  %v5465_v0 = vmov 0.0|0.0   ;;  %vm5466_vm0 = vmmov 0   ;;  %v5467_v1 = vmov 0.0   ;;  %v100_v2 = vld [vmem:[#allocation9] sm:$0xff] }
  0x49   :  { %4987 = vmatprep.subr.bf16.mxu0 %v5465_v0  ;;  %4993 = vmatprep.subr.bf16.mxu1 %v5465_v0  ;;  %v101_v3 = vld [vmem:[#allocation9 + $0x8] sm:$0xff]  ;;  %v179_v4 = vld [vmem:[#allocation11] sm:$0xff]  ;;  %v102_v7 = vld [vmem:[#allocation9 + $0x10] sm:$0xff]  ;;  %vm255_vm1 = vcmask 253952   ;;  %vm104_vm2 = vcmask 261120   ;;  %s5469_s22 = smov 32  }
  0x4a   :  { %4588 = vmatprep.mubr.msk.f32.mxu0 %vm5466_vm0, %v5467_v1  ;;  %4599 = vmatprep.mubr.msk.f32.mxu1 %vm5466_vm0, %v5467_v1  ;;  %v4988_v5 = vpack.c.bf16 %v101_v3, %v100_v2  ;;  %v180_v6 = vld [vmem:[#allocation11 + $0x8] sm:$0xff]  ;;  %v103_v8 = vld [vmem:[#allocation9 + $0x18] sm:$0xff]  ;;  %v181_v10 = vld [vmem:[#allocation11 + $0x10] sm:$0xff]  ;;  %v542_v3 = vlaneseq  ;;  %vm261_vm3 = vcmask 7168   ;;  %s5470_s4 = smov 96   ;;  %vm263_vm4 = vcmask 0  }
  0x4b   :  { %v4994_v9 = vpack.c.bf16 %v180_v6, %v179_v4  ;;  %v182_v11 = vld [vmem:[#allocation11 + $0x18] sm:$0xff]  ;;  %v4991_v12 = vpack.c.bf16 %v103_v8, %v102_v7  ;;  %v272_v14 = vld [vmem:[%s6391_s2] sm:$0xff]  ;;  %v273_v15 = vld [vmem:[%s6391_s2 + $0x8] sm:$0xff]  ;;  %262 = vst.msk [vmem:[#allocation5] sm:$0xff] %vm261_vm3, %v5467_v1 }
  0x4c   :  { %4989 = vmatpush3.bf16.msra.mxu0 %v4988_v5  ;;  %v4997_v13 = vpack.c.bf16 %v182_v11, %v181_v10  ;;  %v268_v16 = vld [vmem:[%s6390_s1] sm:$0xff]  ;;  %v269_v17 = vld [vmem:[%s6390_s1 + $0x8] sm:$0xff]  ;;  %v5648_v21 = vpack.c.bf16 %v273_v15, %v272_v14  ;;  %v274_v23 = vld [vmem:[%s6391_s2 + $0x10] sm:$0xff]  ;;  %v5726_v4 = vshrl.u32 %v542_v3, 7  ;;  %264 = vst.msk [vmem:[#allocation6] sm:$0x1] %vm263_vm4, %v5467_v1 }
  0x4d   :  { %4995 = vmatpush3.bf16.msra.mxu1 %v4994_v9  ;;  %4990 = vmatprep.subr.bf16.mxu0 %v5465_v0  ;;  %v254_v18 = vld [vmem:[%s6399_s10] sm:$0x1]  ;;  %v5652_v22 = vpack.c.bf16 %v269_v17, %v268_v16  ;;  %v275_v24 = vld [vmem:[%s6391_s2 + $0x18] sm:$0xff]  ;;  %v270_v25 = vld [vmem:[%s6390_s1 + $0x10] sm:$0xff] }
  0x4e   :  { %4996 = vmatprep.subr.bf16.mxu1 %v5465_v0  ;;  %256 = vst.msk [vmem:[#allocation2] sm:$0x1] %vm255_vm1, %v254_v18  ;;  %v259_v19 = vld [vmem:[%s6401_s12] sm:$0x1]  ;;  %v271_v26 = vld [vmem:[%s6390_s1 + $0x18] sm:$0xff]  ;;  %v5672_v27 = vpack.c.bf16 %v275_v24, %v274_v23  ;;  %v467_v56 = vld [vmem:[#allocation13 + $0x8] sm:$0xff] }
  0x4f   :  { %v5646_v20 = vld [vmem:[%s6389_s0] sm:$0xff]  ;;  %260 = vst.msk [vmem:[#allocation4] sm:$0x1] %vm255_vm1, %v259_v19  ;;  %v5676_v28 = vpack.c.bf16 %v271_v26, %v270_v25  ;;  %v468_v57 = vld [vmem:[#allocation13 + $0x10] sm:$0xff]  ;;  %v469_v59 = vld [vmem:[#allocation13 + $0x18] sm:$0xff]  ;;  %v5729_v5 = vsub.s32 0, %v5726_v4 }
  0x50   :  { %4992 = vmatpush3.bf16.msra.mxu0 %v4991_v12  ;;  %v257_v31 = vld [vmem:[%s6400_s11] sm:$0x1]  ;;  %s5468_s11 = smov 64   ;;  %v5711_v60 = vpack.c.bf16 %v469_v59, %v468_v57  ;;  %v692_v59 = vld [vmem:[#allocation14 + $0x8] sm:$0xff] }
  0x51   :  { %4998 = vmatpush3.bf16.msra.mxu1 %v4997_v13  ;;  %4999 = vmatprep.subr.bf16.mxu0 %v5465_v0  ;;  %258 = vst.msk [vmem:[#allocation3] sm:$0x1] %vm255_vm1, %v257_v31  ;;  %v422_v38 = vld [vmem:[%s6392_s3] sm:$0x1] }
  0x52   :  { %5005 = vmatprep.subr.bf16.mxu1 %v5465_v0  ;;  %v466_v55 = vld [vmem:[#allocation13] sm:$0xff] }
  0x53   :  { %4589 = vmatmul.mubr.msk.f32.vlgmr.msra.gmra.mrb[0].mxu0 %vm104_vm2, %v5646_v20  ;;  %v5708_v58 = vpack.c.bf16 %v467_v56, %v466_v55  ;;  %v5738_v11 = vld [vmem:[%s6396_s7] ss:$0 sm:$0xff] }
  0x54   :  { %4600 = vmatmul.mubr.msk.f32.vlgmr.msra.gmra.mrb[0].mxu1 %vm104_vm2, %v5646_v20  ;;  %5001 = vmatpush3.bf16.msra.mxu0 %v5648_v21  ;;  %v691_v57 = vld [vmem:[#allocation14] sm:$0xff] }
  0x55   :  { %5007 = vmatpush3.bf16.msra.mxu1 %v5652_v22  ;;  %5002 = vmatprep.subr.bf16.mxu0 %v5465_v0  ;;  %v266_v29 = vld [vmem:[#allocation2] sm:$0x1] }
  0x56   :  { %5008 = vmatprep.subr.bf16.mxu1 %v5465_v0  ;;  %4610 = vmatprep.mubr.msk.f32.mxu0 %vm5466_vm0, %v5467_v1  ;;  %v265_v30 = vld [vmem:[#allocation4] sm:$0x1] }
  0x57   :  { %4621 = vmatprep.mubr.msk.f32.mxu1 %vm5466_vm0, %v5467_v1 }
  0x58   :  { %5004 = vmatpush3.bf16.msra.mxu0 %v5672_v27  ;;  %v4335_v44 = vld [vmem:[#allocation3] ss:$0 sm:$0xff] }
  0x59   :  { %5010 = vmatpush3.bf16.msra.mxu1 %v5676_v28  ;;  %5011 = vmatprep.subr.bf16.mxu0 %v5465_v0 }
  0x5a   :  { %5017 = vmatprep.subr.bf16.mxu1 %v5465_v0 }
  0x5b   :  { %4611 = vmatmul.mubr.msk.f32.vlgmr.msra.gmra.mrb[2].mxu0 %vm104_vm2, %v266_v29 }
  0x5c   :  { %4622 = vmatmul.mubr.msk.f32.vlgmr.msra.gmra.mrb[2].mxu1 %vm104_vm2, %v265_v30  ;;  %4632 = vmatprep.mubr.msk.f32.mxu0 %vm5466_vm0, %v5467_v1 }
  0x5d   :  { %4643 = vmatprep.mubr.msk.f32.mxu1 %vm5466_vm0, %v5467_v1  ;;  %5013 = vmatpush3.bf16.msra.mxu0 %v5708_v58 }
  0x5e   :  { %5019 = vmatpush3.bf16.msra.mxu1 %v5708_v58  ;;  %5014 = vmatprep.subr.bf16.mxu0 %v5465_v0 }
  0x5f   :  { %5020 = vmatprep.subr.bf16.mxu1 %v5465_v0 }
  0x61   :  { %5016 = vmatpush3.bf16.msra.mxu0 %v5711_v60 }
  0x62   :  { %5022 = vmatpush3.bf16.msra.mxu1 %v5711_v60  ;;  %5023 = vmatprep.subr.bf16.mxu0 %v5465_v0 }
  0x63   :  { %5029 = vmatprep.subr.bf16.mxu1 %v5465_v0 }
 0x126   :  { %v174_v32 = vpop.f32.mrb[0].mxu0 }
 0x127   :  { %178 = vst.msk [vmem:[#allocation7] sm:$0xff] %vm104_vm2, %v174_v32  ;;  %v249_v33 = vpop.f32.mrb[0].mxu1  ;;  %v4590_v34 = vpop.f32.mrb[1].mxu0 }
 0x128   :  { %253 = vst.msk [vmem:[#allocation8] sm:$0xff] %vm104_vm2, %v249_v33  ;;  %v4601_v35 = vpop.f32.mrb[1].mxu1 }
 0x12e   :  { %v345_v36 = vpop.f32.mrb[2].mxu0 }
 0x12f   :  { %v418_v37 = vpop.f32.mrb[2].mxu1  ;;  %v4612_v39 = vpop.f32.mrb[3].mxu0  ;;  %v5732_v9 = vld [vmem:[#allocation8] sm:$0xff] }
 0x130   :  { %v419_v40 = vadd.f32 %v418_v37, %v345_v36  ;;  %v4623_v41 = vpop.f32.mrb[3].mxu1 }
 0x132   :  { %v423_v42 = vadd.f32 %v422_v38, %v419_v40 }
 0x134   :  { %5224 = vtanh.f32 %v423_v42  ;;  %v424_v45 = vmul.f32 0.5, %v423_v42 }
 0x136   :  { %5226 = vtanh.f32 %v424_v45 }
 0x13e   :  { %v5225_v43 = vpop.eup %5224 }
 0x13f   :  { %439 = vrot.lane.b32.xlu0 %v5225_v43, %s5468_s11 }
 0x140   :  { %v5227_v46 = vpop.eup %5226 }
 0x141   :  { %v426_v47 = vmul.f32 0.5, %v5227_v46 }
 0x143   :  { %434 = vrot.lane.b32.xlu0 %v4335_v44, %s5469_s22  ;;  %v427_v48 = vadd.f32 0.5, %v426_v47 }
 0x1b1   :  { %v440_v49 = vpop.permute.xlu0 %439 }
 0x1b2   :  { %v442_v50 = vmul.f32 %v440_v49, %v427_v48 }
 0x1b4   :  { %444 = vrot.lane.b32.xlu1 %v442_v50, %s5469_s22 }
 0x1b5   :  { %v435_v51 = vpop.permute.xlu0 %434 }
 0x1b6   :  { %v437_v52 = vmul.f32 %v435_v51, %v427_v48 }
 0x226   :  { %v445_v53 = vpop.permute.xlu1 %444 }
 0x227   :  { %v5705_v54 = vadd.f32 %v445_v53, %v437_v52 }
 0x229   :  { %5228 = vtanh.f32 %v5705_v54 }
 0x233   :  { %v5229_v61 = vpop.eup %5228 }
 0x234   :  { %450 = vrot.lane.b32.xlu1 %v5229_v61, %s5468_s11  ;;  %v693_v61 = vld [vmem:[#allocation14 + $0x10] sm:$0xff] }
 0x2a6   :  { %v451_v62 = vpop.permute.xlu1 %450 }
 0x2a7   :  { %v453_v63 = vmul.f32 %v451_v62, %v427_v48  ;;  %v5764_v62 = vpack.c.bf16 %v692_v59, %v691_v57 }
 0x2a9   :  { %455 = vrot.lane.b32.xlu0 %v453_v63, %s5469_s22  ;;  %v694_v63 = vld [vmem:[#allocation14 + $0x18] sm:$0xff] }
 0x31b   :  { %v456_v2 = vpop.permute.xlu0 %455 }
 0x31c   :  { %458 = vst.msk [vmem:[#allocation2] sm:$0x1] %vm255_vm1, %v456_v2  ;;  %4633 = vmatmul.mubr.msk.f32.vlgmr.msra.gmra.mrb[4].mxu0 %vm104_vm2, %v456_v2  ;;  %v5767_v2 = vpack.c.bf16 %v694_v63, %v693_v61 }
 0x31d   :  { %4654 = vmatprep.mubr.msk.f32.mxu0 %vm5466_vm0, %v5467_v1  ;;  %5025 = vmatpush3.bf16.msra.mxu0 %v5764_v62 }
 0x31e   :  { %5026 = vmatprep.subr.bf16.mxu0 %v5465_v0 }
 0x321   :  { %5028 = vmatpush3.bf16.msra.mxu0 %v5767_v2 }
 0x322   :  { %5035 = vmatprep.subr.bf16.mxu0 %v5465_v0 }
 0x323   :  { %v863_v46 = vld [vmem:[#allocation2] sm:$0x1] }
 0x3ef   :  { %v538_v6 = vpop.f32.mrb[4].mxu0 }
 0x3f0   :  { %v545_v7 = vrot.slane %v538_v6, %v5729_v5  ;;  %v4634_v8 = vpop.f32.mrb[5].mxu0 }
 0x3f2   :  { %v546_v10 = vadd.f32 %v545_v7, %v5732_v9 }
 0x3f4   :  { %5230 = vtanh.f32 %v546_v10 }
 0x3fe   :  { %v5231_v12 = vpop.eup %5230 }
 0x3ff   :  { %v554_v13 = vmul.f32 %v5231_v12, %v5738_v11 }
 0x401   :  { %v555_v14 = vsel %vm104_vm2, %v554_v13, 0.0 }
 0x402   :  { %556 = vadd.xlane.f32.xlu1 %v555_v14 }
 0x48f   :  { %v557_v15 = vpop.xlane.xlu1 %556 }
 0x490   :  { %v558_v16 = vrot.slane %v557_v15, 4 }
 0x492   :  { %v559_v17 = vmax.f32 %v557_v15, %v558_v16 }
 0x494   :  { %v560_v18 = vrot.slane %v559_v17, 2 }
 0x496   :  { %v561_v19 = vmax.f32 %v559_v17, %v560_v18 }
 0x498   :  { %v562_v23 = vrot.slane %v561_v19, 1 }
 0x49a   :  { %v563_v24 = vmax.f32 %v561_v19, %v562_v23 }
 0x49c   :  { %v564_v25 = vsub.f32 %v557_v15, %v563_v24 }
 0x49e   :  { %v565_v26 = vmul.f32 1.442695, %v564_v25 }
 0x4a0   :  { %5232 = vpow2.f32 %v565_v26 }
 0x4aa   :  { %v5233_v29 = vpop.eup %5232 }
 0x4ab   :  { %v567_v30 = vrot.slane %v5233_v29, 4 }
 0x4ad   :  { %v568_v31 = vadd.f32 %v5233_v29, %v567_v30 }
 0x4af   :  { %v569_v32 = vrot.slane %v568_v31, 2 }
 0x4b1   :  { %v570_v33 = vadd.f32 %v569_v32, %v568_v31 }
 0x4b3   :  { %v571_v34 = vrot.slane %v570_v33, 1 }
 0x4b5   :  { %v572_v35 = vadd.f32 %v571_v34, %v570_v33 }
 0x4b7   :  { %5234 = vrcp.f32 %v572_v35 }
 0x4c1   :  { %v5235_v36 = vpop.eup %5234 }
 0x4c2   :  { %v574_v37 = vmul.f32 %v5235_v36, %v5233_v29 }
 0x4c4   :  { %v575_v38 = vmul.f32 %v574_v37, %v5732_v9 }
 0x4c6   :  { %v576_v39 = vsel %vm104_vm2, %v575_v38, 0.0 }
 0x4c7   :  { %v577_v40 = vrot.slane %v576_v39, 4 }
 0x4c9   :  { %v578_v41 = vadd.f32 %v577_v40, %v576_v39 }
 0x4cb   :  { %v579_v42 = vrot.slane %v578_v41, 2 }
 0x4cd   :  { %v580_v43 = vadd.f32 %v579_v42, %v578_v41  ;;  %v5784_v41 = vld [vmem:[#allocation7] sm:$0xff] }
 0x4cf   :  { %v581_v44 = vrot.slane %v580_v43, 1 }
 0x4d1   :  { %v582_v45 = vadd.f32 %v581_v44, %v580_v43  ;;  %v5790_v43 = vld [vmem:[%s6398_s9] ss:$0 sm:$0xff] }
 0x4d3   :  { %4644 = vmatmul.mubr.msk.f32.vlgmr.msra.gmra.mrb[4].mxu1 %vm104_vm2, %v582_v45 }
 0x4d4   :  { %5031 = vmatpush3.bf16.msra.mxu1 %v5648_v21  ;;  %4665 = vmatprep.mubr.msk.f32.mxu1 %vm5466_vm0, %v5467_v1 }
 0x4d5   :  { %5032 = vmatprep.subr.bf16.mxu1 %v5465_v0 }
 0x4d8   :  { %5034 = vmatpush3.bf16.msra.mxu1 %v5672_v27 }
 0x4d9   :  { %5041 = vmatprep.subr.bf16.mxu1 %v5465_v0 }
 0x4db   :  { %4666 = vmatmul.mubr.msk.f32.vlgmr.msra.gmra.mrb[6].mxu1 %vm104_vm2, %v863_v46 }
 0x4dc   :  { %5043 = vmatpush3.bf16.msra.mxu1 %v5708_v58  ;;  %4687 = vmatprep.mubr.msk.f32.mxu1 %vm5466_vm0, %v5467_v1 }
 0x4dd   :  { %5044 = vmatprep.subr.bf16.mxu1 %v5465_v0 }
 0x4e0   :  { %5046 = vmatpush3.bf16.msra.mxu1 %v5711_v60 }
 0x4e1   :  { %5053 = vmatprep.subr.bf16.mxu1 %v5465_v0 }
 0x5a6   :  { %v652_v47 = vpop.f32.mrb[4].mxu1 }
 0x5a7   :  { %v659_v48 = vrot.slane %v652_v47, %v5729_v5  ;;  %v4645_v49 = vpop.f32.mrb[5].mxu1  ;;  %v5471_v47 = vmov 0  }
 0x5a8   :  { %5222 = vset.pattern.permute.xlu1 %v5471_v47  ;;  %5223 = vset.pattern.permute.xlu0 %v5471_v47 }
 0x5a9   :  { %v660_v50 = vadd.f32 %v659_v48, %v5732_v9  ;;  %v828_v48 = vld [vmem:[#allocation6] sm:$0x1] }
 0x5aa   :  { %v829_v49 = vmax.f32 %v828_v48, 0.0 }
 0x5ab   :  { %5236 = vtanh.f32 %v660_v50  ;;  %v786_v50 = vld [vmem:[#allocation5] sm:$0xff] }
 0x5ac   :  { %830 = vst.msk [vmem:[#allocation6] sm:$0x1] %vm263_vm4, %v829_v49  ;;  %vm787_vm5 = vcmp.gt.f32.partialorder %v786_v50, 0.5 }
 0x5ae   :  { %v5760_v51 = vpop.f32.mrb[6].mxu1 }
 0x5af   :  { %v4667_v52 = vpop.f32.mrb[7].mxu1 }
 0x5b0   :  { %v5800_v52 = vcvt.s32.f32 %v5726_v4 }
 0x5b2   :  { %vm808_vm6 = vcmp.gt.f32.partialorder %v5800_v52, 6.5 }
 0x5b5   :  { %v5237_v53 = vpop.eup %5236 }
 0x5b6   :  { %v662_v55 = vmul.f32 %v5237_v53, %v5738_v11 }
 0x5b8   :  { %v663_v56 = vsel %vm104_vm2, %v662_v55, 0.0 }
 0x5b9   :  { %664 = vadd.xlane.f32.xlu0 %v663_v56 }
 0x646   :  { %v665_v3 = vpop.xlane.xlu0 %664 }
 0x647   :  { %v666_v6 = vrot.slane %v665_v3, 4 }
 0x649   :  { %v667_v7 = vmax.f32 %v665_v3, %v666_v6 }
 0x64b   :  { %v668_v8 = vrot.slane %v667_v7, 2 }
 0x64d   :  { %v669_v10 = vmax.f32 %v667_v7, %v668_v8 }
 0x64f   :  { %v670_v12 = vrot.slane %v669_v10, 1 }
 0x651   :  { %v671_v13 = vmax.f32 %v669_v10, %v670_v12 }
 0x653   :  { %v672_v14 = vsub.f32 %v665_v3, %v671_v13 }
 0x655   :  { %v673_v15 = vmul.f32 1.442695, %v672_v14 }
 0x657   :  { %5238 = vpow2.f32 %v673_v15 }
 0x661   :  { %v5239_v16 = vpop.eup %5238 }
 0x662   :  { %v675_v17 = vrot.slane %v5239_v16, 4 }
 0x664   :  { %v676_v18 = vadd.f32 %v5239_v16, %v675_v17 }
 0x666   :  { %v677_v19 = vrot.slane %v676_v18, 2 }
 0x668   :  { %v678_v23 = vadd.f32 %v677_v19, %v676_v18 }
 0x66a   :  { %v679_v24 = vrot.slane %v678_v23, 1 }
 0x66c   :  { %v680_v25 = vadd.f32 %v679_v24, %v678_v23 }
 0x66e   :  { %5240 = vrcp.f32 %v680_v25 }
 0x678   :  { %v5241_v26 = vpop.eup %5240 }
 0x679   :  { %v682_v29 = vmul.f32 %v5241_v26, %v5239_v16 }
 0x67b   :  { %v683_v30 = vmul.f32 %v682_v29, %v5732_v9 }
 0x67d   :  { %v684_v31 = vsel %vm104_vm2, %v683_v30, 0.0 }
 0x67e   :  { %v685_v32 = vrot.slane %v684_v31, 4 }
 0x680   :  { %v686_v33 = vadd.f32 %v685_v32, %v684_v31 }
 0x682   :  { %v687_v34 = vrot.slane %v686_v33, 2 }
 0x684   :  { %v688_v35 = vadd.f32 %v687_v34, %v686_v33 }
 0x686   :  { %v689_v36 = vrot.slane %v688_v35, 1 }
 0x688   :  { %v690_v37 = vadd.f32 %v689_v36, %v688_v35 }
 0x68a   :  { %4655 = vmatmul.mubr.msk.f32.vlgmr.msra.gmra.mrb[6].mxu0 %vm104_vm2, %v690_v37  ;;  %v835_v37 = vsub.f32 1.0, %v829_v49 }
 0x68b   :  { %5037 = vmatpush3.bf16.msra.mxu0 %v5652_v22  ;;  %4676 = vmatprep.mubr.msk.f32.mxu0 %vm5466_vm0, %v5467_v1 }
 0x68c   :  { %5038 = vmatprep.subr.bf16.mxu0 %v5465_v0 }
 0x68f   :  { %5040 = vmatpush3.bf16.msra.mxu0 %v5676_v28 }
 0x690   :  { %5047 = vmatprep.subr.bf16.mxu0 %v5465_v0 }
 0x75d   :  { %v764_v38 = vpop.f32.mrb[6].mxu0 }
 0x75e   :  { %v772_v39 = vrot.slane %v764_v38, %v5729_v5  ;;  %v4656_v40 = vpop.f32.mrb[7].mxu0 }
 0x760   :  { %v773_v42 = vadd.f32 %v772_v39, %v5784_v41 }
 0x762   :  { %5242 = vtanh.f32 %v773_v42  ;;  %v840_v42 = vrot.slane %v835_v37, %v5729_v5 }
 0x76c   :  { %v5243_v44 = vpop.eup %5242 }
 0x76d   :  { %v782_v45 = vmul.f32 %v5243_v44, %v5790_v43 }
 0x76f   :  { %v783_v46 = vsel %vm104_vm2, %v782_v45, 0.0 }
 0x770   :  { %784 = vadd.xlane.f32.xlu0 %v783_v46 }
 0x786   :  { %460 = vrot.lane.b32.xlu0 %v5705_v54, %s5470_s4 }
 0x7fd   :  { %v785_v53 = vpop.xlane.xlu0 %784 }
 0x7fe   :  { %v788_v54 = vsel %vm787_vm5, -1000000.0, %v785_v53 }
 0x7ff   :  { %v792_v55 = vsel %vm261_vm3, %v788_v54, -inf  ;;  %v809_v56 = vsel %vm808_vm6, -3e+38, %v788_v54 }
 0x800   :  { %v793_v57 = vrot.slane %v792_v55, 4  ;;  %v810_v59 = vsel %vm261_vm3, %v809_v56, -inf }
 0x801   :  { %v811_v61 = vrot.slane %v810_v59, 4  ;;  %v461_v63 = vpop.permute.xlu0 %460 }
 0x802   :  { %v794_v3 = vmax.f32 %v792_v55, %v793_v57  ;;  %463 = vst.msk [vmem:[#allocation3] sm:$0x1] %vm255_vm1, %v461_v63  ;;  %v1019_v63 = vld [vmem:[%s6392_s3] sm:$0x1] }
 0x803   :  { %v812_v6 = vmax.f32 %v810_v59, %v811_v61 }
 0x804   :  { %v795_v7 = vrot.slane %v794_v3, 2 }
 0x805   :  { %v813_v4 = vrot.slane %v812_v6, 2 }
 0x806   :  { %v796_v8 = vmax.f32 %v794_v3, %v795_v7 }
 0x807   :  { %v814_v10 = vmax.f32 %v812_v6, %v813_v4 }
 0x808   :  { %v797_v12 = vrot.slane %v796_v8, 1 }
 0x809   :  { %v815_v13 = vrot.slane %v814_v10, 1 }
 0x80a   :  { %v798_v14 = vmax.f32 %v796_v8, %v797_v12  ;;  %v4343_v8 = vld [vmem:[#allocation3] ss:$0 sm:$0xff] }
 0x80b   :  { %v816_v15 = vmax.f32 %v814_v10, %v815_v13 }
 0x80c   :  { %vm799_vm7 = vcmp.ge.f32.partialorder %v788_v54, %v798_v14 }
 0x80d   :  { %v800_v16 = vsel %vm799_vm7, %v5800_v52, 8.0  ;;  %vm817_vm8 = vcmp.ge.f32.partialorder %v809_v56, %v816_v15 }
 0x80e   :  { %v801_v17 = vsel %vm261_vm3, %v800_v16, inf  ;;  %v818_v18 = vsel %vm817_vm8, %v5800_v52, 8.0 }
 0x80f   :  { %v802_v19 = vrot.slane %v801_v17, 4  ;;  %v819_v23 = vsel %vm261_vm3, %v818_v18, inf }
 0x810   :  { %v820_v24 = vrot.slane %v819_v23, 4 }
 0x811   :  { %v803_v25 = vmin.f32 %v801_v17, %v802_v19 }
 0x812   :  { %v821_v26 = vmin.f32 %v819_v23, %v820_v24 }
 0x813   :  { %v804_v29 = vrot.slane %v803_v25, 2 }
 0x814   :  { %v822_v30 = vrot.slane %v821_v26, 2 }
 0x815   :  { %v805_v31 = vmin.f32 %v803_v25, %v804_v29 }
 0x816   :  { %v823_v32 = vmin.f32 %v821_v26, %v822_v30 }
 0x817   :  { %v806_v33 = vrot.slane %v805_v31, 1 }
 0x818   :  { %v824_v34 = vrot.slane %v823_v32, 1 }
 0x819   :  { %v807_v35 = vmin.f32 %v805_v31, %v806_v33 }
 0x81a   :  { %v825_v36 = vmin.f32 %v823_v32, %v824_v34 }
 0x81b   :  { %vm826_vm9 = vcmp.gt.f32.partialorder %v807_v35, 6.5 }
 0x81c   :  { %v827_v38 = vsel %vm826_vm9, %v825_v36, %v807_v35 }
 0x81d   :  { %v831_v39 = vsub.f32 %v5800_v52, %v827_v38 }
 0x81f   :  { %v832_v40 = vand.u32 2147483647, %v831_v39 }
 0x821   :  { %vm833_vm10 = vcmp.lt.f32.partialorder %v832_v40, 0.5 }
 0x822   :  { %v834_v44 = vsel %vm833_vm10, 1.0, %v5467_v1 }
 0x823   :  { %v842_v45 = vmul.f32 %v840_v42, %v834_v44 }
 0x825   :  { %850 = vperm.xlu1 %5222, %v842_v45   ;;  %843 = vst.msk [vmem:[%s6402_s13] sm:$0xff] %vm261_vm3, %v842_v45  ;;  %v845_v46 = vmax.f32 %v786_v50, %v842_v45 }
 0x827   :  { %846 = vst.msk [vmem:[#allocation5] sm:$0xff] %vm261_vm3, %v845_v46 }
 0x8a4   :  { %v851_v47 = vpop.permute.xlu1 %850 }
 0x8a5   :  { %v853_v48 = vmul.f32 %v851_v47, %v5646_v20 }
 0x8a7   :  { %v854_v49 = vsel %vm104_vm2, %v853_v48, 0.0 }
 0x8a8   :  { %v855_v53 = vrot.slane %v854_v49, 4 }
 0x8aa   :  { %v856_v54 = vadd.f32 %v855_v53, %v854_v49 }
 0x8ac   :  { %v857_v55 = vrot.slane %v856_v54, 2 }
 0x8ae   :  { %v858_v56 = vadd.f32 %v857_v55, %v856_v54 }
 0x8b0   :  { %v859_v57 = vrot.slane %v858_v56, 1 }
 0x8b2   :  { %v860_v59 = vadd.f32 %v859_v57, %v858_v56 }
 0x8b4   :  { %861 = vst.msk [vmem:[#allocation4] sm:$0x1] %vm255_vm1, %v860_v59 }
 0x8bb   :  { %v862_v61 = vld [vmem:[#allocation4] sm:$0x1] }
 0x8bc   :  { %4677 = vmatmul.mubr.msk.f32.vlgmr.msra.gmra.mrb[8].mxu0 %vm104_vm2, %v862_v61 }
 0x8bd   :  { %5049 = vmatpush3.bf16.msra.mxu0 %v5708_v58  ;;  %4698 = vmatprep.mubr.msk.f32.mxu0 %vm5466_vm0, %v5467_v1 }
 0x8be   :  { %5050 = vmatprep.subr.bf16.mxu0 %v5465_v0 }
 0x8c1   :  { %5052 = vmatpush3.bf16.msra.mxu0 %v5711_v60 }
 0x8c2   :  { %5059 = vmatprep.subr.bf16.mxu0 %v5465_v0 }
 0x98f   :  { %v1015_v50 = vpop.f32.mrb[8].mxu0 }
 0x990   :  { %v1016_v3 = vadd.f32 %v1015_v50, %v5760_v51  ;;  %v4678_v6 = vpop.f32.mrb[9].mxu0 }
 0x992   :  { %v1020_v7 = vadd.f32 %v1019_v63, %v1016_v3 }
 0x994   :  { %5244 = vtanh.f32 %v1020_v7  ;;  %v1021_v10 = vmul.f32 0.5, %v1020_v7 }
 0x996   :  { %5246 = vtanh.f32 %v1021_v10 }
 0x99e   :  { %v5245_v4 = vpop.eup %5244 }
 0x99f   :  { %1036 = vrot.lane.b32.xlu1 %v5245_v4, %s5468_s11 }
 0x9a0   :  { %v5247_v12 = vpop.eup %5246 }
 0x9a1   :  { %v1023_v13 = vmul.f32 0.5, %v5247_v12 }
 0x9a3   :  { %1031 = vrot.lane.b32.xlu1 %v4343_v8, %s5469_s22  ;;  %v1024_v14 = vadd.f32 0.5, %v1023_v13 }
 0xa11   :  { %v1037_v15 = vpop.permute.xlu1 %1036 }
 0xa12   :  { %v1039_v16 = vmul.f32 %v1037_v15, %v1024_v14 }
 0xa14   :  { %1041 = vrot.lane.b32.xlu0 %v1039_v16, %s5469_s22 }
 0xa15   :  { %v1032_v17 = vpop.permute.xlu1 %1031 }
 0xa16   :  { %v1034_v51 = vmul.f32 %v1032_v17, %v1024_v14 }
 0xa86   :  { %v1042_v18 = vpop.permute.xlu0 %1041 }
 0xa87   :  { %v5835_v19 = vadd.f32 %v1042_v18, %v1034_v51 }
 0xa89   :  { %5248 = vtanh.f32 %v5835_v19 }
 0xa93   :  { %v5249_v23 = vpop.eup %5248 }
 0xa94   :  { %1047 = vrot.lane.b32.xlu1 %v5249_v23, %s5468_s11 }
 0xb06   :  { %v1048_v24 = vpop.permute.xlu1 %1047 }
 0xb07   :  { %v1050_v25 = vmul.f32 %v1048_v24, %v1024_v14 }
 0xb09   :  { %1052 = vrot.lane.b32.xlu0 %v1050_v25, %s5469_s22 }
 0xb7b   :  { %v1053_v26 = vpop.permute.xlu0 %1052 }
 0xb7c   :  { %1055 = vst.msk [vmem:[#allocation2] sm:$0x1] %vm255_vm1, %v1053_v26  ;;  %4688 = vmatmul.mubr.msk.f32.vlgmr.msra.gmra.mrb[8].mxu1 %vm104_vm2, %v1053_v26 }
 0xb7d   :  { %5055 = vmatpush3.bf16.msra.mxu1 %v5764_v62  ;;  %4709 = vmatprep.mubr.msk.f32.mxu1 %vm5466_vm0, %v5467_v1 }
 0xb7e   :  { %5056 = vmatprep.subr.bf16.mxu1 %v5465_v0 }
 0xb81   :  { %5058 = vmatpush3.bf16.msra.mxu1 %v5767_v2 }
 0xb82   :  { %5065 = vmatprep.subr.bf16.mxu1 %v5465_v0 }
 0xb83   :  { %v1440_v10 = vld [vmem:[#allocation2] sm:$0x1] }
 0xc4f   :  { %v1135_v29 = vpop.f32.mrb[8].mxu1 }
 0xc50   :  { %v1142_v30 = vrot.slane %v1135_v29, %v5729_v5  ;;  %v4689_v31 = vpop.f32.mrb[9].mxu1 }
 0xc52   :  { %v1143_v32 = vadd.f32 %v1142_v30, %v5732_v9 }
 0xc54   :  { %5250 = vtanh.f32 %v1143_v32 }
 0xc5e   :  { %v5251_v33 = vpop.eup %5250 }
 0xc5f   :  { %v1151_v34 = vmul.f32 %v5251_v33, %v5738_v11 }
 0xc61   :  { %v1152_v35 = vsel %vm104_vm2, %v1151_v34, 0.0 }
 0xc62   :  { %1153 = vadd.xlane.f32.xlu1 %v1152_v35 }
 0xcef   :  { %v1154_v36 = vpop.xlane.xlu1 %1153 }
 0xcf0   :  { %v1155_v37 = vrot.slane %v1154_v36, 4 }
 0xcf2   :  { %v1156_v38 = vmax.f32 %v1154_v36, %v1155_v37 }
 0xcf4   :  { %v1157_v39 = vrot.slane %v1156_v38, 2 }
 0xcf6   :  { %v1158_v40 = vmax.f32 %v1156_v38, %v1157_v39 }
 0xcf8   :  { %v1159_v42 = vrot.slane %v1158_v40, 1 }
 0xcfa   :  { %v1160_v44 = vmax.f32 %v1158_v40, %v1159_v42 }
 0xcfc   :  { %v1161_v45 = vsub.f32 %v1154_v36, %v1160_v44 }
 0xcfe   :  { %v1162_v46 = vmul.f32 1.442695, %v1161_v45 }
 0xd00   :  { %5252 = vpow2.f32 %v1162_v46 }
 0xd0a   :  { %v5253_v47 = vpop.eup %5252 }
 0xd0b   :  { %v1164_v48 = vrot.slane %v5253_v47, 4 }
 0xd0d   :  { %v1165_v49 = vadd.f32 %v5253_v47, %v1164_v48 }
 0xd0f   :  { %v1166_v53 = vrot.slane %v1165_v49, 2 }
 0xd11   :  { %v1167_v54 = vadd.f32 %v1166_v53, %v1165_v49 }
 0xd13   :  { %v1168_v55 = vrot.slane %v1167_v54, 1 }
 0xd15   :  { %v1169_v56 = vadd.f32 %v1168_v55, %v1167_v54 }
 0xd17   :  { %5254 = vrcp.f32 %v1169_v56 }
 0xd21   :  { %v5255_v57 = vpop.eup %5254 }
 0xd22   :  { %v1171_v59 = vmul.f32 %v5255_v57, %v5253_v47 }
 0xd24   :  { %v1172_v61 = vmul.f32 %v1171_v59, %v5732_v9 }
 0xd26   :  { %v1173_v50 = vsel %vm104_vm2, %v1172_v61, 0.0 }
 0xd27   :  { %v1174_v63 = vrot.slane %v1173_v50, 4 }
 0xd29   :  { %v1175_v3 = vadd.f32 %v1174_v63, %v1173_v50  ;;  %v1383_v63 = vld [vmem:[#allocation5] sm:$0xff] }
 0xd2a   :  { %vm1384_vm11 = vcmp.gt.f32.partialorder %v1383_v63, 0.5 }
 0xd2b   :  { %v1176_v6 = vrot.slane %v1175_v3, 2 }
 0xd2d   :  { %v1177_v7 = vadd.f32 %v1176_v6, %v1175_v3 }
 0xd2f   :  { %v1178_v4 = vrot.slane %v1177_v7, 1 }
 0xd31   :  { %v1179_v8 = vadd.f32 %v1178_v4, %v1177_v7 }
 0xd33   :  { %4699 = vmatmul.mubr.msk.f32.vlgmr.msra.gmra.mrb[10].mxu0 %vm104_vm2, %v1179_v8 }
 0xd34   :  { %5061 = vmatpush3.bf16.msra.mxu0 %v5648_v21  ;;  %4720 = vmatprep.mubr.msk.f32.mxu0 %vm5466_vm0, %v5467_v1 }
 0xd35   :  { %5062 = vmatprep.subr.bf16.mxu0 %v5465_v0 }
 0xd38   :  { %5064 = vmatpush3.bf16.msra.mxu0 %v5672_v27 }
 0xd39   :  { %5071 = vmatprep.subr.bf16.mxu0 %v5465_v0 }
 0xd3b   :  { %4721 = vmatmul.mubr.msk.f32.vlgmr.msra.gmra.mrb[12].mxu0 %vm104_vm2, %v1440_v10 }
 0xd3c   :  { %5073 = vmatpush3.bf16.msra.mxu0 %v5708_v58  ;;  %4742 = vmatprep.mubr.msk.f32.mxu0 %vm5466_vm0, %v5467_v1 }
 0xd3d   :  { %5074 = vmatprep.subr.bf16.mxu0 %v5465_v0 }
 0xd40   :  { %5076 = vmatpush3.bf16.msra.mxu0 %v5711_v60 }
 0xd41   :  { %5083 = vmatprep.subr.bf16.mxu0 %v5465_v0 }
 0xe06   :  { %v1249_v21 = vpop.f32.mrb[10].mxu0 }
 0xe07   :  { %v1256_v12 = vrot.slane %v1249_v21, %v5729_v5  ;;  %v4700_v27 = vpop.f32.mrb[11].mxu0 }
 0xe09   :  { %v1257_v13 = vadd.f32 %v1256_v12, %v5732_v9 }
 0xe0b   :  { %5256 = vtanh.f32 %v1257_v13 }
 0xe0e   :  { %v5870_v14 = vpop.f32.mrb[12].mxu0 }
 0xe0f   :  { %v4722_v15 = vpop.f32.mrb[13].mxu0 }
 0xe15   :  { %v5257_v16 = vpop.eup %5256 }
 0xe16   :  { %v1259_v17 = vmul.f32 %v5257_v16, %v5738_v11 }
 0xe18   :  { %v1260_v51 = vsel %vm104_vm2, %v1259_v17, 0.0 }
 0xe19   :  { %1261 = vadd.xlane.f32.xlu0 %v1260_v51 }
 0xea6   :  { %v1262_v18 = vpop.xlane.xlu0 %1261 }
 0xea7   :  { %v1263_v23 = vrot.slane %v1262_v18, 4 }
 0xea9   :  { %v1264_v24 = vmax.f32 %v1262_v18, %v1263_v23 }
 0xeab   :  { %v1265_v25 = vrot.slane %v1264_v24, 2 }
 0xead   :  { %v1266_v26 = vmax.f32 %v1264_v24, %v1265_v25  ;;  %v1403_v24 = vld [vmem:[#allocation6] sm:$0x1] }
 0xeaf   :  { %v1267_v29 = vrot.slane %v1266_v26, 1 }
 0xeb1   :  { %v1268_v30 = vmax.f32 %v1266_v26, %v1267_v29 }
 0xeb3   :  { %v1269_v31 = vsub.f32 %v1262_v18, %v1268_v30 }
 0xeb5   :  { %v1270_v32 = vmul.f32 1.442695, %v1269_v31 }
 0xeb7   :  { %5258 = vpow2.f32 %v1270_v32 }
 0xec1   :  { %v5259_v33 = vpop.eup %5258 }
 0xec2   :  { %v1272_v34 = vrot.slane %v5259_v33, 4 }
 0xec4   :  { %v1273_v35 = vadd.f32 %v5259_v33, %v1272_v34 }
 0xec6   :  { %v1274_v36 = vrot.slane %v1273_v35, 2 }
 0xec8   :  { %v1275_v37 = vadd.f32 %v1274_v36, %v1273_v35 }
 0xeca   :  { %v1276_v38 = vrot.slane %v1275_v37, 1 }
 0xecc   :  { %v1277_v39 = vadd.f32 %v1276_v38, %v1275_v37 }
 0xece   :  { %5260 = vrcp.f32 %v1277_v39 }
 0xed8   :  { %v5261_v40 = vpop.eup %5260 }
 0xed9   :  { %v1279_v42 = vmul.f32 %v5261_v40, %v5259_v33 }
 0xedb   :  { %v1280_v44 = vmul.f32 %v1279_v42, %v5732_v9 }
 0xedd   :  { %v1281_v45 = vsel %vm104_vm2, %v1280_v44, 0.0 }
 0xede   :  { %v1282_v46 = vrot.slane %v1281_v45, 4 }
 0xee0   :  { %v1283_v47 = vadd.f32 %v1282_v46, %v1281_v45 }
 0xee2   :  { %v1284_v48 = vrot.slane %v1283_v47, 2 }
 0xee4   :  { %v1285_v49 = vadd.f32 %v1284_v48, %v1283_v47  ;;  %v1596_v48 = vld [vmem:[%s6392_s3] sm:$0x1] }
 0xee6   :  { %v1286_v53 = vrot.slane %v1285_v49, 1 }
 0xee8   :  { %v1287_v54 = vadd.f32 %v1286_v53, %v1285_v49 }
 0xeea   :  { %4710 = vmatmul.mubr.msk.f32.vlgmr.msra.gmra.mrb[10].mxu1 %vm104_vm2, %v1287_v54 }
 0xeeb   :  { %5067 = vmatpush3.bf16.msra.mxu1 %v5652_v22  ;;  %4731 = vmatprep.mubr.msk.f32.mxu1 %vm5466_vm0, %v5467_v1 }
 0xeec   :  { %5068 = vmatprep.subr.bf16.mxu1 %v5465_v0 }
 0xeef   :  { %5070 = vmatpush3.bf16.msra.mxu1 %v5676_v28 }
 0xef0   :  { %5077 = vmatprep.subr.bf16.mxu1 %v5465_v0 }
 0xfbd   :  { %v1361_v55 = vpop.f32.mrb[10].mxu1 }
 0xfbe   :  { %v1369_v56 = vrot.slane %v1361_v55, %v5729_v5  ;;  %v4711_v57 = vpop.f32.mrb[11].mxu1 }
 0xfc0   :  { %v1370_v59 = vadd.f32 %v1369_v56, %v5784_v41 }
 0xfc2   :  { %5262 = vtanh.f32 %v1370_v59 }
 0xfcc   :  { %v5263_v61 = vpop.eup %5262 }
 0xfcd   :  { %v1379_v50 = vmul.f32 %v5263_v61, %v5790_v43 }
 0xfcf   :  { %v1380_v22 = vsel %vm104_vm2, %v1379_v50, 0.0 }
 0xfd0   :  { %1381 = vadd.xlane.f32.xlu0 %v1380_v22 }
 0xfe6   :  { %1057 = vrot.lane.b32.xlu0 %v5835_v19, %s5470_s4 }
0x105d   :  { %v1382_v28 = vpop.xlane.xlu0 %1381 }
0x105e   :  { %v1385_v3 = vsel %vm1384_vm11, -1000000.0, %v1382_v28 }
0x105f   :  { %v1386_v6 = vsel %vm261_vm3, %v1385_v3, -inf }
0x1060   :  { %v1387_v7 = vrot.slane %v1386_v6, 4 }
0x1061   :  { %v1058_v4 = vpop.permute.xlu0 %1057 }
0x1062   :  { %v1388_v8 = vmax.f32 %v1386_v6, %v1387_v7  ;;  %1060 = vst.msk [vmem:[#allocation3] sm:$0x1] %vm255_vm1, %v1058_v4 }
0x1064   :  { %v1389_v10 = vrot.slane %v1388_v8, 2 }
0x1066   :  { %v1390_v21 = vmax.f32 %v1388_v8, %v1389_v10 }
0x1068   :  { %v1391_v12 = vrot.slane %v1390_v21, 1 }
0x1069   :  { %v4352_v55 = vld [vmem:[#allocation3] ss:$0 sm:$0xff] }
0x106a   :  { %v1392_v27 = vmax.f32 %v1390_v21, %v1391_v12 }
0x106c   :  { %vm1393_vm12 = vcmp.ge.f32.partialorder %v1385_v3, %v1392_v27 }
0x106d   :  { %v1394_v13 = vsel %vm1393_vm12, %v5800_v52, 8.0 }
0x106e   :  { %v1395_v19 = vsel %vm261_vm3, %v1394_v13, inf }
0x106f   :  { %v1396_v15 = vrot.slane %v1395_v19, 4 }
0x1071   :  { %v1397_v16 = vmin.f32 %v1395_v19, %v1396_v15 }
0x1073   :  { %v1398_v17 = vrot.slane %v1397_v16, 2 }
0x1075   :  { %v1399_v51 = vmin.f32 %v1397_v16, %v1398_v17 }
0x1077   :  { %v1400_v18 = vrot.slane %v1399_v51, 1 }
0x1079   :  { %v1401_v23 = vmin.f32 %v1399_v51, %v1400_v18 }
0x107b   :  { %vm1402_vm13 = vcmp.gt.f32.partialorder %v1401_v23, 6.5  ;;  %v1407_v25 = vsub.f32 %v5800_v52, %v1401_v23 }
0x107c   :  { %v1404_v26 = vsel %vm1402_vm13, 1.0, %v5467_v1 }
0x107d   :  { %v1405_v29 = vmax.f32 %v1403_v24, %v1404_v26  ;;  %v1408_v30 = vand.u32 2147483647, %v1407_v25 }
0x107f   :  { %vm1409_vm14 = vcmp.lt.f32.partialorder %v1408_v30, 0.5  ;;  %v1411_v31 = vsub.f32 1.0, %v1405_v29  ;;  %1406 = vst.msk [vmem:[#allocation6] sm:$0x1] %vm263_vm4, %v1405_v29 }
0x1080   :  { %v1410_v33 = vsel %vm1409_vm14, 1.0, %v5467_v1 }
0x1081   :  { %v1416_v32 = vrot.slane %v1411_v31, %v5729_v5 }
0x1083   :  { %v1418_v34 = vmul.f32 %v1416_v32, %v1410_v33 }
0x1085   :  { %1427 = vperm.xlu1 %5222, %v1418_v34   ;;  %4349 = vst.msk [vmem:[%s6402_s13 + $0x8] sm:$0xff] %vm261_vm3, %v1418_v34  ;;  %v1422_v35 = vmax.f32 %v1383_v63, %v1418_v34 }
0x1087   :  { %1423 = vst.msk [vmem:[#allocation5] sm:$0xff] %vm261_vm3, %v1422_v35 }
0x1104   :  { %v1428_v36 = vpop.permute.xlu1 %1427 }
0x1105   :  { %v1430_v37 = vmul.f32 %v1428_v36, %v5646_v20 }
0x1107   :  { %v1431_v38 = vsel %vm104_vm2, %v1430_v37, 0.0 }
0x1108   :  { %v1432_v39 = vrot.slane %v1431_v38, 4 }
0x110a   :  { %v1433_v40 = vadd.f32 %v1432_v39, %v1431_v38 }
0x110c   :  { %v1434_v42 = vrot.slane %v1433_v40, 2 }
0x110e   :  { %v1435_v44 = vadd.f32 %v1434_v42, %v1433_v40 }
0x1110   :  { %v1436_v45 = vrot.slane %v1435_v44, 1 }
0x1112   :  { %v1437_v46 = vadd.f32 %v1436_v45, %v1435_v44  ;;  %v2023_v44 = vld [vmem:[%s6391_s2] sm:$0xff]  ;;  %v2024_v45 = vld [vmem:[%s6391_s2 + $0x8] sm:$0xff] }
0x1114   :  { %1438 = vst.msk [vmem:[#allocation4] sm:$0x1] %vm255_vm1, %v1437_v46 }
0x111b   :  { %v1439_v47 = vld [vmem:[#allocation4] sm:$0x1] }
0x111c   :  { %4732 = vmatmul.mubr.msk.f32.vlgmr.msra.gmra.mrb[12].mxu1 %vm104_vm2, %v1439_v47  ;;  %v5945_v47 = vpack.c.bf16 %v2024_v45, %v2023_v44 }
0x111d   :  { %5079 = vmatpush3.bf16.msra.mxu1 %v5708_v58  ;;  %4753 = vmatprep.mubr.msk.f32.mxu1 %vm5466_vm0, %v5467_v1 }
0x111e   :  { %5080 = vmatprep.subr.bf16.mxu1 %v5465_v0 }
0x1121   :  { %5082 = vmatpush3.bf16.msra.mxu1 %v5711_v60 }
0x1122   :  { %5089 = vmatprep.subr.bf16.mxu1 %v5465_v0 }
0x11ef   :  { %v1592_v20 = vpop.f32.mrb[12].mxu1 }
0x11f0   :  { %v1593_v49 = vadd.f32 %v1592_v20, %v5870_v14  ;;  %v4733_v53 = vpop.f32.mrb[13].mxu1 }
0x11f2   :  { %v1597_v54 = vadd.f32 %v1596_v48, %v1593_v49  ;;  %v2025_v48 = vld [vmem:[%s6391_s2 + $0x10] sm:$0xff]  ;;  %v2026_v49 = vld [vmem:[%s6391_s2 + $0x18] sm:$0xff] }
0x11f3   :  { %v5955_v53 = vpack.c.bf16 %v2026_v49, %v2025_v48 }
0x11f4   :  { %5264 = vtanh.f32 %v1597_v54  ;;  %v1598_v56 = vmul.f32 0.5, %v1597_v54 }
0x11f6   :  { %5266 = vtanh.f32 %v1598_v56 }
0x11fe   :  { %v5265_v58 = vpop.eup %5264 }
0x11ff   :  { %1613 = vrot.lane.b32.xlu1 %v5265_v58, %s5468_s11 }
0x1200   :  { %v5267_v60 = vpop.eup %5266 }
0x1201   :  { %v1600_v57 = vmul.f32 0.5, %v5267_v60 }
0x1203   :  { %1608 = vrot.lane.b32.xlu1 %v4352_v55, %s5469_s22  ;;  %v1601_v59 = vadd.f32 0.5, %v1600_v57 }
0x1271   :  { %v1614_v61 = vpop.permute.xlu1 %1613 }
0x1272   :  { %v1616_v50 = vmul.f32 %v1614_v61, %v1601_v59 }
0x1274   :  { %1618 = vrot.lane.b32.xlu0 %v1616_v50, %s5469_s22 }
0x1275   :  { %v1609_v22 = vpop.permute.xlu1 %1608 }
0x1276   :  { %v1611_v14 = vmul.f32 %v1609_v22, %v1601_v59 }
0x12e6   :  { %v1619_v63 = vpop.permute.xlu0 %1618 }
0x12e7   :  { %v5920_v28 = vadd.f32 %v1619_v63, %v1611_v14 }
0x12e9   :  { %5268 = vtanh.f32 %v5920_v28 }
0x12f3   :  { %v5269_v3 = vpop.eup %5268 }
0x12f4   :  { %1624 = vrot.lane.b32.xlu1 %v5269_v3, %s5468_s11 }
0x1366   :  { %v1625_v6 = vpop.permute.xlu1 %1624 }
0x1367   :  { %v1627_v7 = vmul.f32 %v1625_v6, %v1601_v59 }
0x1369   :  { %1629 = vrot.lane.b32.xlu0 %v1627_v7, %s5469_s22 }
0x13db   :  { %v1630_v4 = vpop.permute.xlu0 %1629 }
0x13dc   :  { %1632 = vst.msk [vmem:[#allocation2] sm:$0x1] %vm255_vm1, %v1630_v4  ;;  %4743 = vmatmul.mubr.msk.f32.vlgmr.msra.gmra.mrb[14].mxu0 %vm104_vm2, %v1630_v4 }
0x13dd   :  { %5085 = vmatpush3.bf16.msra.mxu0 %v5764_v62  ;;  %4764 = vmatprep.mubr.msk.f32.mxu0 %vm5466_vm0, %v5467_v1 }
0x13de   :  { %5086 = vmatprep.subr.bf16.mxu0 %v5465_v0 }
0x13e1   :  { %5088 = vmatpush3.bf16.msra.mxu0 %v5767_v2 }
0x13e2   :  { %5095 = vmatprep.subr.bf16.mxu0 %v5465_v0 }
0x13e3   :  { %v2017_v54 = vld [vmem:[#allocation2] sm:$0x1] }
0x14af   :  { %v1712_v8 = vpop.f32.mrb[14].mxu0 }
0x14b0   :  { %v1719_v10 = vrot.slane %v1712_v8, %v5729_v5  ;;  %v4744_v21 = vpop.f32.mrb[15].mxu0 }
0x14b2   :  { %v1720_v12 = vadd.f32 %v1719_v10, %v5732_v9 }
0x14b4   :  { %5270 = vtanh.f32 %v1720_v12 }
0x14be   :  { %v5271_v27 = vpop.eup %5270 }
0x14bf   :  { %v1728_v13 = vmul.f32 %v5271_v27, %v5738_v11 }
0x14c1   :  { %v1729_v62 = vsel %vm104_vm2, %v1728_v13, 0.0 }
0x14c2   :  { %1730 = vadd.xlane.f32.xlu1 %v1729_v62 }
0x154f   :  { %v1731_v19 = vpop.xlane.xlu1 %1730 }
0x1550   :  { %v1732_v15 = vrot.slane %v1731_v19, 4 }
0x1552   :  { %v1733_v16 = vmax.f32 %v1731_v19, %v1732_v15 }
0x1554   :  { %v1734_v17 = vrot.slane %v1733_v16, 2 }
0x1556   :  { %v1735_v2 = vmax.f32 %v1733_v16, %v1734_v17  ;;  %v5364_v17 = vld [vmem:[#allocation8] sm:$0xff] }
0x1558   :  { %v1736_v51 = vrot.slane %v1735_v2, 1 }
0x155a   :  { %v1737_v18 = vmax.f32 %v1735_v2, %v1736_v51 }
0x155c   :  { %v1738_v23 = vsub.f32 %v1731_v19, %v1737_v18 }
0x155e   :  { %v1739_v24 = vmul.f32 1.442695, %v1738_v23 }
0x1560   :  { %5272 = vpow2.f32 %v1739_v24 }
0x156a   :  { %v5273_v25 = vpop.eup %5272 }
0x156b   :  { %v1741_v26 = vrot.slane %v5273_v25, 4 }
0x156d   :  { %v1742_v29 = vadd.f32 %v5273_v25, %v1741_v26 }
0x156f   :  { %v1743_v30 = vrot.slane %v1742_v29, 2 }
0x1571   :  { %v1744_v31 = vadd.f32 %v1743_v30, %v1742_v29 }
0x1573   :  { %v1745_v32 = vrot.slane %v1744_v31, 1 }
0x1575   :  { %v1746_v33 = vadd.f32 %v1745_v32, %v1744_v31 }
0x1577   :  { %5274 = vrcp.f32 %v1746_v33 }
0x1581   :  { %v5275_v34 = vpop.eup %5274 }
0x1582   :  { %v1748_v35 = vmul.f32 %v5275_v34, %v5273_v25 }
0x1584   :  { %v1749_v36 = vmul.f32 %v1748_v35, %v5732_v9 }
0x1586   :  { %v1750_v37 = vsel %vm104_vm2, %v1749_v36, 0.0 }
0x1587   :  { %v1751_v38 = vrot.slane %v1750_v37, 4 }
0x1589   :  { %v1752_v39 = vadd.f32 %v1751_v38, %v1750_v37  ;;  %v1960_v37 = vld [vmem:[#allocation5] sm:$0xff] }
0x158a   :  { %vm1961_vm15 = vcmp.gt.f32.partialorder %v1960_v37, 0.5 }
0x158b   :  { %v1753_v40 = vrot.slane %v1752_v39, 2 }
0x158d   :  { %v1754_v42 = vadd.f32 %v1753_v40, %v1752_v39 }
0x158f   :  { %v1755_v46 = vrot.slane %v1754_v42, 1 }
0x1591   :  { %v1756_v20 = vadd.f32 %v1755_v46, %v1754_v42 }
0x1593   :  { %4754 = vmatmul.mubr.msk.f32.vlgmr.msra.gmra.mrb[14].mxu1 %vm104_vm2, %v1756_v20 }
0x1594   :  { %5091 = vmatpush3.bf16.msra.mxu1 %v5945_v47  ;;  %4775 = vmatprep.mubr.msk.f32.mxu1 %vm5466_vm0, %v5467_v1 }
0x1595   :  { %5092 = vmatprep.subr.bf16.mxu1 %v5465_v0 }
0x1598   :  { %5094 = vmatpush3.bf16.msra.mxu1 %v5955_v53 }
0x1599   :  { %5101 = vmatprep.subr.bf16.mxu1 %v5465_v0 }
0x159b   :  { %4776 = vmatmul.mubr.msk.f32.vlgmr.msra.gmra.mrb[16].mxu1 %vm104_vm2, %v2017_v54 }
0x159c   :  { %4797 = vmatprep.mubr.msk.f32.mxu1 %vm5466_vm0, %v5467_v1 }
0x1666   :  { %v1826_v58 = vpop.f32.mrb[14].mxu1 }
0x1667   :  { %v1833_v55 = vrot.slane %v1826_v58, %v5729_v5  ;;  %v4755_v56 = vpop.f32.mrb[15].mxu1 }
0x1669   :  { %v1834_v60 = vadd.f32 %v1833_v55, %v5732_v9 }
0x166b   :  { %5276 = vtanh.f32 %v1834_v60 }
0x166e   :  { %v5967_v57 = vpop.f32.mrb[16].mxu1 }
0x166f   :  { %v4777_v59 = vpop.f32.mrb[17].mxu1 }
0x1675   :  { %v5277_v61 = vpop.eup %5276 }
0x1676   :  { %v1836_v50 = vmul.f32 %v5277_v61, %v5738_v11  ;;  %v1980_v61 = vld [vmem:[#allocation6] sm:$0x1] }
0x1678   :  { %v1837_v22 = vsel %vm104_vm2, %v1836_v50, 0.0 }
0x1679   :  { %1838 = vadd.xlane.f32.xlu0 %v1837_v22 }
0x1706   :  { %v1839_v14 = vpop.xlane.xlu0 %1838 }
0x1707   :  { %v1840_v63 = vrot.slane %v1839_v14, 4 }
0x1709   :  { %v1841_v3 = vmax.f32 %v1839_v14, %v1840_v63 }
0x170b   :  { %v1842_v6 = vrot.slane %v1841_v3, 2 }
0x170d   :  { %v1843_v7 = vmax.f32 %v1841_v3, %v1842_v6 }
0x170f   :  { %v1844_v4 = vrot.slane %v1843_v7, 1 }
0x1711   :  { %v1845_v8 = vmax.f32 %v1843_v7, %v1844_v4 }
0x1713   :  { %v1846_v10 = vsub.f32 %v1839_v14, %v1845_v8  ;;  %v2019_v8 = vld [vmem:[%s6390_s1] sm:$0xff] }
0x1715   :  { %v1847_v21 = vmul.f32 1.442695, %v1846_v10  ;;  %v2020_v10 = vld [vmem:[%s6390_s1 + $0x8] sm:$0xff] }
0x1717   :  { %5278 = vpow2.f32 %v1847_v21  ;;  %v6001_v21 = vpack.c.bf16 %v2020_v10, %v2019_v8 }
0x1721   :  { %v5279_v9 = vpop.eup %5278 }
0x1722   :  { %v1849_v12 = vrot.slane %v5279_v9, 4 }
0x1724   :  { %v1850_v27 = vadd.f32 %v5279_v9, %v1849_v12  ;;  %v2022_v12 = vld [vmem:[%s6390_s1 + $0x18] sm:$0xff] }
0x1726   :  { %v1851_v13 = vrot.slane %v1850_v27, 2 }
0x1728   :  { %v1852_v62 = vadd.f32 %v1851_v13, %v1850_v27  ;;  %v6018_v13 = vld [vmem:[%s6389_s0] sm:$0xff] }
0x172a   :  { %v1853_v19 = vrot.slane %v1852_v62, 1 }
0x172c   :  { %v1854_v11 = vadd.f32 %v1853_v19, %v1852_v62 }
0x172e   :  { %5280 = vrcp.f32 %v1854_v11 }
0x1738   :  { %v5281_v15 = vpop.eup %5280 }
0x1739   :  { %v1856_v16 = vmul.f32 %v5281_v15, %v5279_v9  ;;  %v2021_v9 = vld [vmem:[%s6390_s1 + $0x10] sm:$0xff] }
0x173a   :  { %v6010_v27 = vpack.c.bf16 %v2022_v12, %v2021_v9 }
0x173b   :  { %v1857_v2 = vmul.f32 %v5364_v17, %v1856_v16 }
0x173d   :  { %v1858_v51 = vsel %vm104_vm2, %v1857_v2, 0.0 }
0x173e   :  { %v1859_v18 = vrot.slane %v1858_v51, 4 }
0x1740   :  { %v1860_v23 = vadd.f32 %v1859_v18, %v1858_v51 }
0x1742   :  { %v1861_v24 = vrot.slane %v1860_v23, 2 }
0x1744   :  { %v1862_v25 = vadd.f32 %v1861_v24, %v1860_v23 }
0x1746   :  { %v1863_v26 = vrot.slane %v1862_v25, 1 }
0x1748   :  { %v1864_v29 = vadd.f32 %v1863_v26, %v1862_v25  ;;  %v2173_v25 = vld [vmem:[%s6392_s3] sm:$0x1] }
0x174a   :  { %4765 = vmatmul.mubr.msk.f32.vlgmr.msra.gmra.mrb[16].mxu0 %vm104_vm2, %v1864_v29 }
0x174b   :  { %4786 = vmatprep.mubr.msk.f32.mxu0 %vm5466_vm0, %v5467_v1  ;;  %5097 = vmatpush3.bf16.msra.mxu0 %v6001_v21 }
0x174c   :  { %5098 = vmatprep.subr.bf16.mxu0 %v5465_v0 }
0x174f   :  { %5100 = vmatpush3.bf16.msra.mxu0 %v6010_v27 }
0x1750   :  { %5107 = vmatprep.subr.bf16.mxu0 %v5465_v0 }
0x181d   :  { %v1938_v30 = vpop.f32.mrb[16].mxu0 }
0x181e   :  { %v1946_v31 = vrot.slane %v1938_v30, %v5729_v5  ;;  %v4766_v32 = vpop.f32.mrb[17].mxu0 }
0x1820   :  { %v1947_v33 = vadd.f32 %v1946_v31, %v5784_v41 }
0x1822   :  { %5282 = vtanh.f32 %v1947_v33 }
0x182c   :  { %v5283_v34 = vpop.eup %5282 }
0x182d   :  { %v1956_v35 = vmul.f32 %v5283_v34, %v5790_v43 }
0x182f   :  { %v1957_v36 = vsel %vm104_vm2, %v1956_v35, 0.0 }
0x1830   :  { %1958 = vadd.xlane.f32.xlu0 %v1957_v36 }
0x1846   :  { %1634 = vrot.lane.b32.xlu0 %v5920_v28, %s5470_s4 }
0x18bd   :  { %v1959_v38 = vpop.xlane.xlu0 %1958 }
0x18be   :  { %v1962_v39 = vsel %vm1961_vm15, -1000000.0, %v1959_v38 }
0x18bf   :  { %v1963_v40 = vsel %vm261_vm3, %v1962_v39, -inf }
0x18c0   :  { %v1964_v42 = vrot.slane %v1963_v40, 4 }
0x18c1   :  { %v1635_v44 = vpop.permute.xlu0 %1634 }
0x18c2   :  { %v1965_v45 = vmax.f32 %v1963_v40, %v1964_v42  ;;  %1637 = vst.msk [vmem:[#allocation3] sm:$0x1] %vm255_vm1, %v1635_v44  ;;  %v2217_v44 = vld [vmem:[#allocation13] sm:$0xff] }
0x18c4   :  { %v1966_v41 = vrot.slane %v1965_v45, 2 }
0x18c6   :  { %v1967_v46 = vmax.f32 %v1965_v45, %v1966_v41  ;;  %v2218_v45 = vld [vmem:[#allocation13 + $0x8] sm:$0xff]  ;;  %v2219_v41 = vld [vmem:[#allocation13 + $0x10] sm:$0xff] }
0x18c8   :  { %v1968_v43 = vrot.slane %v1967_v46, 1 }
0x18c9   :  { %v4361_v32 = vld [vmem:[#allocation3] ss:$0 sm:$0xff] }
0x18ca   :  { %v1969_v20 = vmax.f32 %v1967_v46, %v1968_v43  ;;  %v6036_v46 = vpack.c.bf16 %v2218_v45, %v2217_v44  ;;  %v2220_v43 = vld [vmem:[#allocation13 + $0x18] sm:$0xff]  ;;  %v2442_v45 = vld [vmem:[#allocation14] sm:$0xff] }
0x18cc   :  { %vm1970_vm5 = vcmp.ge.f32.partialorder %v1962_v39, %v1969_v20  ;;  %5103 = vmatpush3.bf16.msra.mxu1 %v6036_v46  ;;  %v6039_v20 = vpack.c.bf16 %v2220_v43, %v2219_v41  ;;  %v2443_v41 = vld [vmem:[#allocation14 + $0x8] sm:$0xff]  ;;  %v2444_v43 = vld [vmem:[#allocation14 + $0x10] sm:$0xff] }
0x18cd   :  { %v1971_v48 = vsel %vm1970_vm5, %v5800_v52, 8.0  ;;  %5104 = vmatprep.subr.bf16.mxu1 %v5465_v0 }
0x18ce   :  { %v1972_v28 = vsel %vm261_vm3, %v1971_v48, inf }
0x18cf   :  { %v1973_v49 = vrot.slane %v1972_v28, 4 }
0x18d0   :  { %5106 = vmatpush3.bf16.msra.mxu1 %v6039_v20 }
0x18d1   :  { %v1974_v54 = vmin.f32 %v1972_v28, %v1973_v49  ;;  %5113 = vmatprep.subr.bf16.mxu1 %v5465_v0 }
0x18d3   :  { %v1975_v58 = vrot.slane %v1974_v54, 2 }
0x18d5   :  { %v1976_v55 = vmin.f32 %v1974_v54, %v1975_v58 }
0x18d7   :  { %v1977_v56 = vrot.slane %v1976_v55, 1 }
0x18d9   :  { %v1978_v60 = vmin.f32 %v1976_v55, %v1977_v56 }
0x18db   :  { %vm1979_vm6 = vcmp.gt.f32.partialorder %v1978_v60, 6.5  ;;  %v1984_v59 = vsub.f32 %v5800_v52, %v1978_v60  ;;  %v6055_v60 = vld [vmem:[#allocation8] sm:$0xff] }
0x18dc   :  { %v1981_v50 = vsel %vm1979_vm6, 1.0, %v5467_v1 }
0x18dd   :  { %v1982_v22 = vmax.f32 %v1980_v61, %v1981_v50  ;;  %v1985_v14 = vand.u32 2147483647, %v1984_v59  ;;  %v6061_v61 = vld [vmem:[%s6396_s7] ss:$0 sm:$0xff] }
0x18df   :  { %vm1986_vm7 = vcmp.lt.f32.partialorder %v1985_v14, 0.5  ;;  %v1988_v63 = vsub.f32 1.0, %v1982_v22  ;;  %1983 = vst.msk [vmem:[#allocation6] sm:$0x1] %vm263_vm4, %v1982_v22 }
0x18e0   :  { %v1987_v6 = vsel %vm1986_vm7, 1.0, %v5467_v1 }
0x18e1   :  { %v1993_v3 = vrot.slane %v1988_v63, %v5729_v5 }
0x18e3   :  { %v1995_v7 = vmul.f32 %v1993_v3, %v1987_v6 }
0x18e5   :  { %2004 = vperm.xlu1 %5222, %v1995_v7   ;;  %4358 = vst.msk [vmem:[%s6402_s13 + $0x10] sm:$0xff] %vm261_vm3, %v1995_v7  ;;  %v1999_v4 = vmax.f32 %v1960_v37, %v1995_v7 }
0x18e7   :  { %2000 = vst.msk [vmem:[#allocation5] sm:$0xff] %vm261_vm3, %v1999_v4 }
0x1964   :  { %v2005_v62 = vpop.permute.xlu1 %2004 }
0x1965   :  { %v2007_v19 = vmul.f32 %v2005_v62, %v6018_v13 }
0x1967   :  { %v2008_v11 = vsel %vm104_vm2, %v2007_v19, 0.0 }
0x1968   :  { %v2009_v15 = vrot.slane %v2008_v11, 4 }
0x196a   :  { %v2010_v16 = vadd.f32 %v2009_v15, %v2008_v11 }
0x196c   :  { %v2011_v17 = vrot.slane %v2010_v16, 2 }
0x196e   :  { %v2012_v2 = vadd.f32 %v2011_v17, %v2010_v16 }
0x1970   :  { %v2013_v51 = vrot.slane %v2012_v2, 1 }
0x1972   :  { %v2014_v18 = vadd.f32 %v2013_v51, %v2012_v2 }
0x1974   :  { %2015 = vst.msk [vmem:[#allocation4] sm:$0x1] %vm255_vm1, %v2014_v18 }
0x197b   :  { %v2016_v23 = vld [vmem:[#allocation4] sm:$0x1] }
0x197c   :  { %4787 = vmatmul.mubr.msk.f32.vlgmr.msra.gmra.mrb[18].mxu0 %vm104_vm2, %v2016_v23 }
0x197d   :  { %4808 = vmatprep.mubr.msk.f32.mxu0 %vm5466_vm0, %v5467_v1  ;;  %5109 = vmatpush3.bf16.msra.mxu0 %v6036_v46 }
0x197e   :  { %5110 = vmatprep.subr.bf16.mxu0 %v5465_v0 }
0x1981   :  { %5112 = vmatpush3.bf16.msra.mxu0 %v6039_v20 }
0x1982   :  { %5119 = vmatprep.subr.bf16.mxu0 %v5465_v0 }
0x1a4f   :  { %v2169_v24 = vpop.f32.mrb[18].mxu0 }
0x1a50   :  { %v2170_v26 = vadd.f32 %v2169_v24, %v5967_v57  ;;  %v4788_v29 = vpop.f32.mrb[19].mxu0 }
0x1a52   :  { %v2174_v30 = vadd.f32 %v2173_v25, %v2170_v26 }
0x1a54   :  { %5284 = vtanh.f32 %v2174_v30  ;;  %v2175_v33 = vmul.f32 0.5, %v2174_v30 }
0x1a56   :  { %5286 = vtanh.f32 %v2175_v33 }
0x1a5e   :  { %v5285_v31 = vpop.eup %5284 }
0x1a5f   :  { %2190 = vrot.lane.b32.xlu1 %v5285_v31, %s5468_s11 }
0x1a60   :  { %v5287_v34 = vpop.eup %5286 }
0x1a61   :  { %v2177_v35 = vmul.f32 0.5, %v5287_v34 }
0x1a63   :  { %2185 = vrot.lane.b32.xlu1 %v4361_v32, %s5469_s22  ;;  %v2178_v36 = vadd.f32 0.5, %v2177_v35 }
0x1ad1   :  { %v2191_v37 = vpop.permute.xlu1 %2190 }
0x1ad2   :  { %v2193_v38 = vmul.f32 %v2191_v37, %v2178_v36 }
0x1ad4   :  { %2195 = vrot.lane.b32.xlu0 %v2193_v38, %s5469_s22 }
0x1ad5   :  { %v2186_v39 = vpop.permute.xlu1 %2185 }
0x1ad6   :  { %v2188_v57 = vmul.f32 %v2186_v39, %v2178_v36 }
0x1b46   :  { %v2196_v40 = vpop.permute.xlu0 %2195 }
0x1b47   :  { %v6033_v42 = vadd.f32 %v2196_v40, %v2188_v57 }
0x1b49   :  { %5288 = vtanh.f32 %v6033_v42 }
0x1b53   :  { %v5289_v48 = vpop.eup %5288 }
0x1b54   :  { %2201 = vrot.lane.b32.xlu1 %v5289_v48, %s5468_s11  ;;  %v6087_v48 = vpack.c.bf16 %v2443_v41, %v2442_v45 }
0x1bc6   :  { %v2202_v28 = vpop.permute.xlu1 %2201 }
0x1bc7   :  { %v2204_v49 = vmul.f32 %v2202_v28, %v2178_v36  ;;  %v2445_v28 = vld [vmem:[#allocation14 + $0x18] sm:$0xff] }
0x1bc9   :  { %2206 = vrot.lane.b32.xlu0 %v2204_v49, %s5469_s22  ;;  %v6090_v49 = vpack.c.bf16 %v2445_v28, %v2444_v43 }
0x1c3b   :  { %v2207_v54 = vpop.permute.xlu0 %2206 }
0x1c3c   :  { %2209 = vst.msk [vmem:[#allocation2] sm:$0x1] %vm255_vm1, %v2207_v54  ;;  %4798 = vmatmul.mubr.msk.f32.vlgmr.msra.gmra.mrb[18].mxu1 %vm104_vm2, %v2207_v54 }
0x1c3d   :  { %4819 = vmatprep.mubr.msk.f32.mxu1 %vm5466_vm0, %v5467_v1  ;;  %5115 = vmatpush3.bf16.msra.mxu1 %v6087_v48 }
0x1c3e   :  { %5116 = vmatprep.subr.bf16.mxu1 %v5465_v0 }
0x1c41   :  { %5118 = vmatpush3.bf16.msra.mxu1 %v6090_v49 }
0x1c42   :  { %5125 = vmatprep.subr.bf16.mxu1 %v5465_v0 }
0x1c43   :  { %v2594_v33 = vld [vmem:[#allocation2] sm:$0x1] }
0x1d0f   :  { %v2289_v58 = vpop.f32.mrb[18].mxu1 }
0x1d10   :  { %v2296_v55 = vrot.slane %v2289_v58, %v5729_v5  ;;  %v4799_v56 = vpop.f32.mrb[19].mxu1 }
0x1d12   :  { %v2297_v59 = vadd.f32 %v2296_v55, %v6055_v60 }
0x1d14   :  { %5290 = vtanh.f32 %v2297_v59 }
0x1d1e   :  { %v5291_v50 = vpop.eup %5290 }
0x1d1f   :  { %v2305_v22 = vmul.f32 %v5291_v50, %v6061_v61 }
0x1d21   :  { %v2306_v14 = vsel %vm104_vm2, %v2305_v22, 0.0 }
0x1d22   :  { %2307 = vadd.xlane.f32.xlu1 %v2306_v14 }
0x1daf   :  { %v2308_v63 = vpop.xlane.xlu1 %2307 }
0x1db0   :  { %v2309_v3 = vrot.slane %v2308_v63, 4 }
0x1db2   :  { %v2310_v6 = vmax.f32 %v2308_v63, %v2309_v3 }
0x1db4   :  { %v2311_v7 = vrot.slane %v2310_v6, 2 }
0x1db6   :  { %v2312_v4 = vmax.f32 %v2310_v6, %v2311_v7 }
0x1db8   :  { %v2313_v8 = vrot.slane %v2312_v4, 1 }
0x1dba   :  { %v2314_v10 = vmax.f32 %v2312_v4, %v2313_v8 }
0x1dbc   :  { %v2315_v9 = vsub.f32 %v2308_v63, %v2314_v10 }
0x1dbe   :  { %v2316_v12 = vmul.f32 1.442695, %v2315_v9 }
0x1dc0   :  { %5292 = vpow2.f32 %v2316_v12 }
0x1dca   :  { %v5293_v62 = vpop.eup %5292 }
0x1dcb   :  { %v2318_v19 = vrot.slane %v5293_v62, 4 }
0x1dcd   :  { %v2319_v11 = vadd.f32 %v5293_v62, %v2318_v19 }
0x1dcf   :  { %v2320_v15 = vrot.slane %v2319_v11, 2 }
0x1dd1   :  { %v2321_v16 = vadd.f32 %v2320_v15, %v2319_v11 }
0x1dd3   :  { %v2322_v17 = vrot.slane %v2321_v16, 1 }
0x1dd5   :  { %v2323_v2 = vadd.f32 %v2322_v17, %v2321_v16 }
0x1dd7   :  { %5294 = vrcp.f32 %v2323_v2 }
0x1de1   :  { %v5295_v51 = vpop.eup %5294 }
0x1de2   :  { %v2325_v18 = vmul.f32 %v5295_v51, %v5293_v62 }
0x1de4   :  { %v2326_v23 = vmul.f32 %v2325_v18, %v6055_v60 }
0x1de6   :  { %v2327_v24 = vsel %vm104_vm2, %v2326_v23, 0.0 }
0x1de7   :  { %v2328_v25 = vrot.slane %v2327_v24, 4 }
0x1de9   :  { %v2329_v26 = vadd.f32 %v2328_v25, %v2327_v24 }
0x1deb   :  { %v2330_v29 = vrot.slane %v2329_v26, 2 }
0x1ded   :  { %v2331_v30 = vadd.f32 %v2330_v29, %v2329_v26  ;;  %v6105_v26 = vld [vmem:[#allocation7] sm:$0xff] }
0x1def   :  { %v2332_v31 = vrot.slane %v2331_v30, 1 }
0x1df1   :  { %v2333_v32 = vadd.f32 %v2332_v31, %v2331_v30  ;;  %v6111_v30 = vld [vmem:[%s6398_s9] ss:$0 sm:$0xff] }
0x1df3   :  { %4809 = vmatmul.mubr.msk.f32.vlgmr.msra.gmra.mrb[20].mxu0 %vm104_vm2, %v2333_v32 }
0x1df4   :  { %5121 = vmatpush3.bf16.msra.mxu0 %v5945_v47  ;;  %4830 = vmatprep.mubr.msk.f32.mxu0 %vm5466_vm0, %v5467_v1 }
0x1df5   :  { %5122 = vmatprep.subr.bf16.mxu0 %v5465_v0 }
0x1df8   :  { %5124 = vmatpush3.bf16.msra.mxu0 %v5955_v53 }
0x1df9   :  { %5131 = vmatprep.subr.bf16.mxu0 %v5465_v0 }
0x1dfb   :  { %4831 = vmatmul.mubr.msk.f32.vlgmr.msra.gmra.mrb[22].mxu0 %vm104_vm2, %v2594_v33 }
0x1dfc   :  { %5133 = vmatpush3.bf16.msra.mxu0 %v6036_v46  ;;  %4852 = vmatprep.mubr.msk.f32.mxu0 %vm5466_vm0, %v5467_v1 }
0x1dfd   :  { %5134 = vmatprep.subr.bf16.mxu0 %v5465_v0 }
0x1e00   :  { %5136 = vmatpush3.bf16.msra.mxu0 %v6039_v20 }
0x1e01   :  { %5143 = vmatprep.subr.bf16.mxu0 %v5465_v0 }
0x1ec6   :  { %v2403_v34 = vpop.f32.mrb[20].mxu0 }
0x1ec7   :  { %v2410_v35 = vrot.slane %v2403_v34, %v5729_v5  ;;  %v4810_v36 = vpop.f32.mrb[21].mxu0  ;;  %v2537_v34 = vld [vmem:[#allocation5] sm:$0xff] }
0x1ec8   :  { %vm2538_vm8 = vcmp.gt.f32.partialorder %v2537_v34, 0.5 }
0x1ec9   :  { %v2411_v37 = vadd.f32 %v2410_v35, %v6055_v60 }
0x1ecb   :  { %5296 = vtanh.f32 %v2411_v37 }
0x1ece   :  { %v6083_v38 = vpop.f32.mrb[22].mxu0 }
0x1ecf   :  { %v4832_v39 = vpop.f32.mrb[23].mxu0 }
0x1ed5   :  { %v5297_v57 = vpop.eup %5296 }
0x1ed6   :  { %v2413_v40 = vmul.f32 %v5297_v57, %v6061_v61 }
0x1ed8   :  { %v2414_v44 = vsel %vm104_vm2, %v2413_v40, 0.0 }
0x1ed9   :  { %2415 = vadd.xlane.f32.xlu0 %v2414_v44 }
0x1f66   :  { %v2416_v54 = vpop.xlane.xlu0 %2415 }
0x1f67   :  { %v2417_v58 = vrot.slane %v2416_v54, 4 }
0x1f69   :  { %v2418_v55 = vmax.f32 %v2416_v54, %v2417_v58 }
0x1f6b   :  { %v2419_v56 = vrot.slane %v2418_v55, 2 }
0x1f6d   :  { %v2420_v59 = vmax.f32 %v2418_v55, %v2419_v56 }
0x1f6f   :  { %v2421_v50 = vrot.slane %v2420_v59, 1 }
0x1f71   :  { %v2422_v22 = vmax.f32 %v2420_v59, %v2421_v50 }
0x1f73   :  { %v2423_v14 = vsub.f32 %v2416_v54, %v2422_v22 }
0x1f75   :  { %v2424_v63 = vmul.f32 1.442695, %v2423_v14  ;;  %v2557_v14 = vld [vmem:[#allocation6] sm:$0x1] }
0x1f77   :  { %5298 = vpow2.f32 %v2424_v63 }
0x1f81   :  { %v5299_v3 = vpop.eup %5298 }
0x1f82   :  { %v2426_v6 = vrot.slane %v5299_v3, 4 }
0x1f84   :  { %v2427_v7 = vadd.f32 %v5299_v3, %v2426_v6 }
0x1f86   :  { %v2428_v4 = vrot.slane %v2427_v7, 2 }
0x1f88   :  { %v2429_v8 = vadd.f32 %v2428_v4, %v2427_v7 }
0x1f8a   :  { %v2430_v10 = vrot.slane %v2429_v8, 1 }
0x1f8c   :  { %v2431_v9 = vadd.f32 %v2430_v10, %v2429_v8 }
0x1f8e   :  { %5300 = vrcp.f32 %v2431_v9 }
0x1f98   :  { %v5301_v12 = vpop.eup %5300 }
0x1f99   :  { %v2433_v62 = vmul.f32 %v5301_v12, %v5299_v3 }
0x1f9b   :  { %v2434_v19 = vmul.f32 %v2433_v62, %v6055_v60 }
0x1f9d   :  { %v2435_v11 = vsel %vm104_vm2, %v2434_v19, 0.0 }
0x1f9e   :  { %v2436_v15 = vrot.slane %v2435_v11, 4 }
0x1fa0   :  { %v2437_v16 = vadd.f32 %v2436_v15, %v2435_v11 }
0x1fa2   :  { %v2438_v17 = vrot.slane %v2437_v16, 2 }
0x1fa4   :  { %v2439_v2 = vadd.f32 %v2438_v17, %v2437_v16 }
0x1fa6   :  { %v2440_v51 = vrot.slane %v2439_v2, 1 }
0x1fa8   :  { %v2441_v18 = vadd.f32 %v2440_v51, %v2439_v2 }
0x1faa   :  { %4820 = vmatmul.mubr.msk.f32.vlgmr.msra.gmra.mrb[20].mxu1 %vm104_vm2, %v2441_v18 }
0x1fab   :  { %5127 = vmatpush3.bf16.msra.mxu1 %v6001_v21  ;;  %4841 = vmatprep.mubr.msk.f32.mxu1 %vm5466_vm0, %v5467_v1 }
0x1fac   :  { %5128 = vmatprep.subr.bf16.mxu1 %v5465_v0 }
0x1faf   :  { %5130 = vmatpush3.bf16.msra.mxu1 %v6010_v27 }
0x1fb0   :  { %5137 = vmatprep.subr.bf16.mxu1 %v5465_v0 }
0x207d   :  { %v2515_v23 = vpop.f32.mrb[20].mxu1 }
0x207e   :  { %v2523_v24 = vrot.slane %v2515_v23, %v5729_v5  ;;  %v4821_v25 = vpop.f32.mrb[21].mxu1 }
0x2080   :  { %v2524_v29 = vadd.f32 %v2523_v24, %v6105_v26  ;;  %v2750_v24 = vld [vmem:[%s6392_s3] sm:$0x1] }
0x2082   :  { %5302 = vtanh.f32 %v2524_v29 }
0x208c   :  { %v5303_v31 = vpop.eup %5302 }
0x208d   :  { %v2533_v32 = vmul.f32 %v5303_v31, %v6111_v30 }
0x208f   :  { %v2534_v33 = vsel %vm104_vm2, %v2533_v32, 0.0 }
0x2090   :  { %2535 = vadd.xlane.f32.xlu0 %v2534_v33 }
0x20a6   :  { %2211 = vrot.lane.b32.xlu0 %v6033_v42, %s5470_s4 }
0x211d   :  { %v2536_v35 = vpop.xlane.xlu0 %2535 }
0x211e   :  { %v2539_v36 = vsel %vm2538_vm8, -1000000.0, %v2536_v35 }
0x211f   :  { %v2540_v37 = vsel %vm261_vm3, %v2539_v36, -inf }
0x2120   :  { %v2541_v39 = vrot.slane %v2540_v37, 4 }
0x2121   :  { %v2212_v57 = vpop.permute.xlu0 %2211 }
0x2122   :  { %v2542_v40 = vmax.f32 %v2540_v37, %v2541_v39  ;;  %2214 = vst.msk [vmem:[#allocation3] sm:$0x1] %vm255_vm1, %v2212_v57 }
0x2124   :  { %v2543_v44 = vrot.slane %v2542_v40, 2 }
0x2126   :  { %v2544_v45 = vmax.f32 %v2542_v40, %v2543_v44 }
0x2128   :  { %v2545_v41 = vrot.slane %v2544_v45, 1 }
0x2129   :  { %v4370_v33 = vld [vmem:[#allocation3] ss:$0 sm:$0xff] }
0x212a   :  { %v2546_v43 = vmax.f32 %v2544_v45, %v2545_v41 }
0x212c   :  { %vm2547_vm9 = vcmp.ge.f32.partialorder %v2539_v36, %v2546_v43 }
0x212d   :  { %v2548_v28 = vsel %vm2547_vm9, %v5800_v52, 8.0 }
0x212e   :  { %v2549_v42 = vsel %vm261_vm3, %v2548_v28, inf }
0x212f   :  { %v2550_v54 = vrot.slane %v2549_v42, 4 }
0x2131   :  { %v2551_v58 = vmin.f32 %v2549_v42, %v2550_v54 }
0x2133   :  { %v2552_v55 = vrot.slane %v2551_v58, 2 }
0x2135   :  { %v2553_v56 = vmin.f32 %v2551_v58, %v2552_v55 }
0x2137   :  { %v2554_v59 = vrot.slane %v2553_v56, 1 }
0x2139   :  { %v2555_v50 = vmin.f32 %v2553_v56, %v2554_v59 }
0x213b   :  { %vm2556_vm10 = vcmp.gt.f32.partialorder %v2555_v50, 6.5  ;;  %v2561_v22 = vsub.f32 %v5800_v52, %v2555_v50 }
0x213c   :  { %v2558_v63 = vsel %vm2556_vm10, 1.0, %v5467_v1 }
0x213d   :  { %v2559_v3 = vmax.f32 %v2557_v14, %v2558_v63  ;;  %v2562_v6 = vand.u32 2147483647, %v2561_v22 }
0x213f   :  { %vm2563_vm11 = vcmp.lt.f32.partialorder %v2562_v6, 0.5  ;;  %v2565_v7 = vsub.f32 1.0, %v2559_v3  ;;  %2560 = vst.msk [vmem:[#allocation6] sm:$0x1] %vm263_vm4, %v2559_v3 }
0x2140   :  { %v2564_v8 = vsel %vm2563_vm11, 1.0, %v5467_v1 }
0x2141   :  { %v2570_v4 = vrot.slane %v2565_v7, %v5729_v5 }
0x2143   :  { %v2572_v10 = vmul.f32 %v2570_v4, %v2564_v8 }
0x2145   :  { %2581 = vperm.xlu1 %5222, %v2572_v10   ;;  %4367 = vst.msk [vmem:[%s6402_s13 + $0x18] sm:$0xff] %vm261_vm3, %v2572_v10  ;;  %v2576_v9 = vmax.f32 %v2537_v34, %v2572_v10 }
0x2147   :  { %2577 = vst.msk [vmem:[#allocation5] sm:$0xff] %vm261_vm3, %v2576_v9 }
0x21c4   :  { %v2582_v12 = vpop.permute.xlu1 %2581 }
0x21c5   :  { %v2584_v62 = vmul.f32 %v2582_v12, %v6018_v13 }
0x21c7   :  { %v2585_v19 = vsel %vm104_vm2, %v2584_v62, 0.0 }
0x21c8   :  { %v2586_v11 = vrot.slane %v2585_v19, 4 }
0x21ca   :  { %v2587_v15 = vadd.f32 %v2586_v11, %v2585_v19 }
0x21cc   :  { %v2588_v16 = vrot.slane %v2587_v15, 2 }
0x21ce   :  { %v2589_v17 = vadd.f32 %v2588_v16, %v2587_v15 }
0x21d0   :  { %v2590_v2 = vrot.slane %v2589_v17, 1 }
0x21d2   :  { %v2591_v51 = vadd.f32 %v2590_v2, %v2589_v17 }
0x21d4   :  { %2592 = vst.msk [vmem:[#allocation4] sm:$0x1] %vm255_vm1, %v2591_v51 }
0x21db   :  { %v2593_v18 = vld [vmem:[#allocation4] sm:$0x1] }
0x21dc   :  { %4842 = vmatmul.mubr.msk.f32.vlgmr.msra.gmra.mrb[22].mxu1 %vm104_vm2, %v2593_v18 }
0x21dd   :  { %5139 = vmatpush3.bf16.msra.mxu1 %v6036_v46  ;;  %4863 = vmatprep.mubr.msk.f32.mxu1 %vm5466_vm0, %v5467_v1 }
0x21de   :  { %5140 = vmatprep.subr.bf16.mxu1 %v5465_v0 }
0x21e1   :  { %5142 = vmatpush3.bf16.msra.mxu1 %v6039_v20 }
0x21e2   :  { %5149 = vmatprep.subr.bf16.mxu1 %v5465_v0 }
0x22af   :  { %v2746_v23 = vpop.f32.mrb[22].mxu1 }
0x22b0   :  { %v2747_v25 = vadd.f32 %v2746_v23, %v6083_v38  ;;  %v4843_v29 = vpop.f32.mrb[23].mxu1 }
0x22b2   :  { %v2751_v31 = vadd.f32 %v2750_v24, %v2747_v25 }
0x22b4   :  { %5304 = vtanh.f32 %v2751_v31  ;;  %v2752_v34 = vmul.f32 0.5, %v2751_v31 }
0x22b6   :  { %5306 = vtanh.f32 %v2752_v34 }
0x22be   :  { %v5305_v32 = vpop.eup %5304 }
0x22bf   :  { %2767 = vrot.lane.b32.xlu1 %v5305_v32, %s5468_s11 }
0x22c0   :  { %v5307_v35 = vpop.eup %5306 }
0x22c1   :  { %v2754_v36 = vmul.f32 0.5, %v5307_v35 }
0x22c3   :  { %2762 = vrot.lane.b32.xlu1 %v4370_v33, %s5469_s22  ;;  %v2755_v37 = vadd.f32 0.5, %v2754_v36 }
0x2331   :  { %v2768_v39 = vpop.permute.xlu1 %2767 }
0x2332   :  { %v2770_v57 = vmul.f32 %v2768_v39, %v2755_v37 }
0x2334   :  { %2772 = vrot.lane.b32.xlu0 %v2770_v57, %s5469_s22 }
0x2335   :  { %v2763_v40 = vpop.permute.xlu1 %2762 }
0x2336   :  { %v2765_v38 = vmul.f32 %v2763_v40, %v2755_v37 }
0x23a6   :  { %v2773_v44 = vpop.permute.xlu0 %2772 }
0x23a7   :  { %v6148_v45 = vadd.f32 %v2773_v44, %v2765_v38 }
0x23a9   :  { %5308 = vtanh.f32 %v6148_v45 }
0x23b3   :  { %v5309_v41 = vpop.eup %5308 }
0x23b4   :  { %2778 = vrot.lane.b32.xlu1 %v5309_v41, %s5468_s11 }
0x2426   :  { %v2779_v43 = vpop.permute.xlu1 %2778 }
0x2427   :  { %v2781_v28 = vmul.f32 %v2779_v43, %v2755_v37 }
0x2429   :  { %2783 = vrot.lane.b32.xlu0 %v2781_v28, %s5469_s22 }
0x249b   :  { %v2784_v42 = vpop.permute.xlu0 %2783 }
0x249c   :  { %2786 = vst.msk [vmem:[#allocation2] sm:$0x1] %vm255_vm1, %v2784_v42  ;;  %4853 = vmatmul.mubr.msk.f32.vlgmr.msra.gmra.mrb[24].mxu0 %vm104_vm2, %v2784_v42 }
0x249d   :  { %5145 = vmatpush3.bf16.msra.mxu0 %v6087_v48  ;;  %4874 = vmatprep.mubr.msk.f32.mxu0 %vm5466_vm0, %v5467_v1 }
0x249e   :  { %5146 = vmatprep.subr.bf16.mxu0 %v5465_v0 }
0x24a1   :  { %5148 = vmatpush3.bf16.msra.mxu0 %v6090_v49 }
0x24a2   :  { %5155 = vmatprep.subr.bf16.mxu0 %v5465_v0 }
0x24a3   :  { %v3171_v34 = vld [vmem:[#allocation2] sm:$0x1] }
0x256f   :  { %v2866_v54 = vpop.f32.mrb[24].mxu0 }
0x2570   :  { %v2873_v58 = vrot.slane %v2866_v54, %v5729_v5  ;;  %v4854_v55 = vpop.f32.mrb[25].mxu0 }
0x2572   :  { %v2874_v56 = vadd.f32 %v2873_v58, %v6055_v60 }
0x2574   :  { %5310 = vtanh.f32 %v2874_v56 }
0x257e   :  { %v5311_v59 = vpop.eup %5310 }
0x257f   :  { %v2882_v50 = vmul.f32 %v5311_v59, %v6061_v61 }
0x2581   :  { %v2883_v22 = vsel %vm104_vm2, %v2882_v50, 0.0 }
0x2582   :  { %2884 = vadd.xlane.f32.xlu1 %v2883_v22 }
0x260f   :  { %v2885_v14 = vpop.xlane.xlu1 %2884 }
0x2610   :  { %v2886_v63 = vrot.slane %v2885_v14, 4 }
0x2612   :  { %v2887_v3 = vmax.f32 %v2885_v14, %v2886_v63 }
0x2614   :  { %v2888_v6 = vrot.slane %v2887_v3, 2 }
0x2616   :  { %v2889_v7 = vmax.f32 %v2887_v3, %v2888_v6 }
0x2618   :  { %v2890_v4 = vrot.slane %v2889_v7, 1 }
0x261a   :  { %v2891_v8 = vmax.f32 %v2889_v7, %v2890_v4 }
0x261c   :  { %v2892_v10 = vsub.f32 %v2885_v14, %v2891_v8 }
0x261e   :  { %v2893_v9 = vmul.f32 1.442695, %v2892_v10 }
0x2620   :  { %5312 = vpow2.f32 %v2893_v9 }
0x262a   :  { %v5313_v12 = vpop.eup %5312 }
0x262b   :  { %v2895_v62 = vrot.slane %v5313_v12, 4 }
0x262d   :  { %v2896_v19 = vadd.f32 %v5313_v12, %v2895_v62 }
0x262f   :  { %v2897_v11 = vrot.slane %v2896_v19, 2 }
0x2631   :  { %v2898_v15 = vadd.f32 %v2897_v11, %v2896_v19 }
0x2633   :  { %v2899_v16 = vrot.slane %v2898_v15, 1 }
0x2635   :  { %v2900_v17 = vadd.f32 %v2899_v16, %v2898_v15 }
0x2637   :  { %5314 = vrcp.f32 %v2900_v17 }
0x2641   :  { %v5315_v2 = vpop.eup %5314 }
0x2642   :  { %v2902_v51 = vmul.f32 %v5315_v2, %v5313_v12 }
0x2644   :  { %v2903_v18 = vmul.f32 %v2902_v51, %v6055_v60 }
0x2646   :  { %v2904_v23 = vsel %vm104_vm2, %v2903_v18, 0.0 }
0x2647   :  { %v2905_v24 = vrot.slane %v2904_v23, 4 }
0x2649   :  { %v2906_v25 = vadd.f32 %v2905_v24, %v2904_v23  ;;  %v3114_v24 = vld [vmem:[#allocation5] sm:$0xff] }
0x264a   :  { %vm3115_vm12 = vcmp.gt.f32.partialorder %v3114_v24, 0.5 }
0x264b   :  { %v2907_v29 = vrot.slane %v2906_v25, 2 }
0x264d   :  { %v2908_v31 = vadd.f32 %v2907_v29, %v2906_v25 }
0x264f   :  { %v2909_v32 = vrot.slane %v2908_v31, 1 }
0x2651   :  { %v2910_v33 = vadd.f32 %v2909_v32, %v2908_v31 }
0x2653   :  { %4864 = vmatmul.mubr.msk.f32.vlgmr.msra.gmra.mrb[24].mxu1 %vm104_vm2, %v2910_v33 }
0x2654   :  { %5151 = vmatpush3.bf16.msra.mxu1 %v5945_v47  ;;  %4885 = vmatprep.mubr.msk.f32.mxu1 %vm5466_vm0, %v5467_v1 }
0x2655   :  { %5152 = vmatprep.subr.bf16.mxu1 %v5465_v0 }
0x2658   :  { %5154 = vmatpush3.bf16.msra.mxu1 %v5955_v53 }
0x2659   :  { %5161 = vmatprep.subr.bf16.mxu1 %v5465_v0 }
0x265b   :  { %4886 = vmatmul.mubr.msk.f32.vlgmr.msra.gmra.mrb[26].mxu1 %vm104_vm2, %v3171_v34 }
0x265c   :  { %5163 = vmatpush3.bf16.msra.mxu1 %v6036_v46  ;;  %4907 = vmatprep.mubr.msk.f32.mxu1 %vm5466_vm0, %v5467_v1 }
0x265d   :  { %5164 = vmatprep.subr.bf16.mxu1 %v5465_v0 }
0x2660   :  { %5166 = vmatpush3.bf16.msra.mxu1 %v6039_v20 }
0x2661   :  { %5173 = vmatprep.subr.bf16.mxu1 %v5465_v0 }
0x2726   :  { %v2980_v47 = vpop.f32.mrb[24].mxu1 }
0x2727   :  { %v2987_v35 = vrot.slane %v2980_v47, %v5729_v5  ;;  %v4865_v53 = vpop.f32.mrb[25].mxu1 }
0x2729   :  { %v2988_v36 = vadd.f32 %v2987_v35, %v6055_v60 }
0x272b   :  { %5316 = vtanh.f32 %v2988_v36 }
0x272e   :  { %v6183_v37 = vpop.f32.mrb[26].mxu1 }
0x272f   :  { %v4887_v39 = vpop.f32.mrb[27].mxu1 }
0x2735   :  { %v5317_v57 = vpop.eup %5316 }
0x2736   :  { %v2990_v40 = vmul.f32 %v5317_v57, %v6061_v61 }
0x2738   :  { %v2991_v38 = vsel %vm104_vm2, %v2990_v40, 0.0 }
0x2739   :  { %2992 = vadd.xlane.f32.xlu0 %v2991_v38 }
0x27c6   :  { %v2993_v44 = vpop.xlane.xlu0 %2992 }
0x27c7   :  { %v2994_v41 = vrot.slane %v2993_v44, 4 }
0x27c9   :  { %v2995_v43 = vmax.f32 %v2993_v44, %v2994_v41 }
0x27cb   :  { %v2996_v28 = vrot.slane %v2995_v43, 2 }
0x27cd   :  { %v2997_v42 = vmax.f32 %v2995_v43, %v2996_v28  ;;  %v3134_v28 = vld [vmem:[#allocation6] sm:$0x1] }
0x27cf   :  { %v2998_v54 = vrot.slane %v2997_v42, 1 }
0x27d1   :  { %v2999_v58 = vmax.f32 %v2997_v42, %v2998_v54 }
0x27d3   :  { %v3000_v55 = vsub.f32 %v2993_v44, %v2999_v58 }
0x27d5   :  { %v3001_v56 = vmul.f32 1.442695, %v3000_v55 }
0x27d7   :  { %5318 = vpow2.f32 %v3001_v56 }
0x27e1   :  { %v5319_v59 = vpop.eup %5318 }
0x27e2   :  { %v3003_v50 = vrot.slane %v5319_v59, 4 }
0x27e4   :  { %v3004_v22 = vadd.f32 %v5319_v59, %v3003_v50 }
0x27e6   :  { %v3005_v14 = vrot.slane %v3004_v22, 2 }
0x27e8   :  { %v3006_v63 = vadd.f32 %v3005_v14, %v3004_v22 }
0x27ea   :  { %v3007_v3 = vrot.slane %v3006_v63, 1 }
0x27ec   :  { %v3008_v6 = vadd.f32 %v3007_v3, %v3006_v63 }
0x27ee   :  { %5320 = vrcp.f32 %v3008_v6 }
0x27f8   :  { %v5321_v7 = vpop.eup %5320 }
0x27f9   :  { %v3010_v4 = vmul.f32 %v5321_v7, %v5319_v59 }
0x27fb   :  { %v3011_v8 = vmul.f32 %v3010_v4, %v6055_v60 }
0x27fd   :  { %v3012_v10 = vsel %vm104_vm2, %v3011_v8, 0.0 }
0x27fe   :  { %v3013_v9 = vrot.slane %v3012_v10, 4 }
0x2800   :  { %v3014_v12 = vadd.f32 %v3013_v9, %v3012_v10 }
0x2802   :  { %v3015_v62 = vrot.slane %v3014_v12, 2 }
0x2804   :  { %v3016_v19 = vadd.f32 %v3015_v62, %v3014_v12  ;;  %v3327_v62 = vld [vmem:[%s6392_s3] sm:$0x1] }
0x2806   :  { %v3017_v11 = vrot.slane %v3016_v19, 1 }
0x2808   :  { %v3018_v15 = vadd.f32 %v3017_v11, %v3016_v19 }
0x280a   :  { %4875 = vmatmul.mubr.msk.f32.vlgmr.msra.gmra.mrb[26].mxu0 %vm104_vm2, %v3018_v15 }
0x280b   :  { %5157 = vmatpush3.bf16.msra.mxu0 %v6001_v21  ;;  %4896 = vmatprep.mubr.msk.f32.mxu0 %vm5466_vm0, %v5467_v1 }
0x280c   :  { %5158 = vmatprep.subr.bf16.mxu0 %v5465_v0 }
0x280f   :  { %5160 = vmatpush3.bf16.msra.mxu0 %v6010_v27 }
0x2810   :  { %5167 = vmatprep.subr.bf16.mxu0 %v5465_v0 }
0x28dd   :  { %v3092_v16 = vpop.f32.mrb[26].mxu0 }
0x28de   :  { %v3100_v17 = vrot.slane %v3092_v16, %v5729_v5  ;;  %v4876_v2 = vpop.f32.mrb[27].mxu0 }
0x28e0   :  { %v3101_v51 = vadd.f32 %v3100_v17, %v6105_v26 }
0x28e2   :  { %5322 = vtanh.f32 %v3101_v51 }
0x28ec   :  { %v5323_v18 = vpop.eup %5322 }
0x28ed   :  { %v3110_v23 = vmul.f32 %v5323_v18, %v6111_v30 }
0x28ef   :  { %v3111_v21 = vsel %vm104_vm2, %v3110_v23, 0.0 }
0x28f0   :  { %3112 = vadd.xlane.f32.xlu0 %v3111_v21 }
0x2906   :  { %2788 = vrot.lane.b32.xlu0 %v6148_v45, %s5470_s4 }
0x297d   :  { %v3113_v27 = vpop.xlane.xlu0 %3112 }
0x297e   :  { %v3116_v25 = vsel %vm3115_vm12, -1000000.0, %v3113_v27 }
0x297f   :  { %v3117_v29 = vsel %vm261_vm3, %v3116_v25, -inf }
0x2980   :  { %v3118_v31 = vrot.slane %v3117_v29, 4 }
0x2981   :  { %v2789_v32 = vpop.permute.xlu0 %2788 }
0x2982   :  { %v3119_v33 = vmax.f32 %v3117_v29, %v3118_v31  ;;  %2791 = vst.msk [vmem:[#allocation3] sm:$0x1] %vm255_vm1, %v2789_v32 }
0x2984   :  { %v3120_v34 = vrot.slane %v3119_v33, 2 }
0x2986   :  { %v3121_v47 = vmax.f32 %v3119_v33, %v3120_v34 }
0x2988   :  { %v3122_v35 = vrot.slane %v3121_v47, 1 }
0x2989   :  { %v4379_v16 = vld [vmem:[#allocation3] ss:$0 sm:$0xff] }
0x298a   :  { %v3123_v53 = vmax.f32 %v3121_v47, %v3122_v35 }
0x298c   :  { %vm3124_vm13 = vcmp.ge.f32.partialorder %v3116_v25, %v3123_v53 }
0x298d   :  { %v3125_v36 = vsel %vm3124_vm13, %v5800_v52, 8.0 }
0x298e   :  { %v3126_v45 = vsel %vm261_vm3, %v3125_v36, inf }
0x298f   :  { %v3127_v39 = vrot.slane %v3126_v45, 4 }
0x2991   :  { %v3128_v57 = vmin.f32 %v3126_v45, %v3127_v39 }
0x2993   :  { %v3129_v40 = vrot.slane %v3128_v57, 2 }
0x2995   :  { %v3130_v38 = vmin.f32 %v3128_v57, %v3129_v40 }
0x2997   :  { %v3131_v44 = vrot.slane %v3130_v38, 1 }
0x2999   :  { %v3132_v41 = vmin.f32 %v3130_v38, %v3131_v44 }
0x299b   :  { %vm3133_vm14 = vcmp.gt.f32.partialorder %v3132_v41, 6.5  ;;  %v3138_v43 = vsub.f32 %v5800_v52, %v3132_v41 }
0x299c   :  { %v3135_v42 = vsel %vm3133_vm14, 1.0, %v5467_v1 }
0x299d   :  { %v3136_v54 = vmax.f32 %v3134_v28, %v3135_v42  ;;  %v3139_v58 = vand.u32 2147483647, %v3138_v43 }
0x299f   :  { %vm3140_vm15 = vcmp.lt.f32.partialorder %v3139_v58, 0.5  ;;  %v3142_v55 = vsub.f32 1.0, %v3136_v54  ;;  %3137 = vst.msk [vmem:[#allocation6] sm:$0x1] %vm263_vm4, %v3136_v54 }
0x29a0   :  { %v3141_v59 = vsel %vm3140_vm15, 1.0, %v5467_v1 }
0x29a1   :  { %v3147_v56 = vrot.slane %v3142_v55, %v5729_v5 }
0x29a3   :  { %v3149_v50 = vmul.f32 %v3147_v56, %v3141_v59 }
0x29a5   :  { %3158 = vperm.xlu1 %5222, %v3149_v50   ;;  %4376 = vst.msk [vmem:[%s6402_s13 + $0x20] sm:$0xff] %vm261_vm3, %v3149_v50  ;;  %v3153_v22 = vmax.f32 %v3114_v24, %v3149_v50 }
0x29a7   :  { %3154 = vst.msk [vmem:[#allocation5] sm:$0xff] %vm261_vm3, %v3153_v22 }
0x2a24   :  { %v3159_v14 = vpop.permute.xlu1 %3158 }
0x2a25   :  { %v3161_v63 = vmul.f32 %v3159_v14, %v6018_v13 }
0x2a27   :  { %v3162_v3 = vsel %vm104_vm2, %v3161_v63, 0.0 }
0x2a28   :  { %v3163_v6 = vrot.slane %v3162_v3, 4 }
0x2a2a   :  { %v3164_v7 = vadd.f32 %v3163_v6, %v3162_v3 }
0x2a2c   :  { %v3165_v4 = vrot.slane %v3164_v7, 2 }
0x2a2e   :  { %v3166_v8 = vadd.f32 %v3165_v4, %v3164_v7 }
0x2a30   :  { %v3167_v10 = vrot.slane %v3166_v8, 1 }
0x2a32   :  { %v3168_v9 = vadd.f32 %v3167_v10, %v3166_v8  ;;  %v3754_v8 = vld [vmem:[%s6391_s2] sm:$0xff]  ;;  %v3755_v10 = vld [vmem:[%s6391_s2 + $0x8] sm:$0xff] }
0x2a34   :  { %3169 = vst.msk [vmem:[#allocation4] sm:$0x1] %vm255_vm1, %v3168_v9 }
0x2a3b   :  { %v3170_v12 = vld [vmem:[#allocation4] sm:$0x1] }
0x2a3c   :  { %4897 = vmatmul.mubr.msk.f32.vlgmr.msra.gmra.mrb[28].mxu0 %vm104_vm2, %v3170_v12  ;;  %v5180_v12 = vpack.c.bf16 %v3755_v10, %v3754_v8 }
0x2a3d   :  { %5169 = vmatpush3.bf16.msra.mxu0 %v6036_v46  ;;  %4918 = vmatprep.mubr.msk.f32.mxu0 %vm5466_vm0, %v5467_v1 }
0x2a3e   :  { %5170 = vmatprep.subr.bf16.mxu0 %v5465_v0 }
0x2a41   :  { %5172 = vmatpush3.bf16.msra.mxu0 %v6039_v20 }
0x2a42   :  { %5179 = vmatprep.subr.bf16.mxu0 %v5465_v0 }
0x2b0f   :  { %v3323_v13 = vpop.f32.mrb[28].mxu0 }
0x2b10   :  { %v3324_v19 = vadd.f32 %v3323_v13, %v6183_v37  ;;  %v4898_v11 = vpop.f32.mrb[29].mxu0 }
0x2b12   :  { %v3328_v15 = vadd.f32 %v3327_v62, %v3324_v19  ;;  %v3756_v62 = vld [vmem:[%s6391_s2 + $0x10] sm:$0xff]  ;;  %v3757_v19 = vld [vmem:[%s6391_s2 + $0x18] sm:$0xff] }
0x2b13   :  { %v5183_v11 = vpack.c.bf16 %v3757_v19, %v3756_v62 }
0x2b14   :  { %5324 = vtanh.f32 %v3328_v15  ;;  %v3329_v17 = vmul.f32 0.5, %v3328_v15 }
0x2b16   :  { %5326 = vtanh.f32 %v3329_v17 }
0x2b1e   :  { %v5325_v46 = vpop.eup %5324 }
0x2b1f   :  { %3344 = vrot.lane.b32.xlu1 %v5325_v46, %s5468_s11 }
0x2b20   :  { %v5327_v20 = vpop.eup %5326 }
0x2b21   :  { %v3331_v2 = vmul.f32 0.5, %v5327_v20 }
0x2b23   :  { %3339 = vrot.lane.b32.xlu1 %v4379_v16, %s5469_s22  ;;  %v3332_v51 = vadd.f32 0.5, %v3331_v2 }
0x2b91   :  { %v3345_v18 = vpop.permute.xlu1 %3344 }
0x2b92   :  { %v3347_v23 = vmul.f32 %v3345_v18, %v3332_v51 }
0x2b94   :  { %3349 = vrot.lane.b32.xlu0 %v3347_v23, %s5469_s22 }
0x2b95   :  { %v3340_v21 = vpop.permute.xlu1 %3339 }
0x2b96   :  { %v3342_v37 = vmul.f32 %v3340_v21, %v3332_v51 }
0x2c06   :  { %v3350_v24 = vpop.permute.xlu0 %3349 }
0x2c07   :  { %v6233_v27 = vadd.f32 %v3350_v24, %v3342_v37 }
0x2c09   :  { %5328 = vtanh.f32 %v6233_v27 }
0x2c13   :  { %v5329_v25 = vpop.eup %5328 }
0x2c14   :  { %3355 = vrot.lane.b32.xlu1 %v5329_v25, %s5468_s11 }
0x2c86   :  { %v3356_v29 = vpop.permute.xlu1 %3355 }
0x2c87   :  { %v3358_v31 = vmul.f32 %v3356_v29, %v3332_v51 }
0x2c89   :  { %3360 = vrot.lane.b32.xlu0 %v3358_v31, %s5469_s22 }
0x2cfb   :  { %v3361_v32 = vpop.permute.xlu0 %3360 }
0x2cfc   :  { %3363 = vst.msk [vmem:[#allocation2] sm:$0x1] %vm255_vm1, %v3361_v32  ;;  %4908 = vmatmul.mubr.msk.f32.vlgmr.msra.gmra.mrb[28].mxu1 %vm104_vm2, %v3361_v32 }
0x2cfd   :  { %5175 = vmatpush3.bf16.msra.mxu1 %v6087_v48  ;;  %4929 = vmatprep.mubr.msk.f32.mxu1 %vm5466_vm0, %v5467_v1 }
0x2cfe   :  { %5176 = vmatprep.subr.bf16.mxu1 %v5465_v0 }
0x2d01   :  { %5178 = vmatpush3.bf16.msra.mxu1 %v6090_v49 }
0x2d02   :  { %5185 = vmatprep.subr.bf16.mxu1 %v5465_v0 }
0x2d03   :  { %v3748_v15 = vld [vmem:[#allocation2] sm:$0x1] }
0x2dcf   :  { %v3443_v33 = vpop.f32.mrb[28].mxu1 }
0x2dd0   :  { %v3450_v34 = vrot.slane %v3443_v33, %v5729_v5  ;;  %v4909_v47 = vpop.f32.mrb[29].mxu1 }
0x2dd2   :  { %v3451_v35 = vadd.f32 %v3450_v34, %v6055_v60 }
0x2dd4   :  { %5330 = vtanh.f32 %v3451_v35 }
0x2dde   :  { %v5331_v53 = vpop.eup %5330 }
0x2ddf   :  { %v3459_v36 = vmul.f32 %v5331_v53, %v6061_v61 }
0x2de1   :  { %v3460_v48 = vsel %vm104_vm2, %v3459_v36, 0.0 }
0x2de2   :  { %3461 = vadd.xlane.f32.xlu1 %v3460_v48 }
0x2e6f   :  { %v3462_v45 = vpop.xlane.xlu1 %3461 }
0x2e70   :  { %v3463_v39 = vrot.slane %v3462_v45, 4 }
0x2e72   :  { %v3464_v57 = vmax.f32 %v3462_v45, %v3463_v39 }
0x2e74   :  { %v3465_v40 = vrot.slane %v3464_v57, 2 }
0x2e76   :  { %v3466_v49 = vmax.f32 %v3464_v57, %v3465_v40 }
0x2e78   :  { %v3467_v38 = vrot.slane %v3466_v49, 1 }
0x2e7a   :  { %v3468_v44 = vmax.f32 %v3466_v49, %v3467_v38 }
0x2e7c   :  { %v3469_v41 = vsub.f32 %v3462_v45, %v3468_v44 }
0x2e7e   :  { %v3470_v43 = vmul.f32 1.442695, %v3469_v41 }
0x2e80   :  { %5332 = vpow2.f32 %v3470_v43 }
0x2e8a   :  { %v5333_v28 = vpop.eup %5332 }
0x2e8b   :  { %v3472_v42 = vrot.slane %v5333_v28, 4 }
0x2e8d   :  { %v3473_v54 = vadd.f32 %v5333_v28, %v3472_v42 }
0x2e8f   :  { %v3474_v58 = vrot.slane %v3473_v54, 2 }
0x2e91   :  { %v3475_v55 = vadd.f32 %v3474_v58, %v3473_v54 }
0x2e93   :  { %v3476_v56 = vrot.slane %v3475_v55, 1 }
0x2e95   :  { %v3477_v59 = vadd.f32 %v3476_v56, %v3475_v55 }
0x2e97   :  { %5334 = vrcp.f32 %v3477_v59 }
0x2ea1   :  { %v5335_v50 = vpop.eup %5334 }
0x2ea2   :  { %v3479_v22 = vmul.f32 %v5335_v50, %v5333_v28 }
0x2ea4   :  { %v3480_v14 = vmul.f32 %v3479_v22, %v6055_v60 }
0x2ea6   :  { %v3481_v63 = vsel %vm104_vm2, %v3480_v14, 0.0  ;;  %v3691_v14 = vld [vmem:[#allocation5] sm:$0xff] }
0x2ea7   :  { %v3482_v3 = vrot.slane %v3481_v63, 4  ;;  %vm3692_vm5 = vcmp.gt.f32.partialorder %v3691_v14, 0.5 }
0x2ea9   :  { %v3483_v6 = vadd.f32 %v3482_v3, %v3481_v63 }
0x2eab   :  { %v3484_v7 = vrot.slane %v3483_v6, 2 }
0x2ead   :  { %v3485_v4 = vadd.f32 %v3484_v7, %v3483_v6 }
0x2eaf   :  { %v3486_v9 = vrot.slane %v3485_v4, 1 }
0x2eb1   :  { %v3487_v13 = vadd.f32 %v3486_v9, %v3485_v4 }
0x2eb3   :  { %4919 = vmatmul.mubr.msk.f32.vlgmr.msra.gmra.mrb[30].mxu0 %vm104_vm2, %v3487_v13 }
0x2eb4   :  { %5181 = vmatpush3.bf16.msra.mxu0 %v5180_v12  ;;  %4940 = vmatprep.mubr.msk.f32.mxu0 %vm5466_vm0, %v5467_v1 }
0x2eb5   :  { %5182 = vmatprep.subr.bf16.mxu0 %v5465_v0 }
0x2eb8   :  { %5184 = vmatpush3.bf16.msra.mxu0 %v5183_v11 }
0x2eb9   :  { %5191 = vmatprep.subr.bf16.mxu0 %v5465_v0 }
0x2ebb   :  { %4941 = vmatmul.mubr.msk.f32.vlgmr.msra.gmra.mrb[32].mxu0 %vm104_vm2, %v3748_v15 }
0x2ebc   :  { %4962 = vmatprep.mubr.msk.f32.mxu0 %vm5466_vm0, %v5467_v1 }
0x2f86   :  { %v3557_v46 = vpop.f32.mrb[30].mxu0 }
0x2f87   :  { %v3564_v16 = vrot.slane %v3557_v46, %v5729_v5  ;;  %v4920_v17 = vpop.f32.mrb[31].mxu0 }
0x2f88   :  { %v3711_v17 = vld [vmem:[#allocation6] sm:$0x1] }
0x2f89   :  { %v3565_v20 = vadd.f32 %v3564_v16, %v6055_v60 }
0x2f8b   :  { %5336 = vtanh.f32 %v3565_v20 }
0x2f8e   :  { %v6274_v2 = vpop.f32.mrb[32].mxu0 }
0x2f8f   :  { %v4942_v51 = vpop.f32.mrb[33].mxu0 }
0x2f95   :  { %v5337_v18 = vpop.eup %5336 }
0x2f96   :  { %v3567_v23 = vmul.f32 %v5337_v18, %v6061_v61 }
0x2f98   :  { %v3568_v21 = vsel %vm104_vm2, %v3567_v23, 0.0 }
0x2f99   :  { %3569 = vadd.xlane.f32.xlu0 %v3568_v21 }
0x3026   :  { %v3570_v37 = vpop.xlane.xlu0 %3569 }
0x3027   :  { %v3571_v24 = vrot.slane %v3570_v37, 4 }
0x3029   :  { %v3572_v25 = vmax.f32 %v3570_v37, %v3571_v24 }
0x302b   :  { %v3573_v29 = vrot.slane %v3572_v25, 2 }
0x302d   :  { %v3574_v31 = vmax.f32 %v3572_v25, %v3573_v29  ;;  %v3750_v29 = vld [vmem:[%s6390_s1] sm:$0xff] }
0x302f   :  { %v3575_v32 = vrot.slane %v3574_v31, 1 }
0x3031   :  { %v3576_v33 = vmax.f32 %v3574_v31, %v3575_v32  ;;  %v3751_v31 = vld [vmem:[%s6390_s1 + $0x8] sm:$0xff] }
0x3032   :  { %v5186_v32 = vpack.c.bf16 %v3751_v31, %v3750_v29 }
0x3033   :  { %v3577_v34 = vsub.f32 %v3570_v37, %v3576_v33  ;;  %v3752_v33 = vld [vmem:[%s6390_s1 + $0x10] sm:$0xff] }
0x3035   :  { %v3578_v47 = vmul.f32 1.442695, %v3577_v34  ;;  %v3753_v34 = vld [vmem:[%s6390_s1 + $0x18] sm:$0xff] }
0x3037   :  { %5338 = vpow2.f32 %v3578_v47  ;;  %v5189_v47 = vpack.c.bf16 %v3753_v34, %v3752_v33 }
0x3041   :  { %v5339_v35 = vpop.eup %5338 }
0x3042   :  { %v3580_v53 = vrot.slane %v5339_v35, 4 }
0x3044   :  { %v3581_v36 = vadd.f32 %v5339_v35, %v3580_v53 }
0x3046   :  { %v3582_v48 = vrot.slane %v3581_v36, 2 }
0x3048   :  { %v3583_v45 = vadd.f32 %v3582_v48, %v3581_v36 }
0x304a   :  { %v3584_v39 = vrot.slane %v3583_v45, 1 }
0x304c   :  { %v3585_v61 = vadd.f32 %v3584_v39, %v3583_v45 }
0x304e   :  { %5340 = vrcp.f32 %v3585_v61 }
0x3058   :  { %v5341_v57 = vpop.eup %5340 }
0x3059   :  { %v3587_v40 = vmul.f32 %v5341_v57, %v5339_v35  ;;  %v6320_v35 = vld [vmem:[%s6389_s0] sm:$0xff] }
0x305b   :  { %v3588_v49 = vmul.f32 %v3587_v40, %v6055_v60 }
0x305d   :  { %v3589_v38 = vsel %vm104_vm2, %v3588_v49, 0.0 }
0x305e   :  { %v3590_v44 = vrot.slane %v3589_v38, 4 }
0x3060   :  { %v3591_v41 = vadd.f32 %v3590_v44, %v3589_v38 }
0x3062   :  { %v3592_v43 = vrot.slane %v3591_v41, 2 }
0x3064   :  { %v3593_v28 = vadd.f32 %v3592_v43, %v3591_v41  ;;  %v3904_v41 = vld [vmem:[%s6392_s3] sm:$0x1] }
0x3066   :  { %v3594_v42 = vrot.slane %v3593_v28, 1 }
0x3068   :  { %v3595_v54 = vadd.f32 %v3594_v42, %v3593_v28 }
0x306a   :  { %4930 = vmatmul.mubr.msk.f32.vlgmr.msra.gmra.mrb[30].mxu1 %vm104_vm2, %v3595_v54 }
0x306b   :  { %4951 = vmatprep.mubr.msk.f32.mxu1 %vm5466_vm0, %v5467_v1  ;;  %5187 = vmatpush3.bf16.msra.mxu1 %v5186_v32 }
0x306c   :  { %5188 = vmatprep.subr.bf16.mxu1 %v5465_v0 }
0x306f   :  { %5190 = vmatpush3.bf16.msra.mxu1 %v5189_v47 }
0x3070   :  { %5197 = vmatprep.subr.bf16.mxu1 %v5465_v0 }
0x313d   :  { %v3669_v58 = vpop.f32.mrb[30].mxu1 }
0x313e   :  { %v3677_v55 = vrot.slane %v3669_v58, %v5729_v5  ;;  %v4931_v56 = vpop.f32.mrb[31].mxu1 }
0x3140   :  { %v3678_v59 = vadd.f32 %v3677_v55, %v6105_v26 }
0x3142   :  { %5342 = vtanh.f32 %v3678_v59 }
0x314c   :  { %v5343_v60 = vpop.eup %5342 }
0x314d   :  { %v3687_v50 = vmul.f32 %v5343_v60, %v6111_v30 }
0x314f   :  { %v3688_v22 = vsel %vm104_vm2, %v3687_v50, 0.0 }
0x3150   :  { %3689 = vadd.xlane.f32.xlu0 %v3688_v22 }
0x3166   :  { %3365 = vrot.lane.b32.xlu0 %v6233_v27, %s5470_s4 }
0x31dd   :  { %v3690_v63 = vpop.xlane.xlu0 %3689 }
0x31de   :  { %v3693_v3 = vsel %vm3692_vm5, -1000000.0, %v3690_v63 }
0x31df   :  { %v3694_v6 = vsel %vm261_vm3, %v3693_v3, -inf }
0x31e0   :  { %v3695_v7 = vrot.slane %v3694_v6, 4 }
0x31e1   :  { %v3366_v4 = vpop.permute.xlu0 %3365 }
0x31e2   :  { %v3696_v8 = vmax.f32 %v3694_v6, %v3695_v7  ;;  %3368 = vst.msk [vmem:[#allocation3] sm:$0x1] %vm255_vm1, %v3366_v4  ;;  %v3948_v6 = vld [vmem:[#allocation13] sm:$0xff]  ;;  %v3949_v7 = vld [vmem:[#allocation13 + $0x8] sm:$0xff]  ;;  %v3950_v4 = vld [vmem:[#allocation13 + $0x10] sm:$0xff] }
0x31e4   :  { %v3697_v26 = vrot.slane %v3696_v8, 2 }
0x31e6   :  { %v3698_v10 = vmax.f32 %v3696_v8, %v3697_v26  ;;  %v5192_v8 = vpack.c.bf16 %v3949_v7, %v3948_v6  ;;  %v3951_v26 = vld [vmem:[#allocation13 + $0x18] sm:$0xff] }
0x31e8   :  { %v3699_v30 = vrot.slane %v3698_v10, 1  ;;  %5193 = vmatpush3.bf16.msra.mxu0 %v5192_v8 }
0x31e9   :  { %v4388_v58 = vld [vmem:[#allocation3] ss:$0 sm:$0xff]  ;;  %5194 = vmatprep.subr.bf16.mxu0 %v5465_v0 }
0x31ea   :  { %v3700_v9 = vmax.f32 %v3698_v10, %v3699_v30  ;;  %v5195_v10 = vpack.c.bf16 %v3951_v26, %v3950_v4 }
0x31ec   :  { %vm3701_vm6 = vcmp.ge.f32.partialorder %v3693_v3, %v3700_v9  ;;  %5196 = vmatpush3.bf16.msra.mxu0 %v5195_v10 }
0x31ed   :  { %v3702_v12 = vsel %vm3701_vm6, %v5800_v52, 8.0  ;;  %5203 = vmatprep.subr.bf16.mxu0 %v5465_v0 }
0x31ee   :  { %v3703_v27 = vsel %vm261_vm3, %v3702_v12, inf }
0x31ef   :  { %v3704_v13 = vrot.slane %v3703_v27, 4 }
0x31f1   :  { %v3705_v62 = vmin.f32 %v3703_v27, %v3704_v13 }
0x31f3   :  { %v3706_v19 = vrot.slane %v3705_v62, 2 }
0x31f5   :  { %v3707_v11 = vmin.f32 %v3705_v62, %v3706_v19 }
0x31f7   :  { %v3708_v15 = vrot.slane %v3707_v11, 1 }
0x31f9   :  { %v3709_v46 = vmin.f32 %v3707_v11, %v3708_v15  ;;  %v6348_v11 = vld [vmem:[#allocation8] sm:$0xff] }
0x31fb   :  { %vm3710_vm7 = vcmp.gt.f32.partialorder %v3709_v46, 6.5  ;;  %v3715_v16 = vsub.f32 %v5800_v52, %v3709_v46  ;;  %v4390_v46 = vld [vmem:[%s6396_s7] ss:$0 sm:$0xff] }
0x31fc   :  { %v3712_v20 = vsel %vm3710_vm7, 1.0, %v5467_v1 }
0x31fd   :  { %v3713_v51 = vmax.f32 %v3711_v17, %v3712_v20  ;;  %v3716_v18 = vand.u32 2147483647, %v3715_v16 }
0x31ff   :  { %vm3717_vm8 = vcmp.lt.f32.partialorder %v3716_v18, 0.5  ;;  %v3719_v23 = vsub.f32 1.0, %v3713_v51  ;;  %3714 = vst.msk [vmem:[#allocation6] sm:$0x1] %vm263_vm4, %v3713_v51 }
0x3200   :  { %v3718_v37 = vsel %vm3717_vm8, 1.0, %v5467_v1 }
0x3201   :  { %v3724_v21 = vrot.slane %v3719_v23, %v5729_v5 }
0x3203   :  { %v3726_v24 = vmul.f32 %v3724_v21, %v3718_v37 }
0x3205   :  { %3735 = vperm.xlu1 %5222, %v3726_v24   ;;  %4385 = vst.msk [vmem:[%s6402_s13 + $0x28] sm:$0xff] %vm261_vm3, %v3726_v24  ;;  %v3730_v25 = vmax.f32 %v3691_v14, %v3726_v24 }
0x3207   :  { %3731 = vst.msk [vmem:[#allocation5] sm:$0xff] %vm261_vm3, %v3730_v25 }
0x3284   :  { %v3736_v53 = vpop.permute.xlu1 %3735 }
0x3285   :  { %v3738_v36 = vmul.f32 %v3736_v53, %v6320_v35 }
0x3287   :  { %v3739_v48 = vsel %vm104_vm2, %v3738_v36, 0.0 }
0x3288   :  { %v3740_v45 = vrot.slane %v3739_v48, 4 }
0x328a   :  { %v3741_v39 = vadd.f32 %v3740_v45, %v3739_v48 }
0x328c   :  { %v3742_v61 = vrot.slane %v3741_v39, 2 }
0x328e   :  { %v3743_v57 = vadd.f32 %v3742_v61, %v3741_v39 }
0x3290   :  { %v3744_v40 = vrot.slane %v3743_v57, 1 }
0x3292   :  { %v3745_v49 = vadd.f32 %v3744_v40, %v3743_v57 }
0x3294   :  { %3746 = vst.msk [vmem:[#allocation4] sm:$0x1] %vm255_vm1, %v3745_v49 }
0x329b   :  { %v3747_v38 = vld [vmem:[#allocation4] sm:$0x1] }
0x329c   :  { %4952 = vmatmul.mubr.msk.f32.vlgmr.msra.gmra.mrb[32].mxu1 %vm104_vm2, %v3747_v38 }
0x329d   :  { %4973 = vmatprep.mubr.msk.f32.mxu1 %vm5466_vm0, %v5467_v1  ;;  %5199 = vmatpush3.bf16.msra.mxu1 %v5192_v8 }
0x329e   :  { %5200 = vmatprep.subr.bf16.mxu1 %v5465_v0 }
0x32a1   :  { %5202 = vmatpush3.bf16.msra.mxu1 %v5195_v10 }
0x336f   :  { %v3900_v44 = vpop.f32.mrb[32].mxu1 }
0x3370   :  { %v3901_v43 = vadd.f32 %v3900_v44, %v6274_v2  ;;  %v4953_v28 = vpop.f32.mrb[33].mxu1 }
0x3372   :  { %v3905_v42 = vadd.f32 %v3904_v41, %v3901_v43 }
0x3374   :  { %5344 = vtanh.f32 %v3905_v42  ;;  %v3906_v55 = vmul.f32 0.5, %v3905_v42 }
0x3376   :  { %5346 = vtanh.f32 %v3906_v55 }
0x337e   :  { %v5345_v54 = vpop.eup %5344 }
0x337f   :  { %3921 = vrot.lane.b32.xlu1 %v5345_v54, %s5468_s11 }
0x3380   :  { %v5347_v56 = vpop.eup %5346 }
0x3381   :  { %v3908_v59 = vmul.f32 0.5, %v5347_v56 }
0x3383   :  { %3916 = vrot.lane.b32.xlu1 %v4388_v58, %s5469_s22  ;;  %v3909_v60 = vadd.f32 0.5, %v3908_v59 }
0x33f1   :  { %v3922_v50 = vpop.permute.xlu1 %3921 }
0x33f2   :  { %v3924_v22 = vmul.f32 %v3922_v50, %v3909_v60  ;;  %v4174_v50 = vld [vmem:[#allocation14 + $0x8] sm:$0xff] }
0x33f4   :  { %3926 = vrot.lane.b32.xlu0 %v3924_v22, %s5469_s22  ;;  %v4175_v22 = vld [vmem:[#allocation14 + $0x10] sm:$0xff] }
0x33f5   :  { %v3917_v14 = vpop.permute.xlu1 %3916 }
0x33f6   :  { %v3919_v2 = vmul.f32 %v3917_v14, %v3909_v60 }
0x3466   :  { %v3927_v63 = vpop.permute.xlu0 %3926 }
0x3467   :  { %v6335_v3 = vadd.f32 %v3927_v63, %v3919_v2  ;;  %v4176_v2 = vld [vmem:[#allocation14 + $0x18] sm:$0xff] }
0x3468   :  { %v5207_v63 = vpack.c.bf16 %v4176_v2, %v4175_v22 }
0x3469   :  { %5348 = vtanh.f32 %v6335_v3 }
0x3473   :  { %v5349_v30 = vpop.eup %5348 }
0x3474   :  { %3932 = vrot.lane.b32.xlu1 %v5349_v30, %s5468_s11 }
0x34e6   :  { %v3933_v9 = vpop.permute.xlu1 %3932 }
0x34e7   :  { %v3935_v12 = vmul.f32 %v3933_v9, %v3909_v60  ;;  %v4173_v60 = vld [vmem:[#allocation14] sm:$0xff] }
0x34e8   :  { %v5204_v14 = vpack.c.bf16 %v4174_v50, %v4173_v60  ;;  %v4288_v50 = vld [vmem:[#allocation6] sm:$0x1] }
0x34e9   :  { %3937 = vrot.lane.b32.xlu0 %v3935_v12, %s5469_s22 }
0x355b   :  { %v3938_v27 = vpop.permute.xlu0 %3937 }
0x355c   :  { %3940 = vst.msk [vmem:[#allocation2] sm:$0x1] %vm255_vm1, %v3938_v27  ;;  %4963 = vmatmul.mubr.msk.f32.vlgmr.msra.gmra.mrb[34].mxu0 %vm104_vm2, %v3938_v27 }
0x355d   :  { %4984 = vmatprep.mubr.msk.f32.mxu0 %vm5466_vm0, %v5467_v1  ;;  %5205 = vmatpush3.bf16.msra.mxu0 %v5204_v14 }
0x355e   :  { %5206 = vmatprep.subr.bf16.mxu0 %v5465_v0 }
0x3561   :  { %5208 = vmatpush3.bf16.msra.mxu0 %v5207_v63 }
0x362f   :  { %v4020_v13 = vpop.f32.mrb[34].mxu0 }
0x3630   :  { %v4027_v62 = vrot.slane %v4020_v13, %v5729_v5  ;;  %v4964_v19 = vpop.f32.mrb[35].mxu0 }
0x3632   :  { %v4028_v15 = vadd.f32 %v4027_v62, %v6348_v11 }
0x3634   :  { %5350 = vtanh.f32 %v4028_v15 }
0x363e   :  { %v5351_v16 = vpop.eup %5350 }
0x363f   :  { %v4036_v17 = vmul.f32 %v5351_v16, %v4390_v46 }
0x3641   :  { %v4037_v20 = vsel %vm104_vm2, %v4036_v17, 0.0 }
0x3642   :  { %4038 = vadd.xlane.f32.xlu1 %v4037_v20 }
0x36cf   :  { %v4039_v51 = vpop.xlane.xlu1 %4038 }
0x36d0   :  { %v4040_v18 = vrot.slane %v4039_v51, 4 }
0x36d2   :  { %v4041_v23 = vmax.f32 %v4039_v51, %v4040_v18 }
0x36d4   :  { %v4042_v21 = vrot.slane %v4041_v23, 2 }
0x36d6   :  { %v4043_v37 = vmax.f32 %v4041_v23, %v4042_v21 }
0x36d8   :  { %v4044_v24 = vrot.slane %v4043_v37, 1 }
0x36da   :  { %v4045_v25 = vmax.f32 %v4043_v37, %v4044_v24 }
0x36dc   :  { %v4046_v29 = vsub.f32 %v4039_v51, %v4045_v25 }
0x36de   :  { %v4047_v31 = vmul.f32 1.442695, %v4046_v29 }
0x36e0   :  { %5352 = vpow2.f32 %v4047_v31 }
0x36ea   :  { %v5353_v32 = vpop.eup %5352 }
0x36eb   :  { %v4049_v33 = vrot.slane %v5353_v32, 4 }
0x36ed   :  { %v4050_v34 = vadd.f32 %v5353_v32, %v4049_v33  ;;  %v4250_v33 = vld [vmem:[#allocation7] sm:$0xff] }
0x36ef   :  { %v4051_v47 = vrot.slane %v4050_v34, 2 }
0x36f1   :  { %v4052_v53 = vadd.f32 %v4051_v47, %v4050_v34 }
0x36f3   :  { %v4053_v36 = vrot.slane %v4052_v53, 1 }
0x36f5   :  { %v4054_v48 = vadd.f32 %v4053_v36, %v4052_v53 }
0x36f7   :  { %5354 = vrcp.f32 %v4054_v48  ;;  %v4268_v48 = vld [vmem:[#allocation5] sm:$0xff] }
0x36f8   :  { %vm4269_vm0 = vcmp.gt.f32.partialorder %v4268_v48, 0.5 }
0x3701   :  { %v5355_v45 = vpop.eup %5354 }
0x3702   :  { %v4056_v39 = vmul.f32 %v5355_v45, %v5353_v32 }
0x3704   :  { %v4057_v61 = vmul.f32 %v4056_v39, %v6348_v11 }
0x3706   :  { %v4058_v57 = vsel %vm104_vm2, %v4057_v61, 0.0 }
0x3707   :  { %v4059_v40 = vrot.slane %v4058_v57, 4 }
0x3709   :  { %v4060_v49 = vadd.f32 %v4059_v40, %v4058_v57 }
0x370b   :  { %v4061_v38 = vrot.slane %v4060_v49, 2 }
0x370d   :  { %v4062_v44 = vadd.f32 %v4061_v38, %v4060_v49 }
0x370f   :  { %v4063_v41 = vrot.slane %v4062_v44, 1 }
0x3711   :  { %v4064_v43 = vadd.f32 %v4063_v41, %v4062_v44 }
0x3713   :  { %4974 = vmatmul.mubr.msk.f32.vlgmr.msra.gmra.mrb[34].mxu1 %vm104_vm2, %v4064_v43 }
0x37e6   :  { %v4134_v28 = vpop.f32.mrb[34].mxu1 }
0x37e7   :  { %v4141_v42 = vrot.slane %v4134_v28, %v5729_v5  ;;  %v4975_v54 = vpop.f32.mrb[35].mxu1 }
0x37e9   :  { %v4142_v58 = vadd.f32 %v4141_v42, %v6348_v11 }
0x37eb   :  { %5356 = vtanh.f32 %v4142_v58 }
0x37f5   :  { %v5357_v55 = vpop.eup %5356 }
0x37f6   :  { %v4144_v56 = vmul.f32 %v5357_v55, %v4390_v46 }
0x37f8   :  { %v4145_v59 = vsel %vm104_vm2, %v4144_v56, 0.0 }
0x37f9   :  { %4146 = vadd.xlane.f32.xlu0 %v4145_v59 }
0x3886   :  { %v4147_v6 = vpop.xlane.xlu0 %4146 }
0x3887   :  { %v4148_v7 = vrot.slane %v4147_v6, 4 }
0x3889   :  { %v4149_v4 = vmax.f32 %v4147_v6, %v4148_v7 }
0x388b   :  { %v4150_v8 = vrot.slane %v4149_v4, 2 }
0x388d   :  { %v4151_v26 = vmax.f32 %v4149_v4, %v4150_v8 }
0x388f   :  { %v4152_v10 = vrot.slane %v4151_v26, 1 }
0x3891   :  { %v4153_v30 = vmax.f32 %v4151_v26, %v4152_v10 }
0x3893   :  { %v4154_v9 = vsub.f32 %v4147_v6, %v4153_v30 }
0x3895   :  { %v4155_v12 = vmul.f32 1.442695, %v4154_v9 }
0x3897   :  { %5358 = vpow2.f32 %v4155_v12 }
0x38a1   :  { %v5359_v27 = vpop.eup %5358 }
0x38a2   :  { %v4157_v13 = vrot.slane %v5359_v27, 4 }
0x38a4   :  { %v4158_v62 = vadd.f32 %v5359_v27, %v4157_v13 }
0x38a6   :  { %v4159_v19 = vrot.slane %v4158_v62, 2 }
0x38a8   :  { %v4160_v15 = vadd.f32 %v4159_v19, %v4158_v62 }
0x38aa   :  { %v4161_v46 = vrot.slane %v4160_v15, 1 }
0x38ac   :  { %v4162_v16 = vadd.f32 %v4161_v46, %v4160_v15 }
0x38ae   :  { %5360 = vrcp.f32 %v4162_v16 }
0x38b8   :  { %v5361_v0 = vpop.eup %5360 }
0x38b9   :  { %v4164_v17 = vmul.f32 %v5361_v0, %v5359_v27 }
0x38bb   :  { %v4165_v20 = vmul.f32 %v4164_v17, %v6348_v11  ;;  %v4393_v11 = vld [vmem:[%s6398_s9] ss:$0 sm:$0xff] }
0x38bd   :  { %v4166_v51 = vsel %vm104_vm2, %v4165_v20, 0.0 }
0x38be   :  { %v4167_v18 = vrot.slane %v4166_v51, 4 }
0x38c0   :  { %v4168_v23 = vadd.f32 %v4167_v18, %v4166_v51 }
0x38c2   :  { %v4169_v21 = vrot.slane %v4168_v23, 2 }
0x38c4   :  { %v4170_v37 = vadd.f32 %v4169_v21, %v4168_v23 }
0x38c6   :  { %v4171_v24 = vrot.slane %v4170_v37, 1 }
0x38c8   :  { %v4172_v25 = vadd.f32 %v4171_v24, %v4170_v37 }
0x38ca   :  { %4985 = vmatmul.mubr.msk.f32.vlgmr.msra.gmra.mrb[36].mxu0 %vm104_vm2, %v4172_v25 }
0x399d   :  { %v4246_v29 = vpop.f32.mrb[36].mxu0 }
0x399e   :  { %v4254_v31 = vrot.slane %v4246_v29, %v5729_v5  ;;  %v4986_v32 = vpop.f32.mrb[37].mxu0 }
0x39a0   :  { %v4255_v34 = vadd.f32 %v4254_v31, %v4250_v33 }
0x39a2   :  { %5362 = vtanh.f32 %v4255_v34 }
0x39ac   :  { %v5363_v47 = vpop.eup %5362 }
0x39ad   :  { %v4264_v53 = vmul.f32 %v5363_v47, %v4393_v11 }
0x39af   :  { %v4265_v36 = vsel %vm104_vm2, %v4264_v53, 0.0 }
0x39b0   :  { %4266 = vadd.xlane.f32.xlu0 %v4265_v36 }
0x39c6   :  { %3942 = vrot.lane.b32.xlu0 %v6335_v3, %s5470_s4 }
0x3a3d   :  { %v4267_v45 = vpop.xlane.xlu0 %4266 }
0x3a3e   :  { %v4270_v39 = vsel %vm4269_vm0, -1000000.0, %v4267_v45 }
0x3a3f   :  { %v4271_v61 = vsel %vm261_vm3, %v4270_v39, -inf }
0x3a40   :  { %v4272_v57 = vrot.slane %v4271_v61, 4 }
0x3a41   :  { %v3943_v40 = vpop.permute.xlu0 %3942 }
0x3a42   :  { %v4273_v49 = vmax.f32 %v4271_v61, %v4272_v57  ;;  %3945 = vst.msk [vmem:[#allocation3] sm:$0x1] %vm255_vm1, %v3943_v40 }
0x3a44   :  { %v4274_v38 = vrot.slane %v4273_v49, 2 }
0x3a46   :  { %v4275_v44 = vmax.f32 %v4273_v49, %v4274_v38 }
0x3a48   :  { %v4276_v41 = vrot.slane %v4275_v44, 1 }
0x3a4a   :  { %v4277_v43 = vmax.f32 %v4275_v44, %v4276_v41 }
0x3a4c   :  { %vm4278_vm9 = vcmp.ge.f32.partialorder %v4270_v39, %v4277_v43 }
0x3a4d   :  { %v4279_v28 = vsel %vm4278_vm9, %v5800_v52, 8.0 }
0x3a4e   :  { %v4280_v3 = vsel %vm261_vm3, %v4279_v28, inf }
0x3a4f   :  { %v4281_v42 = vrot.slane %v4280_v3, 4 }
0x3a51   :  { %v4282_v54 = vmin.f32 %v4280_v3, %v4281_v42 }
0x3a53   :  { %v4283_v58 = vrot.slane %v4282_v54, 2 }
0x3a55   :  { %v4284_v55 = vmin.f32 %v4282_v54, %v4283_v58 }
0x3a57   :  { %v4285_v56 = vrot.slane %v4284_v55, 1 }
0x3a59   :  { %v4286_v59 = vmin.f32 %v4284_v55, %v4285_v56 }
0x3a5b   :  { %vm4287_vm10 = vcmp.gt.f32.partialorder %v4286_v59, 6.5  ;;  %v4292_v60 = vsub.f32 %v5800_v52, %v4286_v59 }
0x3a5c   :  { %v4289_v22 = vsel %vm4287_vm10, 1.0, %v5467_v1 }
0x3a5d   :  { %v4290_v14 = vmax.f32 %v4288_v50, %v4289_v22  ;;  %v4293_v2 = vand.u32 2147483647, %v4292_v60 }
0x3a5f   :  { %vm4294_vm11 = vcmp.lt.f32.partialorder %v4293_v2, 0.5  ;;  %v4296_v63 = vsub.f32 1.0, %v4290_v14  ;;  %4291 = vst.msk [vmem:[#allocation6] sm:$0x1] %vm263_vm4, %v4290_v14 }
0x3a60   :  { %v4295_v7 = vsel %vm4294_vm11, 1.0, %v5467_v1 }
0x3a61   :  { %v4301_v6 = vrot.slane %v4296_v63, %v5729_v5 }
0x3a63   :  { %v4303_v4 = vmul.f32 %v4301_v6, %v4295_v7 }
0x3a65   :  { %4312 = vperm.xlu1 %5222, %v4303_v4   ;;  %4394 = vst.msk [vmem:[%s6402_s13 + $0x30] sm:$0xff] %vm261_vm3, %v4303_v4  ;;  %v4307_v52 = vmax.f32 %v4268_v48, %v4303_v4 }
0x3a67   :  { %4308 = vst.msk [vmem:[#allocation5] sm:$0xff] %vm261_vm3, %v4307_v52 }
0x3ae4   :  { %v4313_v8 = vpop.permute.xlu1 %4312 }
0x3ae5   :  { %v4315_v26 = vmul.f32 %v4313_v8, %v6320_v35 }
0x3ae7   :  { %v4316_v10 = vsel %vm104_vm2, %v4315_v26, 0.0 }
0x3ae8   :  { %v4317_v30 = vrot.slane %v4316_v10, 4 }
0x3aea   :  { %v4318_v9 = vadd.f32 %v4317_v30, %v4316_v10 }
0x3aec   :  { %v4319_v5 = vrot.slane %v4318_v9, 2 }
0x3aee   :  { %v4320_v12 = vadd.f32 %v4319_v5, %v4318_v9 }
0x3af0   :  { %v4321_v1 = vrot.slane %v4320_v12, 1 }
0x3af2   :  { %v4322_v27 = vadd.f32 %v4321_v1, %v4320_v12 }
0x3af4   :  { %4323 = vst.msk [vmem:[#allocation4] sm:$0x1] %vm255_vm1, %v4322_v27 }
0x3af5   :  { %4328 = vsyncpa [#allocation10], 1 }
0x3af6   :  { %4329 = vsyncpa [#allocation12], 1 }
0x3af7   :  { %4330 = vsyncpa [#allocation15], 1 }

</bundles_post_ra>
